<compile_context>
chip_gen: v5e
topology: v5e:2x2
jax: 0.10.0
libtpu: 0.0.40
codegen_flags: <defaults>
</compile_context>

<pallas_src>
import jax
import jax.numpy as jnp
from jax.experimental import pallas as pl
from jax.experimental.pallas import tpu as pltpu

LEAKY_SLOPE = 0.01   # nn.LeakyReLU default
BN_EPS = 1e-5        # nn.BatchNorm1d default
NORM_EPS = 1e-12     # F.normalize default


# ----------------------------- Pallas kernel ------------------------------ #
def gmpa_kernel(x_ref, wmask_ref, wout_ref, ff_ref, scale_ref, shift_ref,
                fc_ref, p_ref, q_ref, out_feat_ref, out_logits_ref):
    """Single invocation; all bins are processed as the batch dim of bmm's.

    x_ref      : [nb, B, T, C]
    wmask_ref  : [nb, C, R]        fc_mask weight (transposed)
    wout_ref   : [nb, C*R, C]      to_out weight (transposed; rows are c-major, r-minor)
    ff_ref     : [nb, C, out_c]    FForward
    scale_ref  : [nb, 1, out_c]    folded BN scale = gamma * rsqrt(var + eps)
    shift_ref  : [nb, 1, out_c]    folded BN shift = beta - mean * scale
    fc_ref     : [nb, out_c, ncls] fc1d, pre-normalized along out_c
    p_ref      : [C, C*R]          P[c', c*R+r] = (c' == c)  (lane expansion)
    q_ref      : [R, C*R]          Q[r', c*R+r] = (r' == r)  (lane tiling)
    out_feat_ref   : [B, nb, out_c]
    out_logits_ref : [B, nb, ncls]
    """
    nb, B, T, C = x_ref.shape
    R = wmask_ref.shape[-1]

    x = x_ref[...]                                        # [nb, B, T, C]

    # ---- GMPABlock: context mask = softmax_T(x @ Wmask) ----
    xk = x.reshape(nb, B * T, C)                          # [nb, B*T, C]
    cm = jnp.einsum('nkc,ncr->nkr', xk, wmask_ref[...],
                    preferred_element_type=jnp.float32)   # [nb, B*T, R]
    cm = cm.reshape(nb * B, T, R)                         # softmax over T
    cm = cm - jnp.max(cm, axis=1, keepdims=True)
    cm = jnp.exp(cm)
    cm = cm / jnp.sum(cm, axis=1, keepdims=True)

    # ---- flattened aggregate: agg[n,b,c*R+r] = sum_t x[n,b,t,c]*cm[n,b,t,r] ----
    # Built lane-dense (C*R = 256 lanes) without any minor-dim reshape: expand x
    # and cm to C*R lanes via constant 0/1 matmuls, multiply, reduce over T.
    x2 = x.reshape(nb * B * T, C)                         # [nb*B*T, C]
    cm2 = cm.reshape(nb * B * T, R)                       # [nb*B*T, R]
    x_rep = jnp.dot(x2, p_ref[...], preferred_element_type=jnp.float32)    # [nb*B*T, C*R]
    cm_rep = jnp.dot(cm2, q_ref[...], preferred_element_type=jnp.float32)  # [nb*B*T, C*R]
    z = (x_rep * cm_rep).reshape(nb * B, T, C * R)
    agg = jnp.sum(z, axis=1).reshape(nb, B, C * R)        # [nb, B, C*R]

    # ---- to_out: one (C*R)-deep contraction per bin (batched) + LeakyReLU ----
    o = jnp.einsum('nbq,nqc->nbc', agg, wout_ref[...],
                   preferred_element_type=jnp.float32)    # [nb, B, C]
    o = jnp.where(o >= 0, o, LEAKY_SLOPE * o)

    # ---- residual add (broadcast over T) + temporal max ----
    y = x.reshape(nb * B, T, C) + o.reshape(nb * B, C)[:, None, :]
    feat = jnp.max(y, axis=1).reshape(nb, B, C)           # [nb, B, C]

    # ---- FForward projection (this is the returned "outputs") ----
    outp = jnp.einsum('nbc,nco->nbo', feat, ff_ref[...],
                      preferred_element_type=jnp.float32) # [nb, B, out_c]

    # ---- folded BatchNorm (eval) + L2 normalize ----
    bn = outp * scale_ref[...] + shift_ref[...]
    nrm = jnp.sqrt(jnp.sum(bn * bn, axis=-1, keepdims=True))
    bn = bn / jnp.maximum(nrm, NORM_EPS)

    # ---- class projection (fc pre-normalized along out_c) ----
    logits = jnp.einsum('nbo,nok->nbk', bn, fc_ref[...],
                        preferred_element_type=jnp.float32)   # [nb, B, ncls]

    # ---- store directly in the final [B, nb, *] layout (no wrapper transpose) ----
    for b in range(B):                                    # B is small & static
        out_feat_ref[b] = outp[:, b, :]
        out_logits_ref[b] = logits[:, b, :]


# ------------------------------- Wrapper ----------------------------------- #
def gmpa_head_pallas(x_bins, params):
    """x_bins: [num_bins, B, T, C] float32.  Returns (outputs, logits)."""
    num_bins, B, T, C = x_bins.shape
    R = params['wmask'].shape[-1]
    out_c = params['ff'].shape[-1]
    ncls = params['fc'].shape[-1]

    # ---- weight-only prep (input independent; hoisted out of the kernel) ----
    scale = params['gamma'] * jax.lax.rsqrt(params['rvar'] + BN_EPS)      # [nb,1,out_c]
    shift = params['beta'] - params['rmean'] * scale                      # [nb,1,out_c]
    fc = params['fc']
    fc_n = fc / jnp.maximum(
        jnp.sqrt(jnp.sum(fc * fc, axis=1, keepdims=True)), NORM_EPS)      # normalize over out_c
    # constant lane-expansion matrices for the flattened (c,r) aggregate
    P = jnp.kron(jnp.eye(C, dtype=jnp.float32), jnp.ones((1, R), jnp.float32))  # [C, C*R]
    Q = jnp.kron(jnp.ones((1, C), jnp.float32), jnp.eye(R, dtype=jnp.float32))  # [R, C*R]

    vmem = pl.BlockSpec(memory_space=pltpu.MemorySpace.VMEM)
    outputs, logits = pl.pallas_call(
        gmpa_kernel,
        out_shape=(jax.ShapeDtypeStruct((B, num_bins, out_c), jnp.float32),
                   jax.ShapeDtypeStruct((B, num_bins, ncls), jnp.float32)),
        in_specs=[vmem] * 9,
        out_specs=(vmem, vmem),
    )(x_bins, params['wmask'], params['wout'], params['ff'],
      scale, shift, fc_n, P, Q)
    return outputs, logits


# ------------------------------ Glue (JAX) -------------------------------- #
def horizontal_mapping(x, num_parts):
    """GaitPart-style HPP: x [B, C, T, H, W] -> [B, T, C, num_bins]."""
    B, C, T, H, W = x.shape
    feats = []
    for p in num_parts:
        xr = x.reshape(B, C, T, p, H // p, W)
        f = jnp.max(xr, axis=(4, 5)) + jnp.mean(xr, axis=(4, 5))   # [B, C, T, p]
        feats.append(f)
    out = jnp.concatenate(feats, axis=3)                           # [B, C, T, bins]
    return jnp.transpose(out, (0, 2, 1, 3))                        # [B, T, C, bins]


def init_params(key, num_bins, C, R, out_c, ncls):
    def xavier(k, shape, fan_in, fan_out):
        lim = (6.0 / (fan_in + fan_out)) ** 0.5
        return jax.random.uniform(k, shape, jnp.float32, -lim, lim)

    ks = jax.random.split(key, 8)
    return dict(
        # fc_mask.weight [R, C] stored transposed as [C, R]
        wmask=xavier(ks[0], (num_bins, C, R), C, R),
        # to_out Linear weight [C, C*R] stored transposed as [C*R, C]
        # (row index = c*R + r, matching the PyTorch c-major flatten of x^T @ cm)
        wout=xavier(ks[1], (num_bins, C * R, C), C * R, C),
        ff=xavier(ks[2], (num_bins, C, out_c), C, out_c),
        fc=xavier(ks[3], (num_bins, out_c, ncls), out_c, ncls),
        gamma=jax.random.uniform(ks[4], (num_bins, 1, out_c), jnp.float32, 0.5, 1.5),
        beta=0.1 * jax.random.normal(ks[5], (num_bins, 1, out_c), jnp.float32),
        rmean=0.1 * jax.random.normal(ks[6], (num_bins, 1, out_c), jnp.float32),
        rvar=jax.random.uniform(ks[7], (num_bins, 1, out_c), jnp.float32, 0.5, 1.5),
    )


# ------------------------------ Reference ---------------------------------- #
def reference(x_bins, params):
    num_bins, B, T, C = x_bins.shape
    outs, logs = [], []
    for i in range(num_bins):
        x = x_bins[i]
        cm = jax.nn.softmax(x @ params['wmask'][i], axis=1)
        agg = jnp.einsum('btc,btr->bcr', x, cm).reshape(B, -1)   # c-major flatten
        o = agg @ params['wout'][i]
        o = jnp.where(o >= 0, o, LEAKY_SLOPE * o)
        feat = jnp.max(x + o[:, None, :], axis=1)
        outp = feat @ params['ff'][i]
        bn = (outp - params['rmean'][i]) / jnp.sqrt(params['rvar'][i] + BN_EPS)
        bn = bn * params['gamma'][i] + params['beta'][i]
        bn = bn / jnp.maximum(jnp.linalg.norm(bn, axis=-1, keepdims=True), NORM_EPS)
        fc = params['fc'][i]
        fc = fc / jnp.maximum(jnp.linalg.norm(fc, axis=0, keepdims=True), NORM_EPS)
        outs.append(outp)
        logs.append(bn @ fc)
    outputs = jnp.transpose(jnp.stack(outs, 0), (1, 0, 2))
    logits = jnp.transpose(jnp.stack(logs, 0), (1, 0, 2))
    return outputs, logits


# --------------------------------- Main ------------------------------------ #
if __name__ == "__main__":
    B, C, T, H, W = 2, 32, 8, 16, 8
    num_parts = [1, 2, 4]
    num_bins = sum(num_parts)        # 7
    reduction = 8
    out_channels = 32
    num_classes = 16

    key = jax.random.PRNGKey(0)
    kx, kp = jax.random.split(key)
    x = jax.random.normal(kx, (B, C, T, H, W), jnp.float32)
    params = init_params(kp, num_bins, C, reduction, out_channels, num_classes)

    # HorizontalMapping (glue) -> [B, T, C, num_bins] -> bin-major for the kernel
    xh = horizontal_mapping(x, num_parts)
    x_bins = jnp.transpose(xh, (3, 0, 1, 2))     # [num_bins, B, T, C]

    outputs, logits = gmpa_head_pallas(x_bins, params)
    outputs = jax.block_until_ready(outputs)
    logits = jax.block_until_ready(logits)

    ref_out, ref_log = reference(x_bins, params)
    assert outputs.shape == (B, num_bins, out_channels)
    assert logits.shape == (B, num_bins, num_classes)
    assert jnp.allclose(outputs, ref_out, rtol=1e-4, atol=1e-4)
    assert jnp.allclose(logits, ref_log, rtol=1e-4, atol=1e-4)

    print("KERNEL_OK")
</pallas_src>

<mosaic_0001>
module attributes {stable_mosaic.version = 11 : i64} {
  func.func @gmpa_kernel(%arg0: memref<7x2x8x32xf32, #tpu.memory_space<vmem>>, %arg1: memref<7x32x8xf32, #tpu.memory_space<vmem>>, %arg2: memref<7x256x32xf32, #tpu.memory_space<vmem>>, %arg3: memref<7x32x32xf32, #tpu.memory_space<vmem>>, %arg4: memref<7x1x32xf32, #tpu.memory_space<vmem>>, %arg5: memref<7x1x32xf32, #tpu.memory_space<vmem>>, %arg6: memref<7x32x16xf32, #tpu.memory_space<vmem>>, %arg7: memref<32x256xf32, #tpu.memory_space<vmem>>, %arg8: memref<8x256xf32, #tpu.memory_space<vmem>>, %arg9: memref<2x7x32xf32, #tpu.memory_space<vmem>>, %arg10: memref<2x7x16xf32, #tpu.memory_space<vmem>>) attributes {dimension_semantics = [], scalar_prefetch = 0 : i64, scratch_operands = 0 : i64, tpu.core_type = #tpu.core_type<tc>} {
    %c0 = arith.constant 0 : index
    %c0_0 = arith.constant 0 : index
    %c0_1 = arith.constant 0 : index
    %c0_2 = arith.constant 0 : index
    %0 = vector.load %arg0[%c0, %c0_0, %c0_1, %c0_2] : memref<7x2x8x32xf32, #tpu.memory_space<vmem>>, vector<7x2x8x32xf32>
    %1 = vector.shape_cast %0 : vector<7x2x8x32xf32> to vector<7x16x32xf32>
    %c0_3 = arith.constant 0 : index
    %c0_4 = arith.constant 0 : index
    %c0_5 = arith.constant 0 : index
    %2 = vector.load %arg1[%c0_3, %c0_4, %c0_5] : memref<7x32x8xf32, #tpu.memory_space<vmem>>, vector<7x32x8xf32>
    "tpu.trace_start"() <{level = 10 : i32, message = "nkc,ncr->nkr"}> : () -> ()
    %cst = arith.constant dense<0.000000e+00> : vector<7x16x8xf32>
    %3 = tpu.matmul %1, %2, %cst {dimension_numbers = #tpu.dot_dimension_numbers<[2], [1], [1], [2], [0, 0, 0, 1, 1, 2], [0], [0]>} : vector<7x16x32xf32>, vector<7x32x8xf32>, vector<7x16x8xf32> -> vector<7x16x8xf32>
    "tpu.trace_stop"() : () -> ()
    %4 = vector.shape_cast %3 : vector<7x16x8xf32> to vector<14x8x8xf32>
    %cst_6 = arith.constant dense<0xFF800000> : vector<14x8xf32>
    %5 = vector.multi_reduction <maximumf>, %4, %cst_6 [1] : vector<14x8x8xf32> to vector<14x8xf32>
    %6 = vector.shape_cast %5 : vector<14x8xf32> to vector<14x1x8xf32>
    %7 = vector.broadcast %6 : vector<14x1x8xf32> to vector<14x8x8xf32>
    %8 = arith.subf %4, %7 : vector<14x8x8xf32>
    %9 = math.exp %8 : vector<14x8x8xf32>
    %cst_7 = arith.constant dense<0.000000e+00> : vector<14x8xf32>
    %10 = vector.multi_reduction <add>, %9, %cst_7 [1] : vector<14x8x8xf32> to vector<14x8xf32>
    %11 = vector.shape_cast %10 : vector<14x8xf32> to vector<14x1x8xf32>
    %12 = vector.broadcast %11 : vector<14x1x8xf32> to vector<14x8x8xf32>
    %13 = arith.divf %9, %12 : vector<14x8x8xf32>
    %14 = vector.shape_cast %0 : vector<7x2x8x32xf32> to vector<112x32xf32>
    %15 = vector.shape_cast %13 : vector<14x8x8xf32> to vector<112x8xf32>
    %c0_8 = arith.constant 0 : index
    %c0_9 = arith.constant 0 : index
    %16 = vector.load %arg7[%c0_8, %c0_9] : memref<32x256xf32, #tpu.memory_space<vmem>>, vector<32x256xf32>
    %cst_10 = arith.constant dense<0.000000e+00> : vector<112x256xf32>
    %17 = tpu.matmul %14, %16, %cst_10 {dimension_numbers = #tpu.dot_dimension_numbers<[1], [0], [0], [1], [0, 0, 1, 1], [], []>} : vector<112x32xf32>, vector<32x256xf32>, vector<112x256xf32> -> vector<112x256xf32>
    %c0_11 = arith.constant 0 : index
    %c0_12 = arith.constant 0 : index
    %18 = vector.load %arg8[%c0_11, %c0_12] : memref<8x256xf32, #tpu.memory_space<vmem>>, vector<8x256xf32>
    %cst_13 = arith.constant dense<0.000000e+00> : vector<112x256xf32>
    %19 = tpu.matmul %15, %18, %cst_13 {dimension_numbers = #tpu.dot_dimension_numbers<[1], [0], [0], [1], [0, 0, 1, 1], [], []>} : vector<112x8xf32>, vector<8x256xf32>, vector<112x256xf32> -> vector<112x256xf32>
    %20 = arith.mulf %17, %19 : vector<112x256xf32>
    %21 = vector.shape_cast %20 : vector<112x256xf32> to vector<14x8x256xf32>
    %cst_14 = arith.constant dense<0.000000e+00> : vector<14x256xf32>
    %22 = vector.multi_reduction <add>, %21, %cst_14 [1] : vector<14x8x256xf32> to vector<14x256xf32>
    %23 = vector.shape_cast %22 : vector<14x256xf32> to vector<7x2x256xf32>
    %c0_15 = arith.constant 0 : index
    %c0_16 = arith.constant 0 : index
    %c0_17 = arith.constant 0 : index
    %24 = vector.load %arg2[%c0_15, %c0_16, %c0_17] : memref<7x256x32xf32, #tpu.memory_space<vmem>>, vector<7x256x32xf32>
    "tpu.trace_start"() <{level = 10 : i32, message = "nbq,nqc->nbc"}> : () -> ()
    %cst_18 = arith.constant dense<0.000000e+00> : vector<7x2x32xf32>
    %25 = tpu.matmul %23, %24, %cst_18 {dimension_numbers = #tpu.dot_dimension_numbers<[2], [1], [1], [2], [0, 0, 0, 1, 1, 2], [0], [0]>} : vector<7x2x256xf32>, vector<7x256x32xf32>, vector<7x2x32xf32> -> vector<7x2x32xf32>
    %cst_19 = arith.constant 0.000000e+00 : f32
    "tpu.trace_stop"() : () -> ()
    %26 = vector.broadcast %cst_19 : f32 to vector<7x2x32xf32>
    %27 = arith.cmpf oge, %25, %26 : vector<7x2x32xf32>
    %cst_20 = arith.constant 0.00999999977 : f32
    %28 = vector.broadcast %cst_20 : f32 to vector<7x2x32xf32>
    %29 = arith.mulf %28, %25 : vector<7x2x32xf32>
    %30 = arith.select %27, %25, %29 : vector<7x2x32xi1>, vector<7x2x32xf32>
    %31 = vector.shape_cast %0 : vector<7x2x8x32xf32> to vector<14x8x32xf32>
    %32 = vector.shape_cast %30 : vector<7x2x32xf32> to vector<14x32xf32>
    %33 = vector.shape_cast %32 : vector<14x32xf32> to vector<14x1x32xf32>
    %34 = vector.broadcast %33 : vector<14x1x32xf32> to vector<14x8x32xf32>
    %35 = arith.addf %31, %34 : vector<14x8x32xf32>
    %cst_21 = arith.constant dense<0xFF800000> : vector<14x32xf32>
    %36 = vector.multi_reduction <maximumf>, %35, %cst_21 [1] : vector<14x8x32xf32> to vector<14x32xf32>
    %37 = vector.shape_cast %36 : vector<14x32xf32> to vector<7x2x32xf32>
    %c0_22 = arith.constant 0 : index
    %c0_23 = arith.constant 0 : index
    %c0_24 = arith.constant 0 : index
    %38 = vector.load %arg3[%c0_22, %c0_23, %c0_24] : memref<7x32x32xf32, #tpu.memory_space<vmem>>, vector<7x32x32xf32>
    "tpu.trace_start"() <{level = 10 : i32, message = "nbc,nco->nbo"}> : () -> ()
    %cst_25 = arith.constant dense<0.000000e+00> : vector<7x2x32xf32>
    %39 = tpu.matmul %37, %38, %cst_25 {dimension_numbers = #tpu.dot_dimension_numbers<[2], [1], [1], [2], [0, 0, 0, 1, 1, 2], [0], [0]>} : vector<7x2x32xf32>, vector<7x32x32xf32>, vector<7x2x32xf32> -> vector<7x2x32xf32>
    "tpu.trace_stop"() : () -> ()
    %c0_26 = arith.constant 0 : index
    %c0_27 = arith.constant 0 : index
    %c0_28 = arith.constant 0 : index
    %40 = vector.load %arg4[%c0_26, %c0_27, %c0_28] : memref<7x1x32xf32, #tpu.memory_space<vmem>>, vector<7x1x32xf32>
    %41 = vector.broadcast %40 : vector<7x1x32xf32> to vector<7x2x32xf32>
    %42 = arith.mulf %39, %41 : vector<7x2x32xf32>
    %c0_29 = arith.constant 0 : index
    %c0_30 = arith.constant 0 : index
    %c0_31 = arith.constant 0 : index
    %43 = vector.load %arg5[%c0_29, %c0_30, %c0_31] : memref<7x1x32xf32, #tpu.memory_space<vmem>>, vector<7x1x32xf32>
    %44 = vector.broadcast %43 : vector<7x1x32xf32> to vector<7x2x32xf32>
    %45 = arith.addf %42, %44 : vector<7x2x32xf32>
    %46 = arith.mulf %45, %45 : vector<7x2x32xf32>
    %cst_32 = arith.constant dense<0.000000e+00> : vector<7x2xf32>
    %47 = vector.multi_reduction <add>, %46, %cst_32 [2] : vector<7x2x32xf32> to vector<7x2xf32>
    %48 = vector.shape_cast %47 : vector<7x2xf32> to vector<7x2x1xf32>
    %49 = math.sqrt %48 : vector<7x2x1xf32>
    %cst_33 = arith.constant 9.99999996E-13 : f32
    %50 = vector.broadcast %cst_33 : f32 to vector<7x2x1xf32>
    %51 = arith.maximumf %49, %50 : vector<7x2x1xf32>
    %52 = vector.broadcast %51 : vector<7x2x1xf32> to vector<7x2x32xf32>
    %53 = arith.divf %45, %52 : vector<7x2x32xf32>
    %c0_34 = arith.constant 0 : index
    %c0_35 = arith.constant 0 : index
    %c0_36 = arith.constant 0 : index
    %54 = vector.load %arg6[%c0_34, %c0_35, %c0_36] : memref<7x32x16xf32, #tpu.memory_space<vmem>>, vector<7x32x16xf32>
    "tpu.trace_start"() <{level = 10 : i32, message = "nbo,nok->nbk"}> : () -> ()
    %cst_37 = arith.constant dense<0.000000e+00> : vector<7x2x16xf32>
    %55 = tpu.matmul %53, %54, %cst_37 {dimension_numbers = #tpu.dot_dimension_numbers<[2], [1], [1], [2], [0, 0, 0, 1, 1, 2], [0], [0]>} : vector<7x2x32xf32>, vector<7x32x16xf32>, vector<7x2x16xf32> -> vector<7x2x16xf32>
    "tpu.trace_stop"() : () -> ()
    %56 = vector.extract_strided_slice %39 {offsets = [0, 0, 0], sizes = [7, 1, 32], strides = [1, 1, 1]} : vector<7x2x32xf32> to vector<7x1x32xf32>
    %57 = vector.shape_cast %56 : vector<7x1x32xf32> to vector<7x32xf32>
    %c0_38 = arith.constant 0 : index
    %c0_39 = arith.constant 0 : index
    %c0_40 = arith.constant 0 : index
    %58 = vector.load %arg9[%c0_38, %c0_39, %c0_40] : memref<2x7x32xf32, #tpu.memory_space<vmem>>, vector<1x7x32xf32>
    %59 = vector.shape_cast %58 : vector<1x7x32xf32> to vector<7x32xf32>
    %60 = vector.shape_cast %57 : vector<7x32xf32> to vector<1x7x32xf32>
    tpu.vector_store %arg9[%c0_38, %c0_39, %c0_40], %60 {strides = array<i32>} : memref<2x7x32xf32, #tpu.memory_space<vmem>>, vector<1x7x32xf32>,
    %61 = vector.extract_strided_slice %55 {offsets = [0, 0, 0], sizes = [7, 1, 16], strides = [1, 1, 1]} : vector<7x2x16xf32> to vector<7x1x16xf32>
    %62 = vector.shape_cast %61 : vector<7x1x16xf32> to vector<7x16xf32>
    %c0_41 = arith.constant 0 : index
    %c0_42 = arith.constant 0 : index
    %c0_43 = arith.constant 0 : index
    %63 = vector.load %arg10[%c0_41, %c0_42, %c0_43] : memref<2x7x16xf32, #tpu.memory_space<vmem>>, vector<1x7x16xf32>
    %64 = vector.shape_cast %63 : vector<1x7x16xf32> to vector<7x16xf32>
    %65 = vector.shape_cast %62 : vector<7x16xf32> to vector<1x7x16xf32>
    tpu.vector_store %arg10[%c0_41, %c0_42, %c0_43], %65 {strides = array<i32>} : memref<2x7x16xf32, #tpu.memory_space<vmem>>, vector<1x7x16xf32>,
    %66 = vector.extract_strided_slice %39 {offsets = [0, 1, 0], sizes = [7, 1, 32], strides = [1, 1, 1]} : vector<7x2x32xf32> to vector<7x1x32xf32>
    %67 = vector.shape_cast %66 : vector<7x1x32xf32> to vector<7x32xf32>
    %c1 = arith.constant 1 : index
    %c0_44 = arith.constant 0 : index
    %c0_45 = arith.constant 0 : index
    %68 = vector.load %arg9[%c1, %c0_44, %c0_45] : memref<2x7x32xf32, #tpu.memory_space<vmem>>, vector<1x7x32xf32>
    %69 = vector.shape_cast %68 : vector<1x7x32xf32> to vector<7x32xf32>
    %70 = vector.shape_cast %67 : vector<7x32xf32> to vector<1x7x32xf32>
    tpu.vector_store %arg9[%c1, %c0_44, %c0_45], %70 {strides = array<i32>} : memref<2x7x32xf32, #tpu.memory_space<vmem>>, vector<1x7x32xf32>,
    %71 = vector.extract_strided_slice %55 {offsets = [0, 1, 0], sizes = [7, 1, 16], strides = [1, 1, 1]} : vector<7x2x16xf32> to vector<7x1x16xf32>
    %72 = vector.shape_cast %71 : vector<7x1x16xf32> to vector<7x16xf32>
    %c1_46 = arith.constant 1 : index
    %c0_47 = arith.constant 0 : index
    %c0_48 = arith.constant 0 : index
    %73 = vector.load %arg10[%c1_46, %c0_47, %c0_48] : memref<2x7x16xf32, #tpu.memory_space<vmem>>, vector<1x7x16xf32>
    %74 = vector.shape_cast %73 : vector<1x7x16xf32> to vector<7x16xf32>
    %75 = vector.shape_cast %72 : vector<7x16xf32> to vector<1x7x16xf32>
    tpu.vector_store %arg10[%c1_46, %c0_47, %c0_48], %75 {strides = array<i32>} : memref<2x7x16xf32, #tpu.memory_space<vmem>>, vector<1x7x16xf32>,
    return
  }
}

</mosaic_0001>

<bundles_post_ra>
// kernel: tpu_custom_call.1
= control target key start
LH: loop header
LB: loop body
LE: loop exit
PB: predicated region body
PF: predicated region fallthrough
CT: control target
= control target key end

     0   :  { %vm76_vm0 = vcmask 261120   ;;  %vm280_vm1 = vcmask 64512   ;;  %s4776_s1 = inlined_call_operand.vmem [shape: f32[7,32,8], index: 1, kind: input, shape index: {}]   ;;  %s4777_s0 = inlined_call_operand.vmem [shape: f32[7,2,8,32], index: 0, kind: input, shape index: {}]   ;;  %s4778_s7 = inlined_call_operand.vmem [shape: f32[32,256], index: 7, kind: input, shape index: {}]   ;;  %s4779_s8 = inlined_call_operand.vmem [shape: f32[8,256], index: 8, kind: input, shape index: {}]   ;;  %s4780_s2 = inlined_call_operand.vmem [shape: f32[7,256,32], index: 2, kind: input, shape index: {}]   ;;  %s4781_s3 = inlined_call_operand.vmem [shape: f32[7,32,32], index: 3, kind: input, shape index: {}]   ;;  %s4782_s4 = inlined_call_operand.vmem [shape: f32[7,1,32], index: 4, kind: input, shape index: {}]   ;;  %s4783_s5 = inlined_call_operand.vmem [shape: f32[7,1,32], index: 5, kind: input, shape index: {}]   ;;  %s4784_s9 = inlined_call_operand.vmem [shape: f32[2,7,32], index: 9, kind: output, shape index: {0}]   ;;  %s4785_s6 = inlined_call_operand.vmem [shape: f32[7,32,16], index: 6, kind: input, shape index: {}]   ;;  %s4786_s10 = inlined_call_operand.vmem [shape: f32[2,7,16], index: 10, kind: output, shape index: {1}]  }
   0x1   :  { %v51_v0 = vld [vmem:[%s4776_s1 + $0x18] sm:$0xff]  ;;  %v50_v4 = vld [vmem:[%s4776_s1 + $0x10] sm:$0xff]  ;;  %v49_v8 = vld [vmem:[%s4776_s1 + $0x8] sm:$0xff] }
   0x2   :  { %v55_v1 = vld [vmem:[%s4776_s1 + $0x38] sm:$0xff]  ;;  %95 = vmatpush.msra.mxu0 %v51_v0  ;;  %v54_v5 = vld [vmem:[%s4776_s1 + $0x30] sm:$0xff]  ;;  %v53_v9 = vld [vmem:[%s4776_s1 + $0x28] sm:$0xff] }
   0x3   :  { %v59_v2 = vld [vmem:[%s4776_s1 + $0x58] sm:$0xff]  ;;  %124 = vmatpush.msra.mxu1 %v55_v1  ;;  %v58_v6 = vld [vmem:[%s4776_s1 + $0x50] sm:$0xff]  ;;  %v57_v10 = vld [vmem:[%s4776_s1 + $0x48] sm:$0xff] }
   0x4   :  { %v63_v3 = vld [vmem:[%s4776_s1 + $0x78] sm:$0xff]  ;;  %153 = vmatpush.msra.mxu2 %v59_v2  ;;  %v62_v7 = vld [vmem:[%s4776_s1 + $0x70] sm:$0xff]  ;;  %96 = vmatpush.msra.mxu0 %v50_v4  ;;  %v61_v11 = vld [vmem:[%s4776_s1 + $0x68] sm:$0xff] }
   0x5   :  { %182 = vmatpush.msra.mxu3 %v63_v3  ;;  %125 = vmatpush.msra.mxu1 %v54_v5  ;;  %v48_v12 = vld [vmem:[%s4776_s1] sm:$0xff]  ;;  %v3025_v17 = vld [vmem:[%s4777_s0 + $0x10] sm:$0xff]  ;;  %v67_v20 = vld [vmem:[%s4776_s1 + $0x98] sm:$0xff] }
   0x6   :  { %154 = vmatpush.msra.mxu2 %v58_v6  ;;  %v52_v13 = vld [vmem:[%s4776_s1 + $0x20] sm:$0xff]  ;;  %97 = vmatpush.msra.mxu0 %v49_v8  ;;  %v3035_v19 = vld [vmem:[%s4777_s0 + $0x30] sm:$0xff]  ;;  %v71_v22 = vld [vmem:[%s4776_s1 + $0xb8] sm:$0xff] }
   0x7   :  { %183 = vmatpush.msra.mxu3 %v62_v7  ;;  %126 = vmatpush.msra.mxu1 %v53_v9  ;;  %v56_v14 = vld [vmem:[%s4776_s1 + $0x40] sm:$0xff]  ;;  %v66_v21 = vld [vmem:[%s4776_s1 + $0x90] sm:$0xff]  ;;  %v75_v24 = vld [vmem:[%s4776_s1 + $0xd8] sm:$0xff] }
   0x8   :  { %v60_v15 = vld [vmem:[%s4776_s1 + $0x60] sm:$0xff]  ;;  %155 = vmatpush.msra.mxu2 %v57_v10  ;;  %98 = vmatpush.msra.mxu0 %v48_v12  ;;  %v70_v23 = vld [vmem:[%s4776_s1 + $0xb0] sm:$0xff]  ;;  %v65_v25 = vld [vmem:[%s4776_s1 + $0x88] sm:$0xff] }
   0x9   :  { %184 = vmatpush.msra.mxu3 %v61_v11  ;;  %v3020_v16 = vld [vmem:[%s4777_s0] sm:$0xff]  ;;  %127 = vmatpush.msra.mxu1 %v52_v13  ;;  %v69_v26 = vld [vmem:[%s4776_s1 + $0xa8] sm:$0xff]  ;;  %v74_v27 = vld [vmem:[%s4776_s1 + $0xd0] sm:$0xff] }
   0xa   :  { %v3030_v18 = vld [vmem:[%s4777_s0 + $0x20] sm:$0xff]  ;;  %156 = vmatpush.msra.mxu2 %v56_v14  ;;  %2714 = vmatmul.msk.f32.vlgmr.msra.gmra.mxu0 %vm76_vm0, %v3020_v16  ;;  %v73_v28 = vld [vmem:[%s4776_s1 + $0xc8] sm:$0xff]  ;;  %v3080_v30 = vld [vmem:[%s4777_s0 + $0x18] sm:$0xff] }
   0xb   :  { %185 = vmatpush.msra.mxu3 %v60_v15  ;;  %2716 = vmatmul.msk.f32.vlgmr.msra.gmra.mxu1 %vm76_vm0, %v3025_v17  ;;  %v3075_v29 = vld [vmem:[%s4777_s0 + $0x8] sm:$0xff]  ;;  %v3090_v32 = vld [vmem:[%s4777_s0 + $0x38] sm:$0xff]  ;;  %v64_v33 = vld [vmem:[%s4776_s1 + $0x80] sm:$0xff] }
   0xc   :  { %2718 = vmatmul.msk.f32.vlgmr.msra.gmra.mxu2 %vm76_vm0, %v3030_v18  ;;  %2720 = vmatmul.msk.f32.vlgmr.msra.gmra.mxu3 %vm76_vm0, %v3035_v19  ;;  %v3085_v31 = vld [vmem:[%s4777_s0 + $0x28] sm:$0xff]  ;;  %v68_v34 = vld [vmem:[%s4776_s1 + $0xa0] sm:$0xff]  ;;  %v3117_v37 = vld [vmem:[%s4777_s0 + $0x50] sm:$0xff] }
   0xd   :  { %211 = vmatpush.msrb.mxu0 %v67_v20  ;;  %240 = vmatpush.msrb.mxu1 %v71_v22  ;;  %v72_v35 = vld [vmem:[%s4776_s1 + $0xc0] sm:$0xff]  ;;  %v3133_v39 = vld [vmem:[%s4777_s0 + $0x48] sm:$0xff]  ;;  %v3138_v40 = vld [vmem:[%s4777_s0 + $0x58] sm:$0xff] }
   0xe   :  { %269 = vmatpush.msrb.mxu2 %v75_v24  ;;  %v3112_v36 = vld [vmem:[%s4777_s0 + $0x40] sm:$0xff]  ;;  %v47_v41 = vld [vmem:[%s4777_s0 + $0x68] sm:$0xff] }
   0xf   :  { %212 = vmatpush.msrb.mxu0 %v66_v21  ;;  %241 = vmatpush.msrb.mxu1 %v70_v23  ;;  %v3122_v38 = vld [vmem:[%s4777_s0 + $0x60] sm:$0xff] }
  0x10   :  { %270 = vmatpush.msrb.mxu2 %v74_v27 }
  0x11   :  { %213 = vmatpush.msrb.mxu0 %v65_v25  ;;  %242 = vmatpush.msrb.mxu1 %v69_v26 }
  0x12   :  { %271 = vmatpush.msrb.mxu2 %v73_v28  ;;  %2715 = vmatmul.msk.f32.gmra.mxu0 %vm76_vm0, %v3075_v29 }
  0x13   :  { %2717 = vmatmul.msk.f32.gmra.mxu1 %vm76_vm0, %v3080_v30  ;;  %214 = vmatpush.msrb.mxu0 %v64_v33 }
  0x14   :  { %2719 = vmatmul.msk.f32.gmra.mxu2 %vm76_vm0, %v3085_v31  ;;  %2721 = vmatmul.msk.f32.gmra.mxu3 %vm76_vm0, %v3090_v32 }
  0x15   :  { %243 = vmatpush.msrb.mxu1 %v68_v34  ;;  %272 = vmatpush.msrb.mxu2 %v72_v35 }
  0x1a   :  { %2722 = vmatmul.msk.f32.vlgmr.msrb.gmra.mxu0 %vm76_vm0, %v3112_v36 }
  0x1b   :  { %2724 = vmatmul.msk.f32.vlgmr.msrb.gmra.mxu1 %vm76_vm0, %v3117_v37 }
  0x1c   :  { %2726 = vmatmul.msk.f32.vlgmr.msrb.gmra.mxu2 %vm76_vm0, %v3122_v38 }
  0x22   :  { %2723 = vmatmul.msk.f32.gmra.mxu0 %vm76_vm0, %v3133_v39 }
  0x23   :  { %2725 = vmatmul.msk.f32.gmra.mxu1 %vm76_vm0, %v3138_v40 }
  0x24   :  { %2727 = vmatmul.msk.f32.gmra.mxu2 %vm76_vm0, %v47_v41 }
  0x87   :  { %v100_v42 = vpop.f32.mrf.mxu0 }
  0x88   :  { %v129_v43 = vpop.f32.mrf.mxu1  ;;  %v281_v44 = vsel %vm280_vm1, %v100_v42, -inf }
  0x89   :  { %v295_v45 = vsel %vm280_vm1, %v129_v43, -inf  ;;  %v282_v46 = vrot.slane %v281_v44, 4 }
  0x8a   :  { %v296_v47 = vrot.slane %v295_v45, 4 }
  0x8b   :  { %v283_v48 = vmax.f32 %v281_v44, %v282_v46 }
  0x8c   :  { %v297_v49 = vmax.f32 %v295_v45, %v296_v47 }
  0x8d   :  { %v284_v50 = vrot.slane %v283_v48, 2 }
  0x8e   :  { %v298_v51 = vrot.slane %v297_v49, 2 }
  0x8f   :  { %v3150_v52 = vpop.f32.mrf.mxu2  ;;  %v3152_v53 = vpop.f32.mrf.mxu3  ;;  %v285_v54 = vmax.f32 %v283_v48, %v284_v50  ;;  %v735_v48 = vld [vmem:[%s4778_s7 + $0x30] sm:$0xff] }
  0x90   :  { %v299_v55 = vmax.f32 %v297_v49, %v298_v51  ;;  %v309_v56 = vsel %vm280_vm1, %v3150_v52, -inf  ;;  %v323_v57 = vsel %vm280_vm1, %v3152_v53, -inf  ;;  %v3158_v58 = vpop.f32.mrf.mxu0  ;;  %v3160_v59 = vpop.f32.mrf.mxu1  ;;  %749 = vmatpush.msrb.mxu3 %v735_v48  ;;  %v734_v48 = vld [vmem:[%s4778_s7 + $0x28] sm:$0xff] }
  0x91   :  { %v310_v60 = vrot.slane %v309_v56, 4  ;;  %v324_v61 = vrot.slane %v323_v57, 4  ;;  %v288_v62 = vsel %vm280_vm1, %v3158_v58, -inf  ;;  %v302_v63 = vsel %vm280_vm1, %v3160_v59, -inf }
  0x92   :  { %v286_v0 = vrot.slane %v285_v54, 1  ;;  %v300_v1 = vrot.slane %v299_v55, 1  ;;  %v289_v2 = vrot.slane %v288_v62, 4  ;;  %v303_v3 = vrot.slane %v302_v63, 4 }
  0x93   :  { %v311_v4 = vmax.f32 %v309_v56, %v310_v60  ;;  %v325_v5 = vmax.f32 %v323_v57, %v324_v61  ;;  %v733_v60 = vld [vmem:[%s4778_s7 + $0x20] sm:$0xff] }
  0x94   :  { %v287_v6 = vmax.f32 %v285_v54, %v286_v0  ;;  %v301_v7 = vmax.f32 %v299_v55, %v300_v1  ;;  %v290_v8 = vmax.f32 %v288_v62, %v289_v2  ;;  %v304_v9 = vmax.f32 %v302_v63, %v303_v3  ;;  %750 = vmatpush.msrb.mxu3 %v733_v60 }
  0x95   :  { %v312_v10 = vrot.slane %v311_v4, 2  ;;  %v326_v11 = vrot.slane %v325_v5, 2 }
  0x96   :  { %v379_v12 = vsub.f32 %v100_v42, %v287_v6  ;;  %v381_v13 = vsub.f32 %v129_v43, %v301_v7  ;;  %v291_v14 = vrot.slane %v290_v8, 2  ;;  %v305_v15 = vrot.slane %v304_v9, 2 }
  0x97   :  { %v313_v20 = vmax.f32 %v311_v4, %v312_v10  ;;  %v327_v21 = vmax.f32 %v325_v5, %v326_v11  ;;  %v3166_v22 = vpop.f32.mrf.mxu2  ;;  %v3168_v23 = vpop.f32.mrf.mxu3 }
  0x98   :  { %v393_v24 = vmul.f32 1.442695, %v379_v12  ;;  %v397_v25 = vmul.f32 1.442695, %v381_v13  ;;  %v292_v26 = vmax.f32 %v290_v8, %v291_v14  ;;  %v306_v27 = vmax.f32 %v304_v9, %v305_v15  ;;  %v3174_v41 = vpop.f32.mrf.mxu0 }
  0x99   :  { %v314_v28 = vrot.slane %v313_v20, 1  ;;  %v328_v33 = vrot.slane %v327_v21, 1  ;;  %v316_v34 = vsel %vm280_vm1, %v3166_v22, -inf  ;;  %v330_v35 = vsel %vm280_vm1, %v3168_v23, -inf }
  0x9a   :  { %2814 = vpow2.f32 %v393_v24  ;;  %v293_v42 = vrot.slane %v292_v26, 1  ;;  %v307_v43 = vrot.slane %v306_v27, 1  ;;  %v317_v44 = vrot.slane %v316_v34, 4 }
  0x9b   :  { %2816 = vpow2.f32 %v397_v25  ;;  %v315_v45 = vmax.f32 %v313_v20, %v314_v28  ;;  %v329_v46 = vmax.f32 %v327_v21, %v328_v33  ;;  %v331_v47 = vrot.slane %v330_v35, 4 }
  0x9c   :  { %v294_v49 = vmax.f32 %v292_v26, %v293_v42  ;;  %v308_v50 = vmax.f32 %v306_v27, %v307_v43  ;;  %v318_v51 = vmax.f32 %v316_v34, %v317_v44  ;;  %v337_v54 = vsel %vm280_vm1, %v3174_v41, -inf  ;;  %v855_v34 = vld [vmem:[%s4779_s8] sm:$0xff]  ;;  %v736_v42 = vld [vmem:[%s4778_s7 + $0x38] sm:$0xff] }
  0x9d   :  { %v383_v55 = vsub.f32 %v3150_v52, %v315_v45  ;;  %v332_v56 = vmax.f32 %v330_v35, %v331_v47  ;;  %v338_v57 = vrot.slane %v337_v54, 4  ;;  %v385_v1 = vsub.f32 %v3152_v53, %v329_v46  ;;  %v731_v52 = vld [vmem:[%s4778_s7 + $0x10] sm:$0xff]  ;;  %v729_v53 = vld [vmem:[%s4778_s7] sm:$0xff]  ;;  %v856_v35 = vld [vmem:[%s4779_s8 + $0x8] sm:$0xff]  ;;  %914 = vmatpush.msra.mxu1 %v855_v34  ;;  %808 = vmatpush.msra.mxu0 %v736_v42 }
  0x9e   :  { %v380_v61 = vsub.f32 %v3158_v58, %v294_v49  ;;  %v382_v62 = vsub.f32 %v3160_v59, %v308_v50  ;;  %v319_v63 = vrot.slane %v318_v51, 2  ;;  %751 = vmatpush.msrb.mxu3 %v731_v52  ;;  %973 = vmatpush.msra.mxu2 %v856_v35 }
  0x9f   :  { %v401_v0 = vmul.f32 1.442695, %v383_v55  ;;  %v333_v2 = vrot.slane %v332_v56, 2  ;;  %v339_v8 = vmax.f32 %v337_v54, %v338_v57  ;;  %v405_v13 = vmul.f32 1.442695, %v385_v1  ;;  %v3229_v55 = vpop.f32.mrf.mxu1  ;;  %809 = vmatpush.msra.mxu0 %v734_v48 }
  0xa0   :  { %v3191_v3 = vpop.eup %2814  ;;  %v395_v4 = vmul.f32 1.442695, %v380_v61  ;;  %v399_v5 = vmul.f32 1.442695, %v382_v62  ;;  %v320_v6 = vmax.f32 %v318_v51, %v319_v63  ;;  %752 = vmatpush.msrb.mxu3 %v729_v53  ;;  %v3204_v21 = vpop.f32.mrf.mxu0  ;;  %v732_v62 = vld [vmem:[%s4778_s7 + $0x18] sm:$0xff]  ;;  %v351_v52 = vsel %vm280_vm1, %v3229_v55, -inf }
  0xa1   :  { %v3193_v7 = vpop.eup %2816  ;;  %v421_v58 = vsel %vm280_vm1, %v3191_v3, 0.0  ;;  %v334_v59 = vmax.f32 %v332_v56, %v333_v2  ;;  %2818 = vpow2.f32 %v401_v0  ;;  %2728 = vmatmul.msk.f32.vlgmr.msrb.gmra.mxu3 %vm76_vm0, %v3020_v16  ;;  %v340_v25 = vrot.slane %v339_v8, 2  ;;  %810 = vmatpush.msra.mxu0 %v732_v62 }
  0xa2   :  { %v422_v9 = vrot.slane %v421_v58, 4  ;;  %v435_v10 = vsel %vm280_vm1, %v3193_v7, 0.0  ;;  %v321_v11 = vrot.slane %v320_v6, 1  ;;  %2820 = vpow2.f32 %v395_v4 }
  0xa3   :  { %v436_v12 = vrot.slane %v435_v10, 4  ;;  %v335_v14 = vrot.slane %v334_v59, 1  ;;  %2822 = vpow2.f32 %v399_v5  ;;  %v344_v33 = vsel %vm280_vm1, %v3204_v21, -inf }
  0xa4   :  { %v423_v15 = vadd.f32 %v422_v9, %v421_v58  ;;  %v322_v20 = vmax.f32 %v320_v6, %v321_v11  ;;  %2824 = vpow2.f32 %v405_v13  ;;  %v341_v47 = vmax.f32 %v339_v8, %v340_v25 }
  0xa5   :  { %v437_v24 = vadd.f32 %v436_v12, %v435_v10  ;;  %v336_v28 = vmax.f32 %v334_v59, %v335_v14  ;;  %v345_v54 = vrot.slane %v344_v33, 4  ;;  %v352_v10 = vrot.slane %v351_v52, 4 }
  0xa6   :  { %v424_v26 = vrot.slane %v423_v15, 2  ;;  %v384_v27 = vsub.f32 %v3166_v22, %v322_v20  ;;  %v342_v8 = vrot.slane %v341_v47, 1 }
  0xa7   :  { %v3218_v43 = vpop.eup %2818  ;;  %v438_v46 = vrot.slane %v437_v24, 2  ;;  %v386_v61 = vsub.f32 %v3168_v23, %v336_v28  ;;  %v730_v23 = vld [vmem:[%s4778_s7 + $0x8] sm:$0xff]  ;;  %v346_v6 = vmax.f32 %v344_v33, %v345_v54  ;;  %v353_v28 = vmax.f32 %v351_v52, %v352_v10  ;;  %v3261_v33 = vpop.f32.mrf.mxu1 }
  0xa8   :  { %v425_v22 = vadd.f32 %v424_v26, %v423_v15  ;;  %v403_v44 = vmul.f32 1.442695, %v384_v27  ;;  %v3220_v45 = vpop.eup %2820  ;;  %v449_v56 = vsel %vm280_vm1, %v3218_v43, 0.0  ;;  %811 = vmatpush.msra.mxu0 %v730_v23  ;;  %v343_v26 = vmax.f32 %v341_v47, %v342_v8  ;;  %v3271_v54 = vpop.f32.mrf.mxu2 }
  0xa9   :  { %v3225_v49 = vpop.eup %2822  ;;  %v428_v51 = vsel %vm280_vm1, %v3220_v45, 0.0  ;;  %2729 = vmatmul.msk.f32.gmra.mxu3 %vm76_vm0, %v3075_v29  ;;  %v439_v1 = vadd.f32 %v438_v46, %v437_v24  ;;  %v450_v4 = vrot.slane %v449_v56, 4  ;;  %v407_v59 = vmul.f32 1.442695, %v386_v61  ;;  %2742 = vmatmul.msk.f32.vlgmr.msra.gmra.mxu0 %vm76_vm0, %v3020_v16 }
  0xaa   :  { %v426_v50 = vrot.slane %v425_v22, 1  ;;  %2826 = vpow2.f32 %v403_v44  ;;  %v429_v57 = vrot.slane %v428_v51, 4  ;;  %v442_v60 = vsel %vm280_vm1, %v3225_v49, 0.0  ;;  %v3243_v0 = vpop.eup %2824 }
  0xab   :  { %v443_v5 = vrot.slane %v442_v60, 4  ;;  %v463_v9 = vsel %vm280_vm1, %v3243_v0, 0.0  ;;  %v440_v11 = vrot.slane %v439_v1, 1  ;;  %v451_v13 = vadd.f32 %v450_v4, %v449_v56 }
  0xac   :  { %v3241_v63 = vadd.f32 %v426_v50, %v425_v22  ;;  %v430_v2 = vadd.f32 %v429_v57, %v428_v51  ;;  %v347_v20 = vrot.slane %v346_v6, 2  ;;  %v464_v24 = vrot.slane %v463_v9, 4 }
  0xad   :  { %v444_v14 = vadd.f32 %v443_v5, %v442_v60  ;;  %v3264_v42 = vadd.f32 %v440_v11, %v439_v1  ;;  %v452_v22 = vrot.slane %v451_v13, 2  ;;  %v387_v47 = vsub.f32 %v3174_v41, %v343_v26 }
  0xae   :  { %2828 = vrcp.f32 %v3241_v63  ;;  %v431_v58 = vrot.slane %v430_v2, 2  ;;  %v348_v35 = vmax.f32 %v346_v6, %v347_v20  ;;  %v465_v50 = vadd.f32 %v464_v24, %v463_v9 }
  0xaf   :  { %2830 = vpow2.f32 %v407_v59  ;;  %v445_v46 = vrot.slane %v444_v14, 2  ;;  %v358_v51 = vsel %vm280_vm1, %v3261_v33, -inf  ;;  %v528_v56 = vand.u32 2147483647, %v3241_v63 }
  0xb0   :  { %v3251_v53 = vpop.eup %2826  ;;  %v432_v12 = vadd.f32 %v431_v58, %v430_v2  ;;  %v530_v57 = vand.u32 2147483648, %v3241_v63  ;;  %v354_v60 = vrot.slane %v353_v28, 2  ;;  %v349_v1 = vrot.slane %v348_v35, 1 }
  0xb1   :  { %v456_v15 = vsel %vm280_vm1, %v3251_v53, 0.0  ;;  %2730 = vmatmul.msk.f32.gmra.mxu3 %vm76_vm0, %v3025_v17  ;;  %2743 = vmatmul.msk.f32.gmra.mxu0 %vm76_vm0, %v3075_v29  ;;  %vm524_vm3 = vweird.f32 %v3241_v63  ;;  %v453_v2 = vadd.f32 %v452_v22, %v451_v13  ;;  %v446_v52 = vadd.f32 %v445_v46, %v444_v14 }
  0xb2   :  { %v433_v25 = vrot.slane %v432_v12, 1  ;;  %v457_v34 = vrot.slane %v456_v15, 4  ;;  %v466_v4 = vrot.slane %v465_v50, 2  ;;  %v409_v5 = vmul.f32 1.442695, %v387_v47 }
  0xb3   :  { %v359_v6 = vrot.slane %v358_v51, 4  ;;  %vm529_vm5 = vcmp.eq.f32.partialorder %v528_v56, 8.507059e+37  ;;  %v531_v29 = vor.u32 1.1754944e-38, %v530_v57  ;;  %v355_v59 = vmax.f32 %v353_v28, %v354_v60 }
  0xb4   :  { %v2829_v27 = vpop.eup %2828  ;;  %v3266_v44 = vadd.f32 %v433_v25, %v432_v12  ;;  %v458_v41 = vadd.f32 %v457_v34, %v456_v15  ;;  %v350_v9 = vmax.f32 %v348_v35, %v349_v1  ;;  %v454_v13 = vrot.slane %v453_v2, 1 }
  0xb5   :  { %v520_v16 = vmul.f32 %v2829_v27, %v3241_v63  ;;  %v3278_v61 = vpop.eup %2830  ;;  %vm525_vm2 = vweird.f32 %v2829_v27  ;;  %v360_v10 = vmax.f32 %v358_v51, %v359_v6  ;;  %v447_v14 = vrot.slane %v446_v52, 1 }
  0xb6   :  { %2832 = vrcp.f32 %v3266_v44  ;;  %vm526_vm4 = vmor %vm524_vm3, %vm525_vm2  ;;  %v470_v58 = vsel %vm280_vm1, %v3278_v61, 0.0  ;;  %v459_v63 = vrot.slane %v458_v41, 2  ;;  %v467_v20 = vadd.f32 %v466_v4, %v465_v50 }
  0xb7   :  { %v521_v48 = vsub.f32 1.0, %v520_v16  ;;  %2834 = vrcp.f32 %v3264_v42  ;;  %v365_v24 = vsel %vm280_vm1, %v3271_v54, -inf  ;;  %v471_v26 = vrot.slane %v470_v58, 4 }
  0xb8   :  { %2836 = vpow2.f32 %v409_v5  ;;  %v356_v28 = vrot.slane %v355_v59, 1  ;;  %v388_v16 = vsub.f32 %v3204_v21, %v350_v9  ;;  %v361_v34 = vrot.slane %v360_v10, 2 }
  0xb9   :  { %v522_v62 = vmul.f32 %v2829_v27, %v521_v48  ;;  %2731 = vmatmul.msk.f32.gmra.mxu3 %vm76_vm0, %v3080_v30  ;;  %2744 = vmatmul.msk.f32.gmra.mxu0 %vm76_vm0, %v3025_v17  ;;  %v3302_v22 = vadd.f32 %v447_v14, %v446_v52  ;;  %v366_v46 = vrot.slane %v365_v24, 4  ;;  %v3304_v48 = vadd.f32 %v454_v13, %v453_v2 }
  0xba   :  { %v468_v50 = vrot.slane %v467_v20, 1  ;;  %v472_v21 = vadd.f32 %v471_v26, %v470_v58  ;;  %v357_v47 = vmax.f32 %v355_v59, %v356_v28  ;;  %v545_v52 = vand.u32 2147483648, %v3266_v44 }
  0xbb   :  { %v523_v23 = vadd.f32 %v2829_v27, %v522_v62  ;;  %v411_v62 = vmul.f32 1.442695, %v388_v16  ;;  %2838 = vrcp.f32 %v3302_v22  ;;  %v367_v2 = vmax.f32 %v365_v24, %v366_v46 }
  0xbc   :  { %v3286_v11 = vpop.eup %2832  ;;  %2840 = vrcp.f32 %v3304_v48  ;;  %v543_v5 = vand.u32 2147483647, %v3266_v44  ;;  %vm539_vm7 = vweird.f32 %v3266_v44  ;;  %v3338_v14 = vadd.f32 %v468_v50, %v467_v20 }
  0xbd   :  { %v527_v8 = vsel %vm526_vm4, %v2829_v27, %v523_v23  ;;  %v3291_v25 = vpop.eup %2834  ;;  %v460_v27 = vadd.f32 %v459_v63, %v458_v41  ;;  %v535_v35 = vmul.f32 %v3286_v11, %v3266_v44  ;;  %v362_v41 = vmax.f32 %v360_v10, %v361_v34 }
  0xbe   :  { %v532_v12 = vsel %vm529_vm5, %v531_v29, %v527_v8  ;;  %v550_v56 = vmul.f32 %v3291_v25, %v3264_v42  ;;  %v3312_v57 = vpop.eup %2836  ;;  %vm540_vm6 = vweird.f32 %v3286_v11  ;;  %v389_v29 = vsub.f32 %v3229_v55, %v357_v47 }
  0xbf   :  { %v533_v15 = vmul.f32 %v3191_v3, %v532_v12  ;;  %v3298_v3 = vpop.f32.mrf.mxu2  ;;  %v536_v17 = vsub.f32 1.0, %v535_v35  ;;  %v461_v60 = vrot.slane %v460_v27, 1  ;;  %v477_v6 = vsel %vm280_vm1, %v3312_v57, 0.0  ;;  %vm541_vm8 = vmor %vm539_vm7, %vm540_vm6 }
  0xc0   :  { %v372_v51 = vsel %vm280_vm1, %v3298_v3, -inf  ;;  %v551_v58 = vsub.f32 1.0, %v550_v56  ;;  %v473_v8 = vrot.slane %v472_v21, 2  ;;  %2842 = vpow2.f32 %v411_v62 }
  0xc1   :  { %2756 = vmatmul.msk.f32.vlgmr.msra.gmra.mxu1 %vm280_vm1, %v533_v15  ;;  %2770 = vmatmul.msk.f32.vlgmr.msra.gmra.mxu2 %vm280_vm1, %v533_v15  ;;  %v537_v1 = vmul.f32 %v3286_v11, %v536_v17  ;;  %v373_v23 = vrot.slane %v372_v51, 4  ;;  %v3327_v59 = vadd.f32 %v461_v60, %v460_v27  ;;  %v363_v63 = vrot.slane %v362_v41, 1 }
  0xc2   :  { %2732 = vmatmul.msk.f32.gmra.mxu3 %vm76_vm0, %v3030_v18  ;;  %2745 = vmatmul.msk.f32.gmra.mxu0 %vm76_vm0, %v3080_v30  ;;  %v368_v9 = vrot.slane %v367_v2, 2  ;;  %v546_v12 = vor.u32 1.1754944e-38, %v545_v52  ;;  %v552_v55 = vmul.f32 %v3291_v25, %v551_v58  ;;  %v478_v13 = vrot.slane %v477_v6, 4  ;;  %v3336_v30 = vpop.eup %2838 }
  0xc3   :  { %v538_v4 = vadd.f32 %v3286_v11, %v537_v1  ;;  %v374_v44 = vmax.f32 %v372_v51, %v373_v23  ;;  %vm544_vm9 = vcmp.eq.f32.partialorder %v543_v5, 8.507059e+37  ;;  %vm555_vm10 = vweird.f32 %v3291_v25 }
  0xc4   :  { %v413_v15 = vmul.f32 1.442695, %v389_v29  ;;  %v553_v26 = vadd.f32 %v3291_v25, %v552_v55  ;;  %v364_v28 = vmax.f32 %v362_v41, %v363_v63  ;;  %vm554_vm11 = vweird.f32 %v3264_v42 }
  0xc5   :  { %v542_v10 = vsel %vm541_vm8, %v3286_v11, %v538_v4  ;;  %v3341_v11 = vpop.eup %2840  ;;  %v558_v16 = vand.u32 2147483647, %v3264_v42  ;;  %2844 = vrcp.f32 %v3327_v59  ;;  %v474_v34 = vadd.f32 %v473_v8, %v472_v21  ;;  %vm3349_vm12 = vmor %vm554_vm11, %vm555_vm10 }
  0xc6   :  { %v547_v24 = vsel %vm544_vm9, %v546_v12, %v542_v10  ;;  %v369_v35 = vmax.f32 %v367_v2, %v368_v9  ;;  %v560_v46 = vand.u32 2147483648, %v3264_v42  ;;  %v3354_v50 = vpop.eup %2842  ;;  %v479_v17 = vadd.f32 %v478_v13, %v477_v6 }
  0xc7   :  { %v548_v27 = vmul.f32 %v3220_v45, %v547_v24  ;;  %v375_v45 = vrot.slane %v374_v44, 2  ;;  %v557_v21 = vsel %vm3349_vm12, %v3291_v25, %v553_v26  ;;  %v565_v47 = vmul.f32 %v3336_v30, %v3302_v22 }
  0xc8   :  { %v561_v51 = vor.u32 1.1754944e-38, %v560_v46  ;;  %2846 = vpow2.f32 %v413_v15  ;;  %v390_v42 = vsub.f32 %v3261_v33, %v364_v28  ;;  %vm559_vm13 = vcmp.eq.f32.partialorder %v558_v16, 8.507059e+37 }
  0xc9   :  { %2757 = vmatmul.msk.f32.gmra.mxu1 %vm280_vm1, %v548_v27  ;;  %2771 = vmatmul.msk.f32.gmra.mxu2 %vm280_vm1, %v548_v27  ;;  %v566_v56 = vsub.f32 1.0, %v565_v47  ;;  %v484_v60 = vsel %vm280_vm1, %v3354_v50, 0.0  ;;  %v370_v62 = vrot.slane %v369_v35, 1  ;;  %2848 = vrcp.f32 %v3338_v14 }
  0xca   :  { %2733 = vmatmul.msk.f32.gmra.mxu3 %vm76_vm0, %v3085_v31  ;;  %2746 = vmatmul.msk.f32.gmra.mxu0 %vm76_vm0, %v3030_v18  ;;  %v562_v41 = vsel %vm559_vm13, %v561_v51, %v557_v21  ;;  %v475_v25 = vrot.slane %v474_v34, 1  ;;  %v480_v1 = vrot.slane %v479_v17, 2  ;;  %v376_v2 = vmax.f32 %v374_v44, %v375_v45 }
  0xcb   :  { %v3371_v52 = vpop.eup %2844  ;;  %v567_v18 = vmul.f32 %v3336_v30, %v566_v56  ;;  %vm570_vm14 = vweird.f32 %v3336_v30  ;;  %v575_v33 = vand.u32 2147483648, %v3302_v22  ;;  %v580_v23 = vmul.f32 %v3341_v11, %v3304_v48 }
  0xcc   :  { %v485_v4 = vrot.slane %v484_v60, 4  ;;  %v415_v5 = vmul.f32 1.442695, %v390_v42  ;;  %v563_v6 = vmul.f32 %v3193_v7, %v562_v41  ;;  %v573_v29 = vand.u32 2147483647, %v3302_v22 }
  0xcd   :  { %v371_v58 = vmax.f32 %v369_v35, %v370_v62  ;;  %v568_v8 = vadd.f32 %v3336_v30, %v567_v18  ;;  %vm569_vm15 = vweird.f32 %v3302_v22  ;;  %v581_v63 = vsub.f32 1.0, %v580_v23 }
  0xce   :  { %v3382_v9 = vpop.eup %2846  ;;  %vm3386_vm2 = vmor %vm569_vm15, %vm570_vm14  ;;  %v595_v7 = vmul.f32 %v3371_v52, %v3327_v59  ;;  %v377_v12 = vrot.slane %v376_v2, 1  ;;  %v576_v22 = vor.u32 1.1754944e-38, %v575_v33  ;;  %v3400_v15 = vadd.f32 %v475_v25, %v474_v34 }
  0xcf   :  { %v572_v55 = vsel %vm3386_vm2, %v3336_v30, %v568_v8  ;;  %v582_v13 = vmul.f32 %v3341_v11, %v581_v63  ;;  %v3398_v44 = vpop.eup %2848  ;;  %v481_v24 = vadd.f32 %v480_v1, %v479_v17  ;;  %2850 = vpow2.f32 %v415_v5 }
  0xd0   :  { %vm574_vm3 = vcmp.eq.f32.partialorder %v573_v29, 8.507059e+37  ;;  %v486_v26 = vadd.f32 %v485_v4, %v484_v60  ;;  %v491_v28 = vsel %vm280_vm1, %v3382_v9, 0.0  ;;  %v391_v27 = vsub.f32 %v3271_v54, %v371_v58 }
  0xd1   :  { %2758 = vmatmul.msk.f32.gmra.mxu1 %vm280_vm1, %v563_v6  ;;  %2772 = vmatmul.msk.f32.gmra.mxu2 %vm280_vm1, %v563_v6  ;;  %v577_v30 = vsel %vm574_vm3, %v576_v22, %v572_v55  ;;  %v583_v16 = vadd.f32 %v3341_v11, %v582_v13  ;;  %vm584_vm4 = vweird.f32 %v3304_v48  ;;  %vm585_vm5 = vweird.f32 %v3341_v11 }
  0xd2   :  { %2734 = vmatmul.msk.f32.gmra.mxu3 %vm76_vm0, %v3035_v19  ;;  %2747 = vmatmul.msk.f32.gmra.mxu0 %vm76_vm0, %v3085_v31  ;;  %v596_v31 = vsub.f32 1.0, %v595_v7  ;;  %v378_v34 = vmax.f32 %v376_v2, %v377_v12  ;;  %v590_v35 = vand.u32 2147483648, %v3304_v48  ;;  %v482_v20 = vrot.slane %v481_v24, 1  ;;  %vm3414_vm6 = vmor %vm584_vm4, %vm585_vm5 }
  0xd3   :  { %v492_v46 = vrot.slane %v491_v28, 4  ;;  %v578_v17 = vmul.f32 %v3225_v49, %v577_v30  ;;  %v588_v54 = vand.u32 2147483647, %v3304_v48  ;;  %2852 = vrcp.f32 %v3400_v15 }
  0xd4   :  { %v487_v45 = vrot.slane %v486_v26, 2  ;;  %v417_v21 = vmul.f32 1.442695, %v391_v27  ;;  %v587_v49 = vsel %vm3414_vm6, %v3341_v11, %v583_v16  ;;  %v597_v48 = vmul.f32 %v3371_v52, %v596_v31 }
  0xd5   :  { %v3418_v51 = vpop.eup %2850  ;;  %v610_v42 = vmul.f32 %v3398_v44, %v3338_v14  ;;  %v392_v56 = vsub.f32 %v3298_v3, %v378_v34  ;;  %v591_v60 = vor.u32 1.1754944e-38, %v590_v35  ;;  %v3431_v62 = vadd.f32 %v482_v20, %v481_v24 }
  0xd6   :  { %v493_v41 = vadd.f32 %v492_v46, %v491_v28  ;;  %vm589_vm7 = vcmp.eq.f32.partialorder %v588_v54, 8.507059e+37  ;;  %v488_v25 = vadd.f32 %v487_v45, %v486_v26  ;;  %v498_v1 = vsel %vm280_vm1, %v3418_v51, 0.0 }
  0xd7   :  { %2854 = vpow2.f32 %v417_v21  ;;  %v592_v11 = vsel %vm589_vm7, %v591_v60, %v587_v49  ;;  %v598_v2 = vadd.f32 %v3371_v52, %v597_v48  ;;  %vm599_vm8 = vweird.f32 %v3327_v59 }
  0xd8   :  { %vm600_vm9 = vweird.f32 %v3371_v52  ;;  %v611_v3 = vsub.f32 1.0, %v610_v42  ;;  %v419_v18 = vmul.f32 1.442695, %v392_v56  ;;  %v605_v33 = vand.u32 2147483648, %v3327_v59  ;;  %v1243_v56 = vld [vmem:[%s4780_s2 + $0xf0] sm:$0xff] }
  0xd9   :  { %2759 = vmatmul.msk.f32.gmra.mxu1 %vm280_vm1, %v578_v17  ;;  %2773 = vmatmul.msk.f32.gmra.mxu2 %vm280_vm1, %v578_v17  ;;  %v494_v23 = vrot.slane %v493_v41, 2  ;;  %v593_v4 = vmul.f32 %v3218_v43, %v592_v11  ;;  %v603_v5 = vand.u32 2147483647, %v3327_v59  ;;  %2856 = vrcp.f32 %v3431_v62  ;;  %vm3446_vm10 = vmor %vm599_vm8, %vm600_vm9 }
  0xda   :  { %2735 = vmatmul.msk.f32.gmra.mxu3 %vm76_vm0, %v3090_v32  ;;  %2748 = vmatmul.msk.f32.gmra.mxu0 %vm76_vm0, %v3035_v19  ;;  %v3440_v19 = vpop.eup %2852  ;;  %v489_v6 = vrot.slane %v488_v25, 1  ;;  %v499_v29 = vrot.slane %v498_v1, 4  ;;  %v602_v8 = vsel %vm3446_vm10, %v3371_v52, %v598_v2  ;;  %v612_v43 = vmul.f32 %v3398_v44, %v611_v3 }
  0xdb   :  { %v625_v59 = vmul.f32 %v3440_v19, %v3400_v15  ;;  %2858 = vpow2.f32 %v419_v18  ;;  %v606_v10 = vor.u32 1.1754944e-38, %v605_v33  ;;  %v495_v7 = vadd.f32 %v494_v23, %v493_v41 }
  0xdc   :  { %vm604_vm11 = vcmp.eq.f32.partialorder %v603_v5, 8.507059e+37  ;;  %vm614_vm12 = vweird.f32 %v3338_v14  ;;  %vm615_vm13 = vweird.f32 %v3398_v44  ;;  %v3464_v12 = vadd.f32 %v489_v6, %v488_v25 }
  0xdd   :  { %v3458_v63 = vpop.eup %2854  ;;  %v500_v52 = vadd.f32 %v499_v29, %v498_v1  ;;  %v607_v55 = vsel %vm604_vm11, %v606_v10, %v602_v8  ;;  %v620_v22 = vand.u32 2147483648, %v3338_v14  ;;  %v613_v24 = vadd.f32 %v3398_v44, %v612_v43  ;;  %vm3475_vm14 = vmor %vm614_vm12, %vm615_vm13 }
  0xde   :  { %v505_v13 = vsel %vm280_vm1, %v3458_v63, 0.0  ;;  %v618_v26 = vand.u32 2147483647, %v3338_v14  ;;  %v496_v30 = vrot.slane %v495_v7, 1  ;;  %v608_v16 = vmul.f32 %v3251_v53, %v607_v55 }
  0xdf   :  { %v3473_v28 = vpop.eup %2856  ;;  %2860 = vrcp.f32 %v3464_v12  ;;  %v501_v34 = vrot.slane %v500_v52, 2  ;;  %v506_v35 = vrot.slane %v505_v13, 4  ;;  %v621_v14 = vor.u32 1.1754944e-38, %v620_v22 }
  0xe0   :  { %v617_v20 = vsel %vm3475_vm14, %v3398_v44, %v613_v24  ;;  %vm619_vm15 = vcmp.eq.f32.partialorder %v618_v26, 8.507059e+37  ;;  %v640_v53 = vmul.f32 %v3473_v28, %v3431_v62  ;;  %v3493_v17 = vadd.f32 %v496_v30, %v495_v7 }
  0xe1   :  { %2760 = vmatmul.msk.f32.gmra.mxu1 %vm280_vm1, %v593_v4  ;;  %2774 = vmatmul.msk.f32.gmra.mxu2 %vm280_vm1, %v593_v4  ;;  %v3480_v31 = vpop.eup %2858  ;;  %vm629_vm2 = vweird.f32 %v3400_v15  ;;  %vm630_vm3 = vweird.f32 %v3440_v19  ;;  %v502_v45 = vadd.f32 %v501_v34, %v500_v52  ;;  %v507_v44 = vadd.f32 %v506_v35, %v505_v13  ;;  %v1227_v35 = vld [vmem:[%s4780_s2 + $0x70] sm:$0xff] }
  0xe2   :  { %2736 = vmatmul.msk.f32.gmra.mxu3 %vm76_vm0, %v3112_v36  ;;  %2749 = vmatmul.msk.f32.gmra.mxu0 %vm76_vm0, %v3090_v32  ;;  %v626_v32 = vsub.f32 1.0, %v625_v59  ;;  %v512_v54 = vsel %vm280_vm1, %v3480_v31, 0.0  ;;  %v622_v21 = vsel %vm619_vm15, %v621_v14, %v617_v20  ;;  %v635_v47 = vand.u32 2147483648, %v3400_v15  ;;  %vm3506_vm4 = vmor %vm629_vm2, %vm630_vm3 }
  0xe3   :  { %v633_v48 = vand.u32 2147483647, %v3400_v15  ;;  %v641_v42 = vsub.f32 1.0, %v640_v53  ;;  %v513_v60 = vrot.slane %v512_v54, 4  ;;  %v623_v41 = vmul.f32 %v3243_v0, %v622_v21  ;;  %v1238_v21 = vld [vmem:[%s4780_s2 + $0xc8] sm:$0xff] }
  0xe4   :  { %v627_v46 = vmul.f32 %v3440_v19, %v626_v32  ;;  %2862 = vrcp.f32 %v3493_v17  ;;  %v503_v25 = vrot.slane %v502_v45, 1  ;;  %v508_v1 = vrot.slane %v507_v44, 2 }
  0xe5   :  { %v636_v11 = vor.u32 1.1754944e-38, %v635_v47  ;;  %vm634_vm5 = vcmp.eq.f32.partialorder %v633_v48, 8.507059e+37  ;;  %v642_v2 = vmul.f32 %v3473_v28, %v641_v42  ;;  %v514_v0 = vadd.f32 %v513_v60, %v512_v54  ;;  %v1226_v60 = vld [vmem:[%s4780_s2 + $0x68] sm:$0xff]  ;;  %v1217_v48 = vld [vmem:[%s4780_s2 + $0x20] sm:$0xff] }
  0xe6   :  { %v628_v49 = vadd.f32 %v3440_v19, %v627_v46  ;;  %vm644_vm6 = vweird.f32 %v3431_v62  ;;  %vm645_vm7 = vweird.f32 %v3473_v28  ;;  %v3524_v18 = vadd.f32 %v503_v25, %v502_v45  ;;  %v1260_v25 = vld [vmem:[%s4780_s2 + $0x178] sm:$0xff] }
  0xe7   :  { %v509_v33 = vadd.f32 %v508_v1, %v507_v44  ;;  %v643_v4 = vadd.f32 %v3473_v28, %v642_v2  ;;  %v648_v5 = vand.u32 2147483647, %v3431_v62  ;;  %vm3533_vm8 = vmor %vm644_vm6, %vm645_vm7  ;;  %v515_v43 = vrot.slane %v514_v0, 2  ;;  %v1275_v1 = vld [vmem:[%s4780_s2 + $0x1f0] sm:$0xff]  ;;  %1494 = vmatpush.msrb.mxu1 %v1260_v25 }
  0xe8   :  { %v632_v15 = vsel %vm3506_vm4, %v3440_v19, %v628_v49  ;;  %v650_v19 = vand.u32 2147483648, %v3431_v62  ;;  %2864 = vrcp.f32 %v3524_v18  ;;  %vm659_vm10 = vweird.f32 %v3464_v12  ;;  %v1259_v2 = vld [vmem:[%s4780_s2 + $0x170] sm:$0xff] }
  0xe9   :  { %2761 = vmatmul.msk.f32.gmra.mxu1 %vm280_vm1, %v608_v16  ;;  %2775 = vmatmul.msk.f32.gmra.mxu2 %vm280_vm1, %v608_v16  ;;  %v637_v23 = vsel %vm634_vm5, %v636_v11, %v632_v15  ;;  %v510_v8 = vrot.slane %v509_v33, 1  ;;  %v647_v62 = vsel %vm3533_vm8, %v3473_v28, %v643_v4  ;;  %vm649_vm9 = vcmp.eq.f32.partialorder %v648_v5, 8.507059e+37  ;;  %v1242_v11 = vld [vmem:[%s4780_s2 + $0xe8] sm:$0xff]  ;;  %v1225_v15 = vld [vmem:[%s4780_s2 + $0x60] sm:$0xff]  ;;  %v1235_v25 = vld [vmem:[%s4780_s2 + $0xb0] sm:$0xff] }
  0xea   :  { %2737 = vmatmul.msk.f32.gmra.mxu3 %vm76_vm0, %v3133_v39  ;;  %2750 = vmatmul.msk.f32.gmra.mxu0 %vm76_vm0, %v3112_v36  ;;  %v3504_v36 = vpop.eup %2860  ;;  %v638_v58 = vmul.f32 %v3278_v61, %v637_v23  ;;  %v651_v59 = vor.u32 1.1754944e-38, %v650_v19  ;;  %v1228_v61 = vld [vmem:[%s4780_s2 + $0x78] sm:$0xff]  ;;  %v516_v55 = vadd.f32 %v515_v43, %v514_v0  ;;  %v665_v13 = vand.u32 2147483648, %v3464_v12  ;;  %v1241_v23 = vld [vmem:[%s4780_s2 + $0xe0] sm:$0xff] }
  0xeb   :  { %v655_v3 = vmul.f32 %v3504_v36, %v3464_v12  ;;  %1446 = vmatpush.msra.mxu3 %v1228_v61  ;;  %vm660_vm11 = vweird.f32 %v3504_v36  ;;  %v3554_v52 = vadd.f32 %v510_v8, %v509_v33  ;;  %v663_v26 = vand.u32 2147483647, %v3464_v12  ;;  %v1224_v19 = vld [vmem:[%s4780_s2 + $0x58] sm:$0xff]  ;;  %1495 = vmatpush.msrb.mxu1 %v1259_v2 }
  0xec   :  { %v652_v22 = vsel %vm649_vm9, %v651_v59, %v647_v62  ;;  %vm3563_vm12 = vmor %vm659_vm10, %vm660_vm11  ;;  %v517_v30 = vrot.slane %v516_v55, 1  ;;  %v666_v16 = vor.u32 1.1754944e-38, %v665_v13  ;;  %vm674_vm14 = vweird.f32 %v3493_v17 }
  0xed   :  { %v656_v6 = vsub.f32 1.0, %v655_v3  ;;  %v653_v27 = vmul.f32 %v3312_v57, %v652_v22  ;;  %2866 = vrcp.f32 %v3554_v52  ;;  %vm664_vm13 = vcmp.eq.f32.partialorder %v663_v26, 8.507059e+37  ;;  %v1244_v57 = vld [vmem:[%s4780_s2 + $0xf8] sm:$0xff]  ;;  %1447 = vmatpush.msra.mxu3 %v1227_v35  ;;  %v1274_v3 = vld [vmem:[%s4780_s2 + $0x1e8] sm:$0xff] }
  0xee   :  { %1466 = vmatpush.msrb.mxu0 %v1244_v57  ;;  %v3587_v14 = vadd.f32 %v517_v30, %v516_v55  ;;  %v680_v46 = vand.u32 2147483648, %v3493_v17  ;;  %v678_v54 = vand.u32 2147483647, %v3493_v17  ;;  %vm689_vm4 = vweird.f32 %v3524_v18  ;;  %v1222_v35 = vld [vmem:[%s4780_s2 + $0x48] sm:$0xff] }
  0xef   :  { %v657_v10 = vmul.f32 %v3504_v36, %v656_v6  ;;  %1448 = vmatpush.msra.mxu3 %v1226_v60  ;;  %v695_v33 = vand.u32 2147483648, %v3524_v18  ;;  %v693_v5 = vand.u32 2147483647, %v3524_v18  ;;  %vm704_vm8 = vweird.f32 %v3554_v52  ;;  %v1271_v60 = vld [vmem:[%s4780_s2 + $0x1d0] sm:$0xff] }
  0xf0   :  { %2868 = vrcp.f32 %v3587_v14  ;;  %v681_v49 = vor.u32 1.1754944e-38, %v680_v46  ;;  %vm3609_vm3 = vcmp.eq.f32.partialorder %v678_v54, 8.507059e+37  ;;  %1467 = vmatpush.msrb.mxu0 %v1243_v56  ;;  %v710_v62 = vand.u32 2147483648, %v3554_v52  ;;  %v1239_v54 = vld [vmem:[%s4780_s2 + $0xd0] sm:$0xff] }
  0xf1   :  { %2762 = vmatmul.msk.f32.gmra.mxu1 %vm280_vm1, %v623_v41  ;;  %2776 = vmatmul.msk.f32.gmra.mxu2 %vm280_vm1, %v623_v41  ;;  %v658_v24 = vadd.f32 %v3504_v36, %v657_v10  ;;  %v2899_v41 = vld [vmem:[%s4777_s0 + $0x60] sm:$0xff]  ;;  %v696_v8 = vor.u32 1.1754944e-38, %v695_v33  ;;  %vm694_vm7 = vcmp.eq.f32.partialorder %v693_v5, 8.507059e+37 }
  0xf2   :  { %2738 = vmatmul.msk.f32.gmra.mxu3 %vm76_vm0, %v3117_v37  ;;  %2751 = vmatmul.msk.f32.gmra.mxu0 %vm76_vm0, %v3133_v39  ;;  %v3531_v39 = vpop.eup %2862  ;;  %v711_v22 = vor.u32 1.1754944e-38, %v710_v62  ;;  %v1213_v5 = vld [vmem:[%s4780_s2] sm:$0xff]  ;;  %v1251_v62 = vld [vmem:[%s4780_s2 + $0x130] sm:$0xff] }
  0xf3   :  { %v670_v7 = vmul.f32 %v3531_v39, %v3493_v17  ;;  %vm675_vm15 = vweird.f32 %v3531_v39  ;;  %1468 = vmatpush.msrb.mxu0 %v1242_v11  ;;  %1449 = vmatpush.msra.mxu3 %v1225_v15  ;;  %v1234_v11 = vld [vmem:[%s4780_s2 + $0xa8] sm:$0xff]  ;;  %v1255_v15 = vld [vmem:[%s4780_s2 + $0x150] sm:$0xff] }
  0xf4   :  { %vm3598_vm2 = vmor %vm674_vm14, %vm675_vm15 }
  0xf5   :  { %v671_v32 = vsub.f32 1.0, %v670_v7  ;;  %1469 = vmatpush.msrb.mxu0 %v1241_v23  ;;  %1450 = vmatpush.msra.mxu3 %v1224_v19  ;;  %v708_v7 = vand.u32 2147483647, %v3554_v52  ;;  %v1233_v23 = vld [vmem:[%s4780_s2 + $0xa0] sm:$0xff] }
  0xf7   :  { %v672_v12 = vmul.f32 %v3531_v39, %v671_v32  ;;  %vm709_vm11 = vcmp.eq.f32.partialorder %v708_v7, 8.507059e+37  ;;  %v725_v32 = vand.u32 2147483648, %v3587_v14 }
  0xf9   :  { %2763 = vmatmul.msk.f32.gmra.mxu1 %vm280_vm1, %v638_v58  ;;  %2777 = vmatmul.msk.f32.gmra.mxu2 %vm280_vm1, %v638_v58  ;;  %v673_v53 = vadd.f32 %v3531_v39, %v672_v12  ;;  %v726_v28 = vor.u32 1.1754944e-38, %v725_v32  ;;  %v1273_v12 = vld [vmem:[%s4780_s2 + $0x1e0] sm:$0xff] }
  0xfa   :  { %2739 = vmatmul.msk.f32.gmra.mxu3 %vm76_vm0, %v3138_v40  ;;  %2752 = vmatmul.msk.f32.gmra.mxu0 %vm76_vm0, %v3117_v37  ;;  %v3561_v37 = vpop.eup %2864 }
  0xfb   :  { %v685_v34 = vmul.f32 %v3561_v37, %v3524_v18  ;;  %v3596_v44 = vpop.eup %2866  ;;  %v677_v17 = vsel %vm3598_vm2, %v3531_v39, %v673_v53  ;;  %vm690_vm5 = vweird.f32 %v3561_v37  ;;  %v1220_v53 = vld [vmem:[%s4780_s2 + $0x38] sm:$0xff] }
  0xfc   :  { %v682_v0 = vsel %vm3609_vm3, %v681_v49, %v677_v17  ;;  %v2869_v39 = vpop.eup %2868  ;;  %vm3664_vm6 = vmor %vm689_vm4, %vm690_vm5  ;;  %vm705_vm9 = vweird.f32 %v3596_v44  ;;  %v1237_v49 = vld [vmem:[%s4780_s2 + $0xc0] sm:$0xff] }
  0xfd   :  { %v686_v45 = vsub.f32 1.0, %v685_v34  ;;  %v683_v58 = vmul.f32 %v3382_v9, %v682_v0  ;;  %v715_v59 = vmul.f32 %v2869_v39, %v3587_v14  ;;  %vm706_vm10 = vmor %vm704_vm8, %vm705_vm9  ;;  %v1240_v34 = vld [vmem:[%s4780_s2 + $0xd8] sm:$0xff]  ;;  %v1254_v0 = vld [vmem:[%s4780_s2 + $0x148] sm:$0xff]  ;;  %vm2229_vm9 = vcmask 254976  }
  0xfe   :  { %1470 = vmatpush.msrb.mxu0 %v1240_v34  ;;  %v1248_v34 = vld [vmem:[%s4780_s2 + $0x118] sm:$0xff] }
  0xff   :  { %v687_v42 = vmul.f32 %v3561_v37, %v686_v45  ;;  %v716_v61 = vsub.f32 1.0, %v715_v59  ;;  %v1292_v59 = vld [vmem:[%s4780_s2 + $0x278] sm:$0xff] }
 0x100   :  { %1471 = vmatpush.msrb.mxu0 %v1239_v54 }
 0x101   :  { %2764 = vmatmul.msk.f32.gmra.mxu1 %vm280_vm1, %v653_v27  ;;  %2778 = vmatmul.msk.f32.gmra.mxu2 %vm280_vm1, %v653_v27  ;;  %v688_v4 = vadd.f32 %v3561_v37, %v687_v42  ;;  %v1236_v42 = vld [vmem:[%s4780_s2 + $0xb8] sm:$0xff] }
 0x102   :  { %2740 = vmatmul.msk.f32.gmra.mxu3 %vm76_vm0, %v3122_v38  ;;  %v662_v38 = vsel %vm3563_vm12, %v3504_v36, %v658_v24  ;;  %2753 = vmatmul.msk.f32.gmra.mxu0 %vm76_vm0, %v3138_v40  ;;  %v2898_v40 = vld [vmem:[%s4777_s0 + $0x68] sm:$0xff]  ;;  %v1276_v36 = vld [vmem:[%s4780_s2 + $0x1f8] sm:$0xff]  ;;  %v717_v24 = vmul.f32 %v2869_v39, %v716_v61  ;;  %vm719_vm12 = vweird.f32 %v3587_v14 }
 0x103   :  { %v667_v20 = vsel %vm664_vm13, %v666_v16, %v662_v38  ;;  %1514 = vmatpush.msrb.mxu2 %v1276_v36  ;;  %v692_v43 = vsel %vm3664_vm6, %v3561_v37, %v688_v4  ;;  %vm720_vm13 = vweird.f32 %v2869_v39  ;;  %v723_v37 = vand.u32 2147483647, %v3587_v14  ;;  %v1258_v38 = vld [vmem:[%s4780_s2 + $0x168] sm:$0xff]  ;;  %1472 = vmatpush.msrb.mxu0 %v1238_v21 }
 0x104   :  { %v668_v47 = vmul.f32 %v3354_v50, %v667_v20  ;;  %v700_v50 = vmul.f32 %v3596_v44, %v3554_v52  ;;  %v697_v9 = vsel %vm694_vm7, %v696_v8, %v692_v43  ;;  %v718_v52 = vadd.f32 %v2869_v39, %v717_v24  ;;  %vm721_vm14 = vmor %vm719_vm12, %vm720_vm13  ;;  %1496 = vmatpush.msrb.mxu1 %v1258_v38  ;;  %v1221_v20 = vld [vmem:[%s4780_s2 + $0x40] sm:$0xff]  ;;  %v1231_v43 = vld [vmem:[%s4780_s2 + $0x90] sm:$0xff] }
 0x105   :  { %1515 = vmatpush.msrb.mxu2 %v1275_v1  ;;  %v698_v55 = vmul.f32 %v3418_v51, %v697_v9  ;;  %vm724_vm15 = vcmp.eq.f32.partialorder %v723_v37, 8.507059e+37  ;;  %1473 = vmatpush.msrb.mxu0 %v1237_v49  ;;  %v1215_v1 = vld [vmem:[%s4780_s2 + $0x10] sm:$0xff]  ;;  %v1230_v9 = vld [vmem:[%s4780_s2 + $0x88] sm:$0xff]  ;;  %vm2652_vm12 = vcmask 1044484   ;;  %vm2655_vm13 = vcmask 1045509  }
 0x106   :  { %v701_v6 = vsub.f32 1.0, %v700_v50  ;;  %v722_v27 = vsel %vm721_vm14, %v2869_v39, %v718_v52  ;;  %v1256_v50 = vld [vmem:[%s4780_s2 + $0x158] sm:$0xff]  ;;  %v1253_v39 = vld [vmem:[%s4780_s2 + $0x140] sm:$0xff]  ;;  %v1250_v61 = vld [vmem:[%s4780_s2 + $0x128] sm:$0xff]  ;;  %vm2658_vm14 = vcmask 1046534  }
 0x107   :  { %1516 = vmatpush.msrb.mxu2 %v1274_v3  ;;  %v727_v30 = vsel %vm724_vm15, %v726_v28, %v722_v27  ;;  %1474 = vmatpush.msrb.mxu0 %v1236_v42  ;;  %v1214_v3 = vld [vmem:[%s4780_s2 + $0x8] sm:$0xff]  ;;  %v1249_v28 = vld [vmem:[%s4780_s2 + $0x120] sm:$0xff]  ;;  %v1268_v27 = vld [vmem:[%s4780_s2 + $0x1b8] sm:$0xff]  ;;  %vm2690_vm15 = vcmask 1047559  }
 0x108   :  { %v702_v18 = vmul.f32 %v3596_v44, %v701_v6  ;;  %v728_v57 = vmul.f32 %v3480_v31, %v727_v30  ;;  %v1257_v31 = vld [vmem:[%s4780_s2 + $0x160] sm:$0xff]  ;;  %v1232_v6 = vld [vmem:[%s4780_s2 + $0x98] sm:$0xff]  ;;  %v1290_v24 = vld [vmem:[%s4780_s2 + $0x268] sm:$0xff] }
 0x109   :  { %2765 = vmatmul.msk.f32.gmra.mxu1 %vm280_vm1, %v668_v47  ;;  %2779 = vmatmul.msk.f32.gmra.mxu2 %vm280_vm1, %v668_v47  ;;  %v1218_v47 = vld [vmem:[%s4780_s2 + $0x28] sm:$0xff]  ;;  %v1289_v30 = vld [vmem:[%s4780_s2 + $0x260] sm:$0xff] }
 0x10a   :  { %2741 = vmatmul.msk.f32.gmra.mxu3 %vm76_vm0, %v2898_v40  ;;  %2754 = vmatmul.msk.f32.gmra.mxu0 %vm76_vm0, %v2899_v41  ;;  %v703_v10 = vadd.f32 %v3596_v44, %v702_v18  ;;  %v1216_v41 = vld [vmem:[%s4780_s2 + $0x18] sm:$0xff]  ;;  %v1306_v21 = vld [vmem:[%s4780_s2 + $0x2e8] sm:$0xff] }
 0x10b   :  { %1517 = vmatpush.msrb.mxu2 %v1273_v12  ;;  %1497 = vmatpush.msrb.mxu1 %v1257_v31  ;;  %v1252_v18 = vld [vmem:[%s4780_s2 + $0x138] sm:$0xff]  ;;  %v1266_v31 = vld [vmem:[%s4780_s2 + $0x1a8] sm:$0xff] }
 0x10c   :  { %v707_v13 = vsel %vm706_vm10, %v3596_v44, %v703_v10  ;;  %v1219_v44 = vld [vmem:[%s4780_s2 + $0x30] sm:$0xff]  ;;  %1475 = vmatpush.msrb.mxu0 %v1235_v25  ;;  %vm2646_vm10 = vcmask 1042434  }
 0x10d   :  { %v712_v26 = vsel %vm709_vm11, %v711_v22, %v707_v13  ;;  %1498 = vmatpush.msrb.mxu1 %v1256_v50  ;;  %v1291_v10 = vld [vmem:[%s4780_s2 + $0x270] sm:$0xff]  ;;  %v1229_v13 = vld [vmem:[%s4780_s2 + $0x80] sm:$0xff]  ;;  %vm2649_vm11 = vcmask 1043459  }
 0x10e   :  { %v713_v51 = vmul.f32 %v3458_v63, %v712_v26  ;;  %v1223_v63 = vld [vmem:[%s4780_s2 + $0x50] sm:$0xff]  ;;  %1476 = vmatpush.msrb.mxu0 %v1234_v11 }
 0x10f   :  { %1451 = vmatpush.msra.mxu3 %v1223_v63  ;;  %1499 = vmatpush.msrb.mxu1 %v1255_v15 }
 0x110   :  { %1477 = vmatpush.msrb.mxu0 %v1233_v23 }
 0x111   :  { %2766 = vmatmul.msk.f32.gmra.mxu1 %vm280_vm1, %v683_v58  ;;  %2780 = vmatmul.msk.f32.gmra.mxu2 %vm280_vm1, %v683_v58  ;;  %v1270_v58 = vld [vmem:[%s4780_s2 + $0x1c8] sm:$0xff] }
 0x112   :  { %2755 = vmatmul.msk.f32.gmra.mxu0 %vm76_vm0, %v2898_v40  ;;  %1452 = vmatpush.msra.mxu3 %v1222_v35  ;;  %v1272_v40 = vld [vmem:[%s4780_s2 + $0x1d8] sm:$0xff] }
 0x113   :  { %1518 = vmatpush.msrb.mxu2 %v1272_v40  ;;  %1500 = vmatpush.msrb.mxu1 %v1254_v0  ;;  %v1288_v35 = vld [vmem:[%s4780_s2 + $0x258] sm:$0xff]  ;;  %v1285_v0 = vld [vmem:[%s4780_s2 + $0x240] sm:$0xff] }
 0x114   :  { %1453 = vmatpush.msra.mxu3 %v1221_v20  ;;  %1478 = vmatpush.msrb.mxu0 %v1232_v6  ;;  %v1307_v20 = vld [vmem:[%s4780_s2 + $0x2f0] sm:$0xff] }
 0x115   :  { %1519 = vmatpush.msrb.mxu2 %v1271_v60  ;;  %1501 = vmatpush.msrb.mxu1 %v1253_v39  ;;  %v1263_v6 = vld [vmem:[%s4780_s2 + $0x190] sm:$0xff]  ;;  %v1284_v39 = vld [vmem:[%s4780_s2 + $0x238] sm:$0xff] }
 0x116   :  { %1454 = vmatpush.msra.mxu3 %v1220_v53  ;;  %1479 = vmatpush.msrb.mxu0 %v1231_v43 }
 0x117   :  { %1520 = vmatpush.msrb.mxu2 %v1270_v58  ;;  %1502 = vmatpush.msrb.mxu1 %v1252_v18  ;;  %v1303_v58 = vld [vmem:[%s4780_s2 + $0x2d0] sm:$0xff]  ;;  %v1324_v18 = vld [vmem:[%s4780_s2 + $0x378] sm:$0xff] }
 0x118   :  { %1455 = vmatpush.msra.mxu3 %v1219_v44  ;;  %1480 = vmatpush.msrb.mxu0 %v1230_v9  ;;  %v1287_v44 = vld [vmem:[%s4780_s2 + $0x250] sm:$0xff] }
 0x119   :  { %2767 = vmatmul.msk.f32.gmra.mxu1 %vm280_vm1, %v698_v55  ;;  %2781 = vmatmul.msk.f32.gmra.mxu2 %vm280_vm1, %v698_v55  ;;  %v1269_v55 = vld [vmem:[%s4780_s2 + $0x1c0] sm:$0xff]  ;;  %v1283_v9 = vld [vmem:[%s4780_s2 + $0x230] sm:$0xff] }
 0x11a   :  { %1456 = vmatpush.msra.mxu3 %v1218_v47  ;;  %1503 = vmatpush.msrb.mxu1 %v1251_v62  ;;  %v1246_v47 = vld [vmem:[%s4780_s2 + $0x108] sm:$0xff] }
 0x11b   :  { %1521 = vmatpush.msrb.mxu2 %v1269_v55  ;;  %1481 = vmatpush.msrb.mxu0 %v1229_v13  ;;  %v1302_v55 = vld [vmem:[%s4780_s2 + $0x2c8] sm:$0xff] }
 0x11c   :  { %1457 = vmatpush.msra.mxu3 %v1217_v48  ;;  %1504 = vmatpush.msrb.mxu1 %v1250_v61  ;;  %v1305_v48 = vld [vmem:[%s4780_s2 + $0x2e0] sm:$0xff] }
 0x11d   :  { %1522 = vmatpush.msrb.mxu2 %v1268_v27  ;;  %v1322_v27 = vld [vmem:[%s4780_s2 + $0x368] sm:$0xff] }
 0x11e   :  { %1458 = vmatpush.msra.mxu3 %v1216_v41  ;;  %1505 = vmatpush.msrb.mxu1 %v1249_v28  ;;  %v1301_v28 = vld [vmem:[%s4780_s2 + $0x2c0] sm:$0xff] }
 0x120   :  { %1459 = vmatpush.msra.mxu3 %v1215_v1  ;;  %1506 = vmatpush.msrb.mxu1 %v1248_v34  ;;  %v1321_v34 = vld [vmem:[%s4780_s2 + $0x360] sm:$0xff] }
 0x121   :  { %2768 = vmatmul.msk.f32.gmra.mxu1 %vm280_vm1, %v713_v51  ;;  %2782 = vmatmul.msk.f32.gmra.mxu2 %vm280_vm1, %v713_v51 }
 0x122   :  { %1460 = vmatpush.msra.mxu3 %v1214_v3  ;;  %v1245_v3 = vld [vmem:[%s4780_s2 + $0x100] sm:$0xff] }
 0x124   :  { %v754_v16 = vpop.f32.mrf.mxu3  ;;  %1461 = vmatpush.msra.mxu3 %v1213_v5 }
 0x126   :  { %v813_v14 = vpop.f32.mrf.mxu0  ;;  %1542 = vmatpush.msrb.mxu3 %v1292_v59  ;;  %v1262_v59 = vld [vmem:[%s4780_s2 + $0x188] sm:$0xff] }
 0x128   :  { %1543 = vmatpush.msrb.mxu3 %v1291_v10 }
 0x129   :  { %2769 = vmatmul.msk.f32.gmra.mxu1 %vm280_vm1, %v728_v57  ;;  %2783 = vmatmul.msk.f32.gmra.mxu2 %vm280_vm1, %v728_v57  ;;  %v1267_v57 = vld [vmem:[%s4780_s2 + $0x1b0] sm:$0xff]  ;;  %vm1441_vm1 = vcmask 1041409  }
 0x12a   :  { %1544 = vmatpush.msrb.mxu3 %v1290_v24  ;;  %1523 = vmatpush.msrb.mxu2 %v1267_v57  ;;  %v1261_v24 = vld [vmem:[%s4780_s2 + $0x180] sm:$0xff] }
 0x12c   :  { %v3713_v46 = vpop.f32.mrf.mxu3  ;;  %1545 = vmatpush.msrb.mxu3 %v1289_v30  ;;  %1524 = vmatpush.msrb.mxu2 %v1266_v31 }
 0x12e   :  { %v3724_v45 = vpop.f32.mrf.mxu0  ;;  %1546 = vmatpush.msrb.mxu3 %v1288_v35  ;;  %v1300_v35 = vld [vmem:[%s4780_s2 + $0x2b8] sm:$0xff] }
 0x130   :  { %1547 = vmatpush.msrb.mxu3 %v1287_v44  ;;  %v1299_v44 = vld [vmem:[%s4780_s2 + $0x2b0] sm:$0xff] }
 0x134   :  { %v3750_v36 = vpop.f32.mrf.mxu3 }
 0x136   :  { %v3770_v2 = vpop.f32.mrf.mxu0 }
 0x13c   :  { %v3790_v29 = vpop.f32.mrf.mxu3 }
 0x13e   :  { %v916_v17 = vpop.f32.mrf.mxu1 }
 0x13f   :  { %v1017_v56 = vmul.f32 %v916_v17, %v754_v16  ;;  %v3825_v26 = vpop.f32.mrf.mxu0  ;;  %v1308_v16 = vld [vmem:[%s4780_s2 + $0x2f8] sm:$0xff]  ;;  %v1286_v17 = vld [vmem:[%s4780_s2 + $0x248] sm:$0xff] }
 0x140   :  { %1562 = vmatpush.msra.mxu0 %v1308_v16  ;;  %1548 = vmatpush.msrb.mxu3 %v1286_v17 }
 0x141   :  { %v1045_v19 = vrot.slane %v1017_v56, 4 }
 0x142   :  { %1563 = vmatpush.msra.mxu0 %v1307_v20  ;;  %1549 = vmatpush.msrb.mxu3 %v1285_v0  ;;  %v1297_v0 = vld [vmem:[%s4780_s2 + $0x2a0] sm:$0xff] }
 0x143   :  { %v1046_v8 = vadd.f32 %v1045_v19, %v1017_v56 }
 0x144   :  { %v975_v33 = vpop.f32.mrf.mxu2  ;;  %1564 = vmatpush.msra.mxu0 %v1306_v21  ;;  %1550 = vmatpush.msrb.mxu3 %v1284_v39  ;;  %v1339_v21 = vld [vmem:[%s4780_s2 + $0x3f0] sm:$0xff]  ;;  %v1336_v39 = vld [vmem:[%s4780_s2 + $0x3d8] sm:$0xff] }
 0x145   :  { %v1018_v4 = vmul.f32 %v975_v33, %v813_v14  ;;  %v1047_v32 = vrot.slane %v1046_v8, 2  ;;  %v3840_v38 = vpop.f32.mrf.mxu3  ;;  %v1304_v33 = vld [vmem:[%s4780_s2 + $0x2d8] sm:$0xff] }
 0x146   :  { %v919_v22 = vpop.f32.mrf.mxu1  ;;  %1565 = vmatpush.msra.mxu0 %v1305_v48  ;;  %1551 = vmatpush.msrb.mxu3 %v1283_v9  ;;  %v1319_v48 = vld [vmem:[%s4780_s2 + $0x350] sm:$0xff] }
 0x147   :  { %v1051_v7 = vrot.slane %v1018_v4, 4  ;;  %v1019_v52 = vmul.f32 %v919_v22, %v3713_v46  ;;  %v1048_v12 = vadd.f32 %v1047_v32, %v1046_v8  ;;  %v1247_v46 = vld [vmem:[%s4780_s2 + $0x110] sm:$0xff]  ;;  %v3880_v41 = vpop.f32.mrf.mxu0 }
 0x148   :  { %1507 = vmatpush.msrb.mxu1 %v1247_v46  ;;  %1566 = vmatpush.msra.mxu0 %v1304_v33  ;;  %v1323_v22 = vld [vmem:[%s4780_s2 + $0x370] sm:$0xff] }
 0x149   :  { %v1052_v37 = vadd.f32 %v1051_v7, %v1018_v4  ;;  %v1057_v51 = vrot.slane %v1019_v52, 4  ;;  %v1049_v42 = vrot.slane %v1048_v12, 1  ;;  %v1335_v9 = vld [vmem:[%s4780_s2 + $0x3d0] sm:$0xff] }
 0x14a   :  { %1508 = vmatpush.msrb.mxu1 %v1246_v47  ;;  %1567 = vmatpush.msra.mxu0 %v1303_v58  ;;  %v1279_v47 = vld [vmem:[%s4780_s2 + $0x210] sm:$0xff] }
 0x14b   :  { %v1058_v63 = vadd.f32 %v1057_v51, %v1019_v52  ;;  %v1053_v53 = vrot.slane %v1052_v37, 2  ;;  %v1050_v23 = vadd.f32 %v1049_v42, %v1048_v12  ;;  %v1338_v42 = vld [vmem:[%s4780_s2 + $0x3e8] sm:$0xff] }
 0x14c   :  { %v978_v14 = vpop.f32.mrf.mxu2  ;;  %1509 = vmatpush.msrb.mxu1 %v1245_v3  ;;  %1568 = vmatpush.msra.mxu0 %v1302_v55  ;;  %v1318_v3 = vld [vmem:[%s4780_s2 + $0x348] sm:$0xff]  ;;  %v1356_v55 = vld [vmem:[%s4780_s2 + $0x478] sm:$0xff] }
 0x14d   :  { %v1059_v54 = vrot.slane %v1058_v63, 2  ;;  %v1020_v40 = vmul.f32 %v978_v14, %v3724_v45  ;;  %v1265_v45 = vld [vmem:[%s4780_s2 + $0x1a0] sm:$0xff]  ;;  %v1054_v25 = vadd.f32 %v1053_v53, %v1052_v37  ;;  %v3903_v43 = vpop.f32.mrf.mxu3  ;;  %v1340_v14 = vld [vmem:[%s4780_s2 + $0x3f8] sm:$0xff] }
 0x14e   :  { %v922_v49 = vpop.f32.mrf.mxu1  ;;  %1525 = vmatpush.msrb.mxu2 %v1265_v45  ;;  %1590 = vmatpush.msra.mxu1 %v1324_v18  ;;  %v1280_v53 = vld [vmem:[%s4780_s2 + $0x218] sm:$0xff] }
 0x14f   :  { %v1060_v50 = vadd.f32 %v1059_v54, %v1058_v63  ;;  %v1063_v56 = vrot.slane %v1020_v40, 4  ;;  %v1021_v60 = vmul.f32 %v922_v49, %v3750_v36  ;;  %v1264_v36 = vld [vmem:[%s4780_s2 + $0x198] sm:$0xff]  ;;  %v1055_v62 = vrot.slane %v1054_v25, 1  ;;  %1569 = vmatpush.msra.mxu0 %v1301_v28  ;;  %v3941_v57 = vpop.f32.mrf.mxu0 }
 0x150   :  { %1526 = vmatpush.msrb.mxu2 %v1264_v36  ;;  %1591 = vmatpush.msra.mxu1 %v1323_v22  ;;  %v1320_v54 = vld [vmem:[%s4780_s2 + $0x358] sm:$0xff]  ;;  %v1337_v36 = vld [vmem:[%s4780_s2 + $0x3e0] sm:$0xff] }
 0x151   :  { %v1061_v1 = vrot.slane %v1060_v50, 1  ;;  %v1064_v11 = vadd.f32 %v1063_v56, %v1020_v40  ;;  %v1069_v15 = vrot.slane %v1021_v60, 4  ;;  %v1056_v30 = vadd.f32 %v1055_v62, %v1054_v25  ;;  %1570 = vmatpush.msra.mxu0 %v1300_v35 }
 0x152   :  { %1527 = vmatpush.msrb.mxu2 %v1263_v6  ;;  %1592 = vmatpush.msra.mxu1 %v1322_v27  ;;  %v1296_v6 = vld [vmem:[%s4780_s2 + $0x298] sm:$0xff] }
 0x153   :  { %v1062_v19 = vadd.f32 %v1061_v1, %v1060_v50  ;;  %v1065_v4 = vrot.slane %v1064_v11, 2  ;;  %v1070_v5 = vadd.f32 %v1069_v15, %v1021_v60  ;;  %v1298_v60 = vld [vmem:[%s4780_s2 + $0x2a8] sm:$0xff]  ;;  %1571 = vmatpush.msra.mxu0 %v1299_v44 }
 0x154   :  { %v981_v8 = vpop.f32.mrf.mxu2  ;;  %1528 = vmatpush.msrb.mxu2 %v1262_v59  ;;  %1593 = vmatpush.msra.mxu1 %v1321_v34  ;;  %v1293_v34 = vld [vmem:[%s4780_s2 + $0x280] sm:$0xff] }
 0x155   :  { %v1066_v10 = vadd.f32 %v1065_v4, %v1064_v11  ;;  %v1022_v7 = vmul.f32 %v981_v8, %v3770_v2  ;;  %v1442_v61 = vsel %vm1441_vm1, %v1062_v19, %v1050_v23  ;;  %v1282_v2 = vld [vmem:[%s4780_s2 + $0x228] sm:$0xff]  ;;  %v1071_v52 = vrot.slane %v1070_v5, 2  ;;  %v3972_v56 = vpop.f32.mrf.mxu3  ;;  %1572 = vmatpush.msra.mxu0 %v1298_v60  ;;  %v1277_v4 = vld [vmem:[%s4780_s2 + $0x200] sm:$0xff] }
 0x156   :  { %v925_v13 = vpop.f32.mrf.mxu1  ;;  %1462 = vmatmul.f32.vlgmr.msra.gmra.mxu3 %v1442_v61  ;;  %1529 = vmatpush.msrb.mxu2 %v1261_v24  ;;  %v1316_v61 = vld [vmem:[%s4780_s2 + $0x338] sm:$0xff] }
 0x157   :  { %v1067_v32 = vrot.slane %v1066_v10, 1  ;;  %v1075_v37 = vrot.slane %v1022_v7, 4  ;;  %v1023_v51 = vmul.f32 %v925_v13, %v3790_v29  ;;  %1552 = vmatpush.msrb.mxu3 %v1282_v2  ;;  %v1281_v29 = vld [vmem:[%s4780_s2 + $0x220] sm:$0xff]  ;;  %v1072_v20 = vadd.f32 %v1071_v52, %v1070_v5  ;;  %1594 = vmatpush.msra.mxu1 %v1320_v54  ;;  %v1355_v52 = vld [vmem:[%s4780_s2 + $0x470] sm:$0xff]  ;;  %v1332_v54 = vld [vmem:[%s4780_s2 + $0x3b8] sm:$0xff] }
 0x158   :  { %1610 = vmatpush.msra.mxu2 %v1340_v14  ;;  %v1317_v5 = vld [vmem:[%s4780_s2 + $0x340] sm:$0xff]  ;;  %1573 = vmatpush.msra.mxu0 %v1297_v0 }
 0x159   :  { %v1068_v16 = vadd.f32 %v1067_v32, %v1066_v10  ;;  %v1076_v12 = vadd.f32 %v1075_v37, %v1022_v7  ;;  %v1081_v63 = vrot.slane %v1023_v51, 4  ;;  %1553 = vmatpush.msrb.mxu3 %v1281_v29  ;;  %v1073_v25 = vrot.slane %v1072_v20, 1  ;;  %1595 = vmatpush.msra.mxu1 %v1319_v48  ;;  %v4005_v10 = vpop.f32.mrf.mxu0  ;;  %v1295_v7 = vld [vmem:[%s4780_s2 + $0x290] sm:$0xff]  ;;  %v1334_v32 = vld [vmem:[%s4780_s2 + $0x3c8] sm:$0xff] }
 0x15a   :  { %1611 = vmatpush.msra.mxu2 %v1339_v21  ;;  %1574 = vmatpush.msra.mxu0 %v1296_v6  ;;  %v1331_v48 = vld [vmem:[%s4780_s2 + $0x3b0] sm:$0xff] }
 0x15b   :  { %v1082_v46 = vadd.f32 %v1081_v63, %v1023_v51  ;;  %v1443_v31 = vsel %vm1441_vm1, %v1068_v16, %v1056_v30  ;;  %v1077_v49 = vrot.slane %v1076_v12, 2  ;;  %1554 = vmatpush.msrb.mxu3 %v1280_v53  ;;  %1596 = vmatpush.msra.mxu1 %v1318_v3  ;;  %v1074_v58 = vadd.f32 %v1073_v25, %v1072_v20  ;;  %v1294_v51 = vld [vmem:[%s4780_s2 + $0x288] sm:$0xff]  ;;  %v1313_v53 = vld [vmem:[%s4780_s2 + $0x320] sm:$0xff]  ;;  %v1351_v25 = vld [vmem:[%s4780_s2 + $0x450] sm:$0xff] }
 0x15c   :  { %v984_v40 = vpop.f32.mrf.mxu2  ;;  %1482 = vmatmul.f32.vlgmr.msrb.gmra.mxu0 %v1443_v31  ;;  %1612 = vmatpush.msra.mxu2 %v1338_v42  ;;  %v1354_v63 = vld [vmem:[%s4780_s2 + $0x468] sm:$0xff]  ;;  %v1353_v31 = vld [vmem:[%s4780_s2 + $0x460] sm:$0xff] }
 0x15d   :  { %v1083_v45 = vrot.slane %v1082_v46, 2  ;;  %v1024_v17 = vmul.f32 %v984_v40, %v3825_v26  ;;  %v1278_v26 = vld [vmem:[%s4780_s2 + $0x208] sm:$0xff]  ;;  %1555 = vmatpush.msrb.mxu3 %v1279_v47  ;;  %v1078_v33 = vadd.f32 %v1077_v49, %v1076_v12  ;;  %1597 = vmatpush.msra.mxu1 %v1317_v5  ;;  %v1333_v12 = vld [vmem:[%s4780_s2 + $0x3c0] sm:$0xff]  ;;  %v4037_v29 = vpop.f32.mrf.mxu3  ;;  %v1372_v47 = vld [vmem:[%s4780_s2 + $0x4f8] sm:$0xff] }
 0x15e   :  { %v928_v50 = vpop.f32.mrf.mxu1  ;;  %1613 = vmatpush.msra.mxu2 %v1337_v36  ;;  %1575 = vmatpush.msra.mxu0 %v1295_v7  ;;  %v1352_v49 = vld [vmem:[%s4780_s2 + $0x458] sm:$0xff] }
 0x15f   :  { %v1084_v1 = vadd.f32 %v1083_v45, %v1082_v46  ;;  %v1087_v11 = vrot.slane %v1024_v17, 4  ;;  %v1025_v15 = vmul.f32 %v928_v50, %v3840_v38  ;;  %1556 = vmatpush.msrb.mxu3 %v1278_v26  ;;  %v1079_v22 = vrot.slane %v1078_v33, 1  ;;  %1598 = vmatpush.msra.mxu1 %v1316_v61  ;;  %v1371_v26 = vld [vmem:[%s4780_s2 + $0x4f0] sm:$0xff] }
 0x160   :  { %1614 = vmatpush.msra.mxu2 %v1336_v39  ;;  %1576 = vmatpush.msra.mxu0 %v1294_v51 }
 0x161   :  { %v1085_v23 = vrot.slane %v1084_v1, 1  ;;  %v1088_v19 = vadd.f32 %v1087_v11, %v1024_v17  ;;  %v1093_v38 = vrot.slane %v1025_v15, 4  ;;  %1557 = vmatpush.msrb.mxu3 %v1277_v4  ;;  %v1080_v35 = vadd.f32 %v1079_v22, %v1078_v33  ;;  %v1312_v17 = vld [vmem:[%s4780_s2 + $0x318] sm:$0xff]  ;;  %v4074_v11 = vpop.f32.mrf.mxu0 }
 0x162   :  { %1615 = vmatpush.msra.mxu2 %v1335_v9  ;;  %1577 = vmatpush.msra.mxu0 %v1293_v34  ;;  %v1328_v9 = vld [vmem:[%s4780_s2 + $0x398] sm:$0xff] }
 0x163   :  { %v1086_v8 = vadd.f32 %v1085_v23, %v1084_v1  ;;  %v1089_v18 = vrot.slane %v1088_v19, 2  ;;  %v1094_v59 = vadd.f32 %v1093_v38, %v1025_v15  ;;  %1638 = vmatpush.msra.mxu3 %v1356_v55  ;;  %v1311_v15 = vld [vmem:[%s4780_s2 + $0x310] sm:$0xff]  ;;  %v1370_v23 = vld [vmem:[%s4780_s2 + $0x4e8] sm:$0xff]  ;;  %v1368_v22 = vld [vmem:[%s4780_s2 + $0x4d8] sm:$0xff] }
 0x164   :  { %v987_v62 = vpop.f32.mrf.mxu2  ;;  %1616 = vmatpush.msra.mxu2 %v1334_v32  ;;  %1658 = vmatpush.msrb.mxu0 %v1372_v47  ;;  %v1310_v38 = vld [vmem:[%s4780_s2 + $0x308] sm:$0xff] }
 0x165   :  { %v1090_v13 = vadd.f32 %v1089_v18, %v1088_v19  ;;  %v1026_v24 = vmul.f32 %v987_v62, %v3880_v41  ;;  %v1490_v2 = vsel %vm1441_vm1, %v1086_v8, %v1074_v58  ;;  %v1315_v41 = vld [vmem:[%s4780_s2 + $0x330] sm:$0xff]  ;;  %v1095_v27 = vrot.slane %v1094_v59, 2  ;;  %1639 = vmatpush.msra.mxu3 %v1355_v52  ;;  %v1350_v19 = vld [vmem:[%s4780_s2 + $0x448] sm:$0xff]  ;;  %v1369_v58 = vld [vmem:[%s4780_s2 + $0x4e0] sm:$0xff]  ;;  %v4101_v18 = vpop.f32.mrf.mxu3 }
 0x166   :  { %v931_v37 = vpop.f32.mrf.mxu1  ;;  %1510 = vmatmul.f32.vlgmr.msrb.gmra.mxu1 %v1490_v2  ;;  %1617 = vmatpush.msra.mxu2 %v1333_v12  ;;  %v1349_v8 = vld [vmem:[%s4780_s2 + $0x440] sm:$0xff]  ;;  %v1348_v2 = vld [vmem:[%s4780_s2 + $0x438] sm:$0xff] }
 0x167   :  { %v1091_v28 = vrot.slane %v1090_v13, 1  ;;  %v1099_v30 = vrot.slane %v1026_v24, 4  ;;  %v1027_v16 = vmul.f32 %v931_v37, %v3903_v43  ;;  %v1314_v43 = vld [vmem:[%s4780_s2 + $0x328] sm:$0xff]  ;;  %1599 = vmatpush.msra.mxu1 %v1315_v41  ;;  %1640 = vmatpush.msra.mxu3 %v1354_v63  ;;  %v1096_v40 = vadd.f32 %v1095_v27, %v1094_v59  ;;  %v1309_v59 = vld [vmem:[%s4780_s2 + $0x300] sm:$0xff]  ;;  %v1367_v41 = vld [vmem:[%s4780_s2 + $0x4d0] sm:$0xff] }
 0x168   :  { %1618 = vmatpush.msra.mxu2 %v1332_v54  ;;  %1659 = vmatpush.msrb.mxu0 %v1371_v26  ;;  %v1344_v26 = vld [vmem:[%s4780_s2 + $0x418] sm:$0xff] }
 0x169   :  { %v1092_v14 = vadd.f32 %v1091_v28, %v1090_v13  ;;  %v1100_v20 = vadd.f32 %v1099_v30, %v1026_v24  ;;  %v1105_v46 = vrot.slane %v1027_v16, 4  ;;  %1600 = vmatpush.msra.mxu1 %v1314_v43  ;;  %1641 = vmatpush.msra.mxu3 %v1353_v31  ;;  %v1097_v3 = vrot.slane %v1096_v40, 1  ;;  %v1327_v24 = vld [vmem:[%s4780_s2 + $0x390] sm:$0xff]  ;;  %v1388_v28 = vld [vmem:[%s4780_s2 + $0x578] sm:$0xff]  ;;  %v1326_v30 = vld [vmem:[%s4780_s2 + $0x388] sm:$0xff] }
 0x16a   :  { %1619 = vmatpush.msra.mxu2 %v1331_v48  ;;  %1660 = vmatpush.msrb.mxu0 %v1370_v23  ;;  %v1366_v43 = vld [vmem:[%s4780_s2 + $0x4c8] sm:$0xff]  ;;  %v1404_v48 = vld [vmem:[%s4780_s2 + $0x5f8] sm:$0xff] }
 0x16b   :  { %v1106_v44 = vadd.f32 %v1105_v46, %v1027_v16  ;;  %v1491_v21 = vsel %vm1441_vm1, %v1092_v14, %v1080_v35  ;;  %v1101_v42 = vrot.slane %v1100_v20, 2  ;;  %1601 = vmatpush.msra.mxu1 %v1313_v53  ;;  %1642 = vmatpush.msra.mxu3 %v1352_v49  ;;  %v1098_v62 = vadd.f32 %v1097_v3, %v1096_v40  ;;  %v1387_v35 = vld [vmem:[%s4780_s2 + $0x570] sm:$0xff]  ;;  %v4139_v14 = vpop.f32.mrf.mxu0  ;;  %v1386_v40 = vld [vmem:[%s4780_s2 + $0x568] sm:$0xff] }
 0x16c   :  { %v990_v45 = vpop.f32.mrf.mxu2  ;;  %1530 = vmatmul.f32.vlgmr.msrb.gmra.mxu2 %v1491_v21  ;;  %1661 = vmatpush.msrb.mxu0 %v1369_v58  ;;  %v1345_v21 = vld [vmem:[%s4780_s2 + $0x420] sm:$0xff]  ;;  %v1403_v3 = vld [vmem:[%s4780_s2 + $0x5f0] sm:$0xff] }
 0x16d   :  { %v1107_v50 = vrot.slane %v1106_v44, 2  ;;  %v1028_v60 = vmul.f32 %v990_v45, %v3941_v57  ;;  %v1330_v57 = vld [vmem:[%s4780_s2 + $0x3a8] sm:$0xff]  ;;  %1602 = vmatpush.msra.mxu1 %v1312_v17  ;;  %1643 = vmatpush.msra.mxu3 %v1351_v25  ;;  %v1102_v4 = vadd.f32 %v1101_v42, %v1100_v20  ;;  %v1325_v20 = vld [vmem:[%s4780_s2 + $0x380] sm:$0xff] }
 0x16e   :  { %v934_v1 = vpop.f32.mrf.mxu1  ;;  %1620 = vmatpush.msra.mxu2 %v1330_v57  ;;  %1662 = vmatpush.msrb.mxu0 %v1368_v22  ;;  %v1385_v17 = vld [vmem:[%s4780_s2 + $0x560] sm:$0xff]  ;;  %v1384_v57 = vld [vmem:[%s4780_s2 + $0x558] sm:$0xff] }
 0x16f   :  { %v1108_v36 = vadd.f32 %v1107_v50, %v1106_v44  ;;  %v1111_v0 = vrot.slane %v1028_v60, 4  ;;  %v1029_v33 = vmul.f32 %v934_v1, %v3972_v56  ;;  %v1329_v56 = vld [vmem:[%s4780_s2 + $0x3a0] sm:$0xff]  ;;  %1603 = vmatpush.msra.mxu1 %v1311_v15  ;;  %1644 = vmatpush.msra.mxu3 %v1350_v19  ;;  %v1103_v32 = vrot.slane %v1102_v4, 1  ;;  %v4163_v50 = vpop.f32.mrf.mxu3 }
 0x170   :  { %1621 = vmatpush.msra.mxu2 %v1329_v56  ;;  %1663 = vmatpush.msrb.mxu0 %v1367_v41  ;;  %v1365_v44 = vld [vmem:[%s4780_s2 + $0x4c0] sm:$0xff]  ;;  %v1383_v56 = vld [vmem:[%s4780_s2 + $0x550] sm:$0xff] }
 0x171   :  { %v1109_v5 = vrot.slane %v1108_v36, 1  ;;  %v1112_v6 = vadd.f32 %v1111_v0, %v1028_v60  ;;  %v1117_v39 = vrot.slane %v1029_v33, 4  ;;  %1604 = vmatpush.msra.mxu1 %v1310_v38  ;;  %1645 = vmatpush.msra.mxu3 %v1349_v8  ;;  %v1104_v46 = vadd.f32 %v1103_v32, %v1102_v4  ;;  %v1364_v60 = vld [vmem:[%s4780_s2 + $0x4b8] sm:$0xff]  ;;  %v1363_v0 = vld [vmem:[%s4780_s2 + $0x4b0] sm:$0xff]  ;;  %v1402_v4 = vld [vmem:[%s4780_s2 + $0x5e8] sm:$0xff] }
 0x172   :  { %1622 = vmatpush.msra.mxu2 %v1328_v9  ;;  %1664 = vmatpush.msrb.mxu0 %v1366_v43  ;;  %v1401_v9 = vld [vmem:[%s4780_s2 + $0x5e0] sm:$0xff] }
 0x173   :  { %v1110_v7 = vadd.f32 %v1109_v5, %v1108_v36  ;;  %v1113_v61 = vrot.slane %v1112_v6, 2  ;;  %v1118_v55 = vadd.f32 %v1117_v39, %v1029_v33  ;;  %1605 = vmatpush.msra.mxu1 %v1309_v59  ;;  %1646 = vmatpush.msra.mxu3 %v1348_v2  ;;  %v1362_v5 = vld [vmem:[%s4780_s2 + $0x4a8] sm:$0xff]  ;;  %v1400_v2 = vld [vmem:[%s4780_s2 + $0x5d8] sm:$0xff] }
 0x174   :  { %v993_v13 = vpop.f32.mrf.mxu2  ;;  %1623 = vmatpush.msra.mxu2 %v1327_v24  ;;  %1665 = vmatpush.msrb.mxu0 %v1365_v44  ;;  %v1382_v59 = vld [vmem:[%s4780_s2 + $0x548] sm:$0xff] }
 0x175   :  { %v1114_v52 = vadd.f32 %v1113_v61, %v1112_v6  ;;  %v1030_v37 = vmul.f32 %v993_v13, %v4005_v10  ;;  %v1538_v51 = vsel %vm1441_vm1, %v1110_v7, %v1098_v62  ;;  %v1347_v10 = vld [vmem:[%s4780_s2 + $0x430] sm:$0xff]  ;;  %v1119_v12 = vrot.slane %v1118_v55, 2  ;;  %1686 = vmatpush.msrb.mxu1 %v1388_v28  ;;  %v1342_v6 = vld [vmem:[%s4780_s2 + $0x408] sm:$0xff]  ;;  %v4203_v62 = vpop.f32.mrf.mxu0  ;;  %v1361_v7 = vld [vmem:[%s4780_s2 + $0x4a0] sm:$0xff] }
 0x176   :  { %v937_v27 = vpop.f32.mrf.mxu1  ;;  %1558 = vmatmul.f32.vlgmr.msrb.gmra.mxu3 %v1538_v51  ;;  %1624 = vmatpush.msra.mxu2 %v1326_v30  ;;  %v1341_v61 = vld [vmem:[%s4780_s2 + $0x400] sm:$0xff]  ;;  %v1399_v30 = vld [vmem:[%s4780_s2 + $0x5d0] sm:$0xff] }
 0x177   :  { %v1115_v16 = vrot.slane %v1114_v52, 1  ;;  %v1123_v63 = vrot.slane %v1030_v37, 4  ;;  %v1031_v34 = vmul.f32 %v937_v27, %v4037_v29  ;;  %v1346_v29 = vld [vmem:[%s4780_s2 + $0x428] sm:$0xff]  ;;  %1647 = vmatpush.msra.mxu3 %v1347_v10  ;;  %1687 = vmatpush.msrb.mxu1 %v1387_v35  ;;  %v1120_v47 = vadd.f32 %v1119_v12, %v1118_v55  ;;  %v1420_v10 = vld [vmem:[%s4780_s2 + $0x678] sm:$0xff]  ;;  %v784_v12 = vpop.f32.mrf.mxu3 }
 0x178   :  { %1625 = vmatpush.msra.mxu2 %v1325_v20  ;;  %1666 = vmatpush.msrb.mxu0 %v1364_v60  ;;  %v1417_v60 = vld [vmem:[%s4780_s2 + $0x660] sm:$0xff] }
 0x179   :  { %v1116_v31 = vadd.f32 %v1115_v16, %v1114_v52  ;;  %v1124_v53 = vadd.f32 %v1123_v63, %v1030_v37  ;;  %v1129_v54 = vrot.slane %v1031_v34, 4  ;;  %1648 = vmatpush.msra.mxu3 %v1346_v29  ;;  %1688 = vmatpush.msrb.mxu1 %v1386_v40  ;;  %v1121_v33 = vrot.slane %v1120_v47, 1  ;;  %v1360_v52 = vld [vmem:[%s4780_s2 + $0x498] sm:$0xff]  ;;  %v1381_v37 = vld [vmem:[%s4780_s2 + $0x540] sm:$0xff]  ;;  %v1359_v63 = vld [vmem:[%s4780_s2 + $0x490] sm:$0xff] }
 0x17a   :  { %1706 = vmatpush.msrb.mxu2 %v1404_v48  ;;  %1667 = vmatpush.msrb.mxu0 %v1363_v0  ;;  %v1398_v29 = vld [vmem:[%s4780_s2 + $0x5c8] sm:$0xff]  ;;  %v1396_v0 = vld [vmem:[%s4780_s2 + $0x5b8] sm:$0xff] }
 0x17b   :  { %v1130_v49 = vadd.f32 %v1129_v54, %v1031_v34  ;;  %v1539_v45 = vsel %vm1441_vm1, %v1116_v31, %v1104_v46  ;;  %v1125_v25 = vrot.slane %v1124_v53, 2  ;;  %1649 = vmatpush.msra.mxu3 %v1345_v21  ;;  %1689 = vmatpush.msrb.mxu1 %v1385_v17  ;;  %v1122_v55 = vadd.f32 %v1121_v33, %v1120_v47  ;;  %v1380_v34 = vld [vmem:[%s4780_s2 + $0x538] sm:$0xff]  ;;  %v1419_v46 = vld [vmem:[%s4780_s2 + $0x670] sm:$0xff]  ;;  %v1358_v31 = vld [vmem:[%s4780_s2 + $0x488] sm:$0xff] }
 0x17c   :  { %v996_v42 = vpop.f32.mrf.mxu2  ;;  %1578 = vmatmul.f32.vlgmr.msra.gmra.mxu0 %v1539_v45  ;;  %1707 = vmatpush.msrb.mxu2 %v1403_v3  ;;  %v1418_v47 = vld [vmem:[%s4780_s2 + $0x668] sm:$0xff] }
 0x17d   :  { %v1131_v1 = vrot.slane %v1130_v49, 2  ;;  %v1032_v15 = vmul.f32 %v996_v42, %v4074_v11  ;;  %v1343_v11 = vld [vmem:[%s4780_s2 + $0x410] sm:$0xff]  ;;  %1650 = vmatpush.msra.mxu3 %v1344_v26  ;;  %1690 = vmatpush.msrb.mxu1 %v1384_v57  ;;  %v1126_v39 = vadd.f32 %v1125_v25, %v1124_v53  ;;  %v1378_v45 = vld [vmem:[%s4780_s2 + $0x528] sm:$0xff]  ;;  %v843_v25 = vpop.f32.mrf.mxu0 }
 0x17e   :  { %v940_v36 = vpop.f32.mrf.mxu1  ;;  %1708 = vmatpush.msrb.mxu2 %v1402_v4  ;;  %1668 = vmatpush.msrb.mxu0 %v1362_v5  ;;  %v1379_v53 = vld [vmem:[%s4780_s2 + $0x530] sm:$0xff] }
 0x17f   :  { %v1132_v23 = vadd.f32 %v1131_v1, %v1130_v49  ;;  %v1135_v19 = vrot.slane %v1032_v15, 4  ;;  %v1033_v38 = vmul.f32 %v940_v36, %v4101_v18  ;;  %1651 = vmatpush.msra.mxu3 %v1343_v11  ;;  %1691 = vmatpush.msrb.mxu1 %v1383_v56  ;;  %v1127_v51 = vrot.slane %v1126_v39, 1  ;;  %v1357_v49 = vld [vmem:[%s4780_s2 + $0x480] sm:$0xff]  ;;  %v1416_v11 = vld [vmem:[%s4780_s2 + $0x658] sm:$0xff] }
 0x180   :  { %1709 = vmatpush.msrb.mxu2 %v1401_v9  ;;  %1669 = vmatpush.msrb.mxu0 %v1361_v7  ;;  %v1377_v1 = vld [vmem:[%s4780_s2 + $0x520] sm:$0xff] }
 0x181   :  { %v1133_v58 = vrot.slane %v1132_v23, 1  ;;  %v1136_v8 = vadd.f32 %v1135_v19, %v1032_v15  ;;  %v1141_v18 = vrot.slane %v1033_v38, 4  ;;  %1652 = vmatpush.msra.mxu3 %v1342_v6  ;;  %1692 = vmatpush.msrb.mxu1 %v1382_v59  ;;  %v1128_v54 = vadd.f32 %v1127_v51, %v1126_v39  ;;  %v1436_v15 = vld [vmem:[%s4780_s2 + $0x6f8] sm:$0xff]  ;;  %v1435_v19 = vld [vmem:[%s4780_s2 + $0x6f0] sm:$0xff] }
 0x182   :  { %1710 = vmatpush.msrb.mxu2 %v1400_v2  ;;  %1670 = vmatpush.msrb.mxu0 %v1360_v52  ;;  %v1395_v6 = vld [vmem:[%s4780_s2 + $0x5b0] sm:$0xff] }
 0x183   :  { %v1134_v22 = vadd.f32 %v1133_v58, %v1132_v23  ;;  %v1137_v13 = vrot.slane %v1136_v8, 2  ;;  %v1142_v24 = vadd.f32 %v1141_v18, %v1033_v38  ;;  %1653 = vmatpush.msra.mxu3 %v1341_v61  ;;  %1693 = vmatpush.msrb.mxu1 %v1381_v37  ;;  %v1376_v23 = vld [vmem:[%s4780_s2 + $0x518] sm:$0xff]  ;;  %v1415_v39 = vld [vmem:[%s4780_s2 + $0x650] sm:$0xff]  ;;  %v787_v58 = vpop.f32.mrf.mxu3  ;;  %v1434_v18 = vld [vmem:[%s4780_s2 + $0x6e8] sm:$0xff] }
 0x184   :  { %v999_v32 = vpop.f32.mrf.mxu2  ;;  %1711 = vmatpush.msrb.mxu2 %v1399_v30  ;;  %1671 = vmatpush.msrb.mxu0 %v1359_v63  ;;  %v1394_v61 = vld [vmem:[%s4780_s2 + $0x5a8] sm:$0xff]  ;;  %v1393_v37 = vld [vmem:[%s4780_s2 + $0x5a0] sm:$0xff]  ;;  %v1432_v63 = vld [vmem:[%s4780_s2 + $0x6d8] sm:$0xff] }
 0x185   :  { %v1138_v41 = vadd.f32 %v1137_v13, %v1136_v8  ;;  %v1034_v28 = vmul.f32 %v999_v32, %v4139_v14  ;;  %v1586_v27 = vsel %vm1441_vm1, %v1134_v22, %v1122_v55  ;;  %v1143_v35 = vrot.slane %v1142_v24, 2  ;;  %1734 = vmatpush.msrb.mxu3 %v1420_v10  ;;  %1694 = vmatpush.msrb.mxu1 %v1380_v34  ;;  %v1375_v8 = vld [vmem:[%s4780_s2 + $0x510] sm:$0xff]  ;;  %v1414_v55 = vld [vmem:[%s4780_s2 + $0x648] sm:$0xff]  ;;  %v1433_v13 = vld [vmem:[%s4780_s2 + $0x6e0] sm:$0xff] }
 0x186   :  { %v943_v16 = vpop.f32.mrf.mxu1  ;;  %1606 = vmatmul.f32.vlgmr.msra.gmra.mxu1 %v1586_v27  ;;  %1712 = vmatpush.msrb.mxu2 %v1398_v29  ;;  %v1374_v22 = vld [vmem:[%s4780_s2 + $0x508] sm:$0xff] }
 0x187   :  { %v1139_v43 = vrot.slane %v1138_v41, 1  ;;  %v1147_v14 = vrot.slane %v1034_v28, 4  ;;  %v1035_v20 = vmul.f32 %v943_v16, %v4163_v50  ;;  %1735 = vmatpush.msrb.mxu3 %v1419_v46  ;;  %v1144_v17 = vadd.f32 %v1143_v35, %v1142_v24  ;;  %1672 = vmatpush.msrb.mxu0 %v1358_v31  ;;  %v1397_v50 = vld [vmem:[%s4780_s2 + $0x5c0] sm:$0xff]  ;;  %v1412_v35 = vld [vmem:[%s4780_s2 + $0x638] sm:$0xff]  ;;  %v1391_v31 = vld [vmem:[%s4780_s2 + $0x590] sm:$0xff] }
 0x188   :  { %1695 = vmatpush.msrb.mxu1 %v1379_v53  ;;  %1713 = vmatpush.msrb.mxu2 %v1397_v50  ;;  %v1431_v53 = vld [vmem:[%s4780_s2 + $0x6d0] sm:$0xff] }
 0x189   :  { %v1140_v40 = vadd.f32 %v1139_v43, %v1138_v41  ;;  %v1148_v44 = vadd.f32 %v1147_v14, %v1034_v28  ;;  %v1153_v21 = vrot.slane %v1035_v20, 4  ;;  %1736 = vmatpush.msrb.mxu3 %v1418_v47  ;;  %1673 = vmatpush.msrb.mxu0 %v1357_v49  ;;  %v1145_v38 = vrot.slane %v1144_v17, 1  ;;  %v1373_v41 = vld [vmem:[%s4780_s2 + $0x500] sm:$0xff]  ;;  %v846_v43 = vpop.f32.mrf.mxu0  ;;  %v1390_v49 = vld [vmem:[%s4780_s2 + $0x588] sm:$0xff] }
 0x18a   :  { %1696 = vmatpush.msrb.mxu1 %v1378_v45  ;;  %1714 = vmatpush.msrb.mxu2 %v1396_v0  ;;  %v1413_v28 = vld [vmem:[%s4780_s2 + $0x640] sm:$0xff] }
 0x18b   :  { %v1154_v48 = vadd.f32 %v1153_v21, %v1035_v20  ;;  %v1587_v42 = vsel %vm1441_vm1, %v1140_v40, %v1128_v54  ;;  %v1149_v57 = vrot.slane %v1148_v44, 2  ;;  %1737 = vmatpush.msrb.mxu3 %v1417_v60  ;;  %1754 = vmatpush.msra.mxu0 %v1436_v15  ;;  %v1146_v24 = vadd.f32 %v1145_v38, %v1144_v17  ;;  %v1411_v54 = vld [vmem:[%s4780_s2 + $0x630] sm:$0xff]  ;;  %v790_v45 = vpop.f32.mrf.mxu3  ;;  %v1430_v17 = vld [vmem:[%s4780_s2 + $0x6c8] sm:$0xff]  ;;  %v1409_v15 = vld [vmem:[%s4780_s2 + $0x620] sm:$0xff] }
 0x18c   :  { %v1002_v26 = vpop.f32.mrf.mxu2  ;;  %1626 = vmatmul.f32.vlgmr.msra.gmra.mxu2 %v1587_v42  ;;  %1697 = vmatpush.msrb.mxu1 %v1377_v1  ;;  %v1429_v1 = vld [vmem:[%s4780_s2 + $0x6c0] sm:$0xff] }
 0x18d   :  { %v1155_v3 = vrot.slane %v1154_v48, 2  ;;  %v1036_v36 = vmul.f32 %v1002_v26, %v4203_v62  ;;  %1738 = vmatpush.msrb.mxu3 %v1416_v11  ;;  %v1150_v59 = vadd.f32 %v1149_v57, %v1148_v44  ;;  %1755 = vmatpush.msra.mxu0 %v1435_v19  ;;  %v1389_v26 = vld [vmem:[%s4780_s2 + $0x580] sm:$0xff]  ;;  %v1428_v11 = vld [vmem:[%s4780_s2 + $0x6b8] sm:$0xff] }
 0x18e   :  { %v946_v33 = vpop.f32.mrf.mxu1  ;;  %1698 = vmatpush.msrb.mxu1 %v1376_v23  ;;  %1715 = vmatpush.msrb.mxu2 %v1395_v6  ;;  %v1407_v6 = vld [vmem:[%s4780_s2 + $0x610] sm:$0xff] }
 0x18f   :  { %v1156_v56 = vadd.f32 %v1155_v3, %v1154_v48  ;;  %v1159_v4 = vrot.slane %v1036_v36, 4  ;;  %v1037_v5 = vmul.f32 %v946_v33, %v784_v12  ;;  %1739 = vmatpush.msrb.mxu3 %v1415_v39  ;;  %1756 = vmatpush.msra.mxu0 %v1434_v18  ;;  %v1151_v27 = vrot.slane %v1150_v59, 1  ;;  %v1392_v12 = vld [vmem:[%s4780_s2 + $0x598] sm:$0xff]  ;;  %v1410_v48 = vld [vmem:[%s4780_s2 + $0x628] sm:$0xff] }
 0x190   :  { %1699 = vmatpush.msrb.mxu1 %v1375_v8  ;;  %1716 = vmatpush.msrb.mxu2 %v1394_v61  ;;  %v1408_v33 = vld [vmem:[%s4780_s2 + $0x618] sm:$0xff] }
 0x191   :  { %v1157_v9 = vrot.slane %v1156_v56, 1  ;;  %v1160_v62 = vadd.f32 %v1159_v4, %v1036_v36  ;;  %v1165_v7 = vrot.slane %v1037_v5, 4  ;;  %1740 = vmatpush.msrb.mxu3 %v1414_v55  ;;  %1757 = vmatpush.msra.mxu0 %v1433_v13  ;;  %v1152_v40 = vadd.f32 %v1151_v27, %v1150_v59  ;;  %v849_v4 = vpop.f32.mrf.mxu0  ;;  %v1426_v59 = vld [vmem:[%s4780_s2 + $0x6a8] sm:$0xff] }
 0x192   :  { %1700 = vmatpush.msrb.mxu1 %v1374_v22  ;;  %1717 = vmatpush.msrb.mxu2 %v1393_v37 }
 0x193   :  { %v1158_v2 = vadd.f32 %v1157_v9, %v1156_v56  ;;  %v1161_v32 = vrot.slane %v1160_v62, 2  ;;  %v1166_v52 = vadd.f32 %v1165_v7, %v1037_v5  ;;  %1741 = vmatpush.msrb.mxu3 %v1413_v28  ;;  %1758 = vmatpush.msra.mxu0 %v1432_v63  ;;  %v1427_v5 = vld [vmem:[%s4780_s2 + $0x6b0] sm:$0xff]  ;;  %v1406_v9 = vld [vmem:[%s4780_s2 + $0x608] sm:$0xff]  ;;  %v793_v13 = vpop.f32.mrf.mxu3  ;;  %v1424_v28 = vld [vmem:[%s4780_s2 + $0x698] sm:$0xff] }
 0x194   :  { %v1005_v51 = vpop.f32.mrf.mxu2  ;;  %1701 = vmatpush.msrb.mxu1 %v1373_v41  ;;  %1718 = vmatpush.msrb.mxu2 %v1392_v12  ;;  %v1423_v12 = vld [vmem:[%s4780_s2 + $0x690] sm:$0xff] }
 0x195   :  { %v1162_v30 = vadd.f32 %v1161_v32, %v1160_v62  ;;  %v1038_v10 = vmul.f32 %v1005_v51, %v843_v25  ;;  %v1634_v16 = vsel %vm1441_vm1, %v1158_v2, %v1146_v24  ;;  %v1167_v20 = vrot.slane %v1166_v52, 2  ;;  %1742 = vmatpush.msrb.mxu3 %v1412_v35  ;;  %1759 = vmatpush.msra.mxu0 %v1431_v53  ;;  %v1425_v24 = vld [vmem:[%s4780_s2 + $0x6a0] sm:$0xff] }
 0x196   :  { %v949_v34 = vpop.f32.mrf.mxu1  ;;  %1654 = vmatmul.f32.vlgmr.msra.gmra.mxu3 %v1634_v16  ;;  %1719 = vmatpush.msrb.mxu2 %v1391_v31  ;;  %v1405_v2 = vld [vmem:[%s4780_s2 + $0x600] sm:$0xff] }
 0x197   :  { %v1163_v14 = vrot.slane %v1162_v30, 1  ;;  %v1171_v29 = vrot.slane %v1038_v10, 4  ;;  %v1039_v46 = vmul.f32 %v949_v34, %v787_v58  ;;  %v1168_v42 = vadd.f32 %v1167_v20, %v1166_v52  ;;  %1743 = vmatpush.msrb.mxu3 %v1411_v54  ;;  %1760 = vmatpush.msra.mxu0 %v1430_v17  ;;  %v1422_v20 = vld [vmem:[%s4780_s2 + $0x688] sm:$0xff]  ;;  %v1421_v54 = vld [vmem:[%s4780_s2 + $0x680] sm:$0xff] }
 0x198   :  { %1720 = vmatpush.msrb.mxu2 %v1390_v49 }
 0x199   :  { %v1164_v44 = vadd.f32 %v1163_v14, %v1162_v30  ;;  %v1172_v21 = vadd.f32 %v1171_v29, %v1038_v10  ;;  %v1177_v47 = vrot.slane %v1039_v46, 4  ;;  %1744 = vmatpush.msrb.mxu3 %v1410_v48  ;;  %v1169_v23 = vrot.slane %v1168_v42, 1  ;;  %1761 = vmatpush.msra.mxu0 %v1429_v1  ;;  %v852_v14 = vpop.f32.mrf.mxu0 }
 0x19a   :  { %1721 = vmatpush.msrb.mxu2 %v1389_v26 }
 0x19b   :  { %v1178_v50 = vadd.f32 %v1177_v47, %v1039_v46  ;;  %v1635_v60 = vsel %vm1441_vm1, %v1164_v44, %v1152_v40  ;;  %v1173_v57 = vrot.slane %v1172_v21, 2  ;;  %1745 = vmatpush.msrb.mxu3 %v1409_v15  ;;  %1762 = vmatpush.msra.mxu0 %v1428_v11  ;;  %v1170_v62 = vadd.f32 %v1169_v23, %v1168_v42  ;;  %v1952_v11 = vld [vmem:[%s4781_s3 + $0x18] sm:$0xff] }
 0x19c   :  { %v1008_v25 = vpop.f32.mrf.mxu2  ;;  %1674 = vmatmul.f32.vlgmr.msrb.gmra.mxu0 %v1635_v60  ;;  %1994 = vmatpush.msra.mxu1 %v1952_v11 }
 0x19d   :  { %v1179_v3 = vrot.slane %v1178_v50, 2  ;;  %v1040_v36 = vmul.f32 %v1008_v25, %v846_v43  ;;  %v1174_v39 = vadd.f32 %v1173_v57, %v1172_v21  ;;  %1746 = vmatpush.msrb.mxu3 %v1408_v33  ;;  %1763 = vmatpush.msra.mxu0 %v1427_v5  ;;  %v1951_v33 = vld [vmem:[%s4781_s3 + $0x10] sm:$0xff] }
 0x19e   :  { %v952_v0 = vpop.f32.mrf.mxu1  ;;  %1995 = vmatpush.msra.mxu1 %v1951_v33  ;;  %v1958_v33 = vld [vmem:[%s4781_s3 + $0x48] sm:$0xff] }
 0x19f   :  { %v1180_v19 = vadd.f32 %v1179_v3, %v1178_v50  ;;  %v1183_v38 = vrot.slane %v1040_v36, 4  ;;  %v1041_v56 = vmul.f32 %v952_v0, %v790_v45  ;;  %1747 = vmatpush.msrb.mxu3 %v1407_v6  ;;  %v1175_v32 = vrot.slane %v1174_v39, 1  ;;  %1764 = vmatpush.msra.mxu0 %v1426_v59 }
 0x1a1   :  { %v1181_v58 = vrot.slane %v1180_v19, 1  ;;  %v1184_v8 = vadd.f32 %v1183_v38, %v1040_v36  ;;  %v1189_v18 = vrot.slane %v1041_v56, 4  ;;  %1748 = vmatpush.msrb.mxu3 %v1406_v9  ;;  %1765 = vmatpush.msra.mxu0 %v1425_v24  ;;  %v1176_v63 = vadd.f32 %v1175_v32, %v1174_v39  ;;  %v1950_v39 = vld [vmem:[%s4781_s3 + $0x8] sm:$0xff] }
 0x1a2   :  { %1996 = vmatpush.msra.mxu1 %v1950_v39  ;;  %v2901_v9 = vld [vmem:[%s4777_s0 + $0x8] sm:$0xff] }
 0x1a3   :  { %v1182_v7 = vadd.f32 %v1181_v58, %v1180_v19  ;;  %v1185_v61 = vrot.slane %v1184_v8, 2  ;;  %v1190_v55 = vadd.f32 %v1189_v18, %v1041_v56  ;;  %1749 = vmatpush.msrb.mxu3 %v1405_v2  ;;  %1766 = vmatpush.msra.mxu0 %v1424_v28  ;;  %v1949_v58 = vld [vmem:[%s4781_s3] sm:$0xff]  ;;  %v1959_v28 = vld [vmem:[%s4781_s3 + $0x50] sm:$0xff] }
 0x1a4   :  { %v1011_v22 = vpop.f32.mrf.mxu2  ;;  %v2900_v18 = vld [vmem:[%s4777_s0] sm:$0xff]  ;;  %1997 = vmatpush.msra.mxu1 %v1949_v58 }
 0x1a5   :  { %v1186_v52 = vadd.f32 %v1185_v61, %v1184_v8  ;;  %v1042_v37 = vmul.f32 %v1011_v22, %v849_v4  ;;  %v1682_v51 = vsel %vm1441_vm1, %v1182_v7, %v1170_v62  ;;  %v1191_v30 = vrot.slane %v1190_v55, 2  ;;  %1767 = vmatpush.msra.mxu0 %v1423_v12  ;;  %v1953_v12 = vld [vmem:[%s4781_s3 + $0x20] sm:$0xff] }
 0x1a6   :  { %v955_v41 = vpop.f32.mrf.mxu1  ;;  %1702 = vmatmul.f32.vlgmr.msrb.gmra.mxu1 %v1682_v51  ;;  %v1955_v51 = vld [vmem:[%s4781_s3 + $0x30] sm:$0xff] }
 0x1a7   :  { %v1187_v27 = vrot.slane %v1186_v52, 1  ;;  %v1195_v10 = vrot.slane %v1042_v37, 4  ;;  %v1043_v16 = vmul.f32 %v955_v41, %v793_v13  ;;  %v1192_v29 = vadd.f32 %v1191_v30, %v1190_v55  ;;  %1768 = vmatpush.msra.mxu0 %v1422_v20  ;;  %v1960_v41 = vld [vmem:[%s4781_s3 + $0x58] sm:$0xff] }
 0x1a8   :  { %2044 = vmatpush.msrb.mxu1 %v1960_v41 }
 0x1a9   :  { %v1188_v34 = vadd.f32 %v1187_v27, %v1186_v52  ;;  %v1196_v43 = vadd.f32 %v1195_v10, %v1042_v37  ;;  %v1201_v35 = vrot.slane %v1043_v16, 4  ;;  %v1193_v47 = vrot.slane %v1192_v29, 1  ;;  %1769 = vmatpush.msra.mxu0 %v1421_v54  ;;  %v1956_v37 = vld [vmem:[%s4781_s3 + $0x38] sm:$0xff]  ;;  %v1954_v10 = vld [vmem:[%s4781_s3 + $0x28] sm:$0xff] }
 0x1aa   :  { %2019 = vmatpush.msra.mxu2 %v1956_v37  ;;  %2045 = vmatpush.msrb.mxu1 %v1959_v28  ;;  %v1968_v37 = vld [vmem:[%s4781_s3 + $0x98] sm:$0xff] }
 0x1ab   :  { %v1202_v46 = vadd.f32 %v1201_v35, %v1043_v16  ;;  %v1683_v31 = vsel %vm1441_vm1, %v1188_v34, %v1176_v63  ;;  %v1197_v40 = vrot.slane %v1196_v43, 2  ;;  %v1194_v50 = vadd.f32 %v1193_v47, %v1192_v29 }
 0x1ac   :  { %v1014_v53 = vpop.f32.mrf.mxu2  ;;  %1722 = vmatmul.f32.vlgmr.msrb.gmra.mxu2 %v1683_v31  ;;  %2046 = vmatpush.msrb.mxu1 %v1958_v33 }
 0x1ad   :  { %v1203_v44 = vrot.slane %v1202_v46, 2  ;;  %v1044_v21 = vmul.f32 %v1014_v53, %v852_v14  ;;  %v1198_v17 = vadd.f32 %v1197_v40, %v1196_v43  ;;  %2020 = vmatpush.msra.mxu2 %v1955_v51  ;;  %v2902_v40 = vld [vmem:[%s4777_s0 + $0x10] sm:$0xff] }
 0x1ae   :  { %v1967_v51 = vld [vmem:[%s4781_s3 + $0x90] sm:$0xff] }
 0x1af   :  { %v1204_v49 = vadd.f32 %v1203_v44, %v1202_v46  ;;  %v1207_v45 = vrot.slane %v1044_v21, 4  ;;  %v1199_v25 = vrot.slane %v1198_v17, 1  ;;  %2021 = vmatpush.msra.mxu2 %v1954_v10  ;;  %v1961_v10 = vld [vmem:[%s4781_s3 + $0x60] sm:$0xff] }
 0x1b1   :  { %v1205_v48 = vrot.slane %v1204_v49, 1  ;;  %v1208_v42 = vadd.f32 %v1207_v45, %v1044_v21  ;;  %v1200_v3 = vadd.f32 %v1199_v25, %v1198_v17  ;;  %2022 = vmatpush.msra.mxu2 %v1953_v12  ;;  %v2903_v21 = vld [vmem:[%s4777_s0 + $0x18] sm:$0xff] }
 0x1b3   :  { %v1206_v60 = vadd.f32 %v1205_v48, %v1204_v49  ;;  %v1209_v26 = vrot.slane %v1208_v42, 2 }
 0x1b5   :  { %v1210_v1 = vadd.f32 %v1209_v26, %v1208_v42  ;;  %v1730_v15 = vsel %vm1441_vm1, %v1206_v60, %v1194_v50 }
 0x1b6   :  { %1750 = vmatmul.f32.vlgmr.msrb.gmra.mxu3 %v1730_v15 }
 0x1b7   :  { %v1211_v57 = vrot.slane %v1210_v1, 1 }
 0x1b9   :  { %v1212_v36 = vadd.f32 %v1211_v57, %v1210_v1 }
 0x1bb   :  { %v1731_v0 = vsel %vm1441_vm1, %v1212_v36, %v1200_v3 }
 0x1bc   :  { %1770 = vmatmul.f32.vlgmr.msra.gmra.mxu0 %v1731_v0 }
 0x1d9   :  { %v1463_v23 = vpop.f32.mrf.mxu3  ;;  %v1483_v19 = vpop.f32.mrf.mxu0 }
 0x1da   :  { %v1484_v38 = vadd.f32 %v1483_v19, %v1463_v23  ;;  %v1957_v23 = vld [vmem:[%s4781_s3 + $0x40] sm:$0xff] }
 0x1db   :  { %2047 = vmatpush.msrb.mxu1 %v1957_v23  ;;  %v2908_v23 = vld [vmem:[%s4777_s0 + $0x40] sm:$0xff] }
 0x1dc   :  { %vm1774_vm2 = vcmp.ge.f32.partialorder %v1484_v38, 0.0  ;;  %v1781_v56 = vmul.f32 0.01, %v1484_v38 }
 0x1de   :  { %v1788_v4 = vsel %vm1774_vm2, %v1484_v38, %v1781_v56  ;;  %v2904_v38 = vld [vmem:[%s4777_s0 + $0x20] sm:$0xff]  ;;  %vm2661_vm2 = vcmask 260096  }
 0x1df   :  { %v1802_v5 = vrot.slane %v1788_v4, 1  ;;  %v1809_v6 = vperm.slane %v1788_v4, 0 }
 0x1e1   :  { %v1810_v8 = vperm.slane %v1802_v5, 0  ;;  %v1837_v59 = vadd.f32 %v2900_v18, %v1809_v6  ;;  %v2905_v6 = vld [vmem:[%s4777_s0 + $0x28] sm:$0xff] }
 0x1e3   :  { %v1838_v62 = vadd.f32 %v2901_v9, %v1810_v8  ;;  %v1851_v7 = vsel %vm76_vm0, %v1837_v59, -inf  ;;  %v1511_v63 = vpop.f32.mrf.mxu1 }
 0x1e4   :  { %v1852_v61 = vrot.slane %v1851_v7, 4 }
 0x1e5   :  { %v1858_v55 = vsel %vm76_vm0, %v1838_v62, -inf }
 0x1e6   :  { %v1853_v22 = vmax.f32 %v1851_v7, %v1852_v61  ;;  %v1859_v13 = vrot.slane %v1858_v55, 4 }
 0x1e8   :  { %v1854_v24 = vrot.slane %v1853_v22, 2  ;;  %v1860_v2 = vmax.f32 %v1858_v55, %v1859_v13 }
 0x1ea   :  { %v1861_v32 = vrot.slane %v1860_v2, 2  ;;  %v1855_v52 = vmax.f32 %v1853_v22, %v1854_v24 }
 0x1ec   :  { %v1856_v27 = vrot.slane %v1855_v52, 1  ;;  %v1862_v30 = vmax.f32 %v1860_v2, %v1861_v32  ;;  %v1964_v32 = vld [vmem:[%s4781_s3 + $0x78] sm:$0xff] }
 0x1ed   :  { %2069 = vmatpush.msrb.mxu2 %v1964_v32  ;;  %v1976_v32 = vld [vmem:[%s4781_s3 + $0xd8] sm:$0xff] }
 0x1ee   :  { %v1863_v16 = vrot.slane %v1862_v30, 1  ;;  %v1857_v35 = vmax.f32 %v1855_v52, %v1856_v27  ;;  %v1963_v52 = vld [vmem:[%s4781_s3 + $0x70] sm:$0xff]  ;;  %v1962_v27 = vld [vmem:[%s4781_s3 + $0x68] sm:$0xff]  ;;  %2144 = vmatpush.msra.mxu3 %v1976_v32 }
 0x1ef   :  { %v1531_v34 = vpop.f32.mrf.mxu2  ;;  %2070 = vmatpush.msrb.mxu2 %v1963_v52  ;;  %v1975_v52 = vld [vmem:[%s4781_s3 + $0xd0] sm:$0xff] }
 0x1f0   :  { %v1532_v43 = vadd.f32 %v1531_v34, %v1511_v63  ;;  %v1864_v14 = vmax.f32 %v1862_v30, %v1863_v16  ;;  %2145 = vmatpush.msra.mxu3 %v1975_v52 }
 0x1f1   :  { %2071 = vmatpush.msrb.mxu2 %v1962_v27 }
 0x1f2   :  { %vm1775_vm3 = vcmp.ge.f32.partialorder %v1532_v43, 0.0  ;;  %v1782_v20 = vmul.f32 0.01, %v1532_v43  ;;  %v1979_v29 = vsel %vm1441_vm1, %v1864_v14, %v1857_v35 }
 0x1f3   :  { %2784 = vmatmul.msk.f32.vlgmr.msra.gmra.mxu1 %vm76_vm0, %v1979_v29  ;;  %2072 = vmatpush.msrb.mxu2 %v1961_v10 }
 0x1f4   :  { %v1789_v46 = vsel %vm1775_vm3, %v1532_v43, %v1782_v20  ;;  %2094 = vmatpush.msra.mxu1 %v1968_v37  ;;  %vm2694_vm3 = vcmask 261121  }
 0x1f5   :  { %v1803_v31 = vrot.slane %v1789_v46, 1  ;;  %v1811_v53 = vperm.slane %v1789_v46, 0 }
 0x1f6   :  { %2095 = vmatpush.msra.mxu1 %v1967_v51 }
 0x1f7   :  { %v1812_v54 = vperm.slane %v1803_v31, 0  ;;  %v1839_v44 = vadd.f32 %v2902_v40, %v1811_v53  ;;  %v2906_v53 = vld [vmem:[%s4777_s0 + $0x30] sm:$0xff]  ;;  %v2907_v40 = vld [vmem:[%s4777_s0 + $0x38] sm:$0xff] }
 0x1f9   :  { %v1840_v47 = vadd.f32 %v2903_v21, %v1812_v54  ;;  %v1865_v49 = vsel %vm76_vm0, %v1839_v44, -inf  ;;  %v1559_v45 = vpop.f32.mrf.mxu3  ;;  %v1579_v17 = vpop.f32.mrf.mxu0 }
 0x1fa   :  { %v1866_v48 = vrot.slane %v1865_v49, 4  ;;  %v1580_v42 = vadd.f32 %v1579_v17, %v1559_v45 }
 0x1fb   :  { %v1872_v50 = vsel %vm76_vm0, %v1840_v47, -inf }
 0x1fc   :  { %v1867_v60 = vmax.f32 %v1865_v49, %v1866_v48  ;;  %v1873_v26 = vrot.slane %v1872_v50, 4  ;;  %vm1776_vm4 = vcmp.ge.f32.partialorder %v1580_v42, 0.0  ;;  %v1783_v25 = vmul.f32 0.01, %v1580_v42 }
 0x1fe   :  { %v1868_v1 = vrot.slane %v1867_v60, 2  ;;  %v1874_v15 = vmax.f32 %v1872_v50, %v1873_v26  ;;  %v1790_v57 = vsel %vm1776_vm4, %v1580_v42, %v1783_v25 }
 0x1ff   :  { %v1804_v3 = vrot.slane %v1790_v57, 1  ;;  %v1813_v36 = vperm.slane %v1790_v57, 0 }
 0x200   :  { %v1875_v0 = vrot.slane %v1874_v15, 2  ;;  %v1869_v11 = vmax.f32 %v1867_v60, %v1868_v1 }
 0x201   :  { %v1814_v19 = vperm.slane %v1804_v3, 0  ;;  %v1841_v56 = vadd.f32 %v2904_v38, %v1813_v36 }
 0x202   :  { %v1870_v4 = vrot.slane %v1869_v11, 1  ;;  %v1876_v5 = vmax.f32 %v1874_v15, %v1875_v0  ;;  %v1966_v0 = vld [vmem:[%s4781_s3 + $0x88] sm:$0xff] }
 0x203   :  { %v1842_v39 = vadd.f32 %v2905_v6, %v1814_v19  ;;  %v1879_v58 = vsel %vm76_vm0, %v1841_v56, -inf  ;;  %v1607_v16 = vpop.f32.mrf.mxu1  ;;  %2096 = vmatpush.msra.mxu1 %v1966_v0 }
 0x204   :  { %v1880_v8 = vrot.slane %v1879_v58, 4  ;;  %v1877_v18 = vrot.slane %v1876_v5, 1  ;;  %v1871_v7 = vmax.f32 %v1869_v11, %v1870_v4  ;;  %v1965_v11 = vld [vmem:[%s4781_s3 + $0x80] sm:$0xff]  ;;  %v2909_v4 = vld [vmem:[%s4777_s0 + $0x48] sm:$0xff] }
 0x205   :  { %v1886_v59 = vsel %vm76_vm0, %v1842_v39, -inf  ;;  %2097 = vmatpush.msra.mxu1 %v1965_v11  ;;  %v2912_v11 = vld [vmem:[%s4777_s0 + $0x60] sm:$0xff] }
 0x206   :  { %v1881_v9 = vmax.f32 %v1879_v58, %v1880_v8  ;;  %v1887_v62 = vrot.slane %v1886_v59, 4  ;;  %v1878_v61 = vmax.f32 %v1876_v5, %v1877_v18 }
 0x208   :  { %v1882_v55 = vrot.slane %v1881_v9, 2  ;;  %v1888_v22 = vmax.f32 %v1886_v59, %v1887_v62  ;;  %v2004_v13 = vsel %vm1441_vm1, %v1878_v61, %v1871_v7 }
 0x209   :  { %2785 = vmatmul.msk.f32.vlgmr.msra.gmra.mxu2 %vm76_vm0, %v2004_v13 }
 0x20a   :  { %v1889_v24 = vrot.slane %v1888_v22, 2  ;;  %v1883_v2 = vmax.f32 %v1881_v9, %v1882_v55 }
 0x20c   :  { %v1884_v41 = vrot.slane %v1883_v2, 1  ;;  %v1890_v28 = vmax.f32 %v1888_v22, %v1889_v24  ;;  %v1972_v24 = vld [vmem:[%s4781_s3 + $0xb8] sm:$0xff] }
 0x20d   :  { %2119 = vmatpush.msra.mxu2 %v1972_v24 }
 0x20e   :  { %v1891_v30 = vrot.slane %v1890_v28, 1  ;;  %v1885_v34 = vmax.f32 %v1883_v2, %v1884_v41  ;;  %v1971_v2 = vld [vmem:[%s4781_s3 + $0xb0] sm:$0xff]  ;;  %v1970_v41 = vld [vmem:[%s4781_s3 + $0xa8] sm:$0xff] }
 0x20f   :  { %v1627_v12 = vpop.f32.mrf.mxu2  ;;  %2120 = vmatpush.msra.mxu2 %v1971_v2 }
 0x210   :  { %v1628_v63 = vadd.f32 %v1627_v12, %v1607_v16  ;;  %v1892_v43 = vmax.f32 %v1890_v28, %v1891_v30  ;;  %v1974_v28 = vld [vmem:[%s4781_s3 + $0xc8] sm:$0xff]  ;;  %v1969_v30 = vld [vmem:[%s4781_s3 + $0xa0] sm:$0xff] }
 0x211   :  { %2121 = vmatpush.msra.mxu2 %v1970_v41  ;;  %v1973_v12 = vld [vmem:[%s4781_s3 + $0xc0] sm:$0xff]  ;;  %2146 = vmatpush.msra.mxu3 %v1974_v28 }
 0x212   :  { %vm1777_vm5 = vcmp.ge.f32.partialorder %v1628_v63, 0.0  ;;  %v1784_v35 = vmul.f32 0.01, %v1628_v63  ;;  %v2029_v14 = vsel %vm1441_vm1, %v1892_v43, %v1885_v34 }
 0x213   :  { %2786 = vmatmul.msk.f32.vlgmr.msrb.gmra.mxu1 %vm76_vm0, %v2029_v14  ;;  %2122 = vmatpush.msra.mxu2 %v1969_v30 }
 0x214   :  { %v1791_v20 = vsel %vm1777_vm5, %v1628_v63, %v1784_v35  ;;  %2147 = vmatpush.msra.mxu3 %v1973_v12  ;;  %v2805_v12 = vld [vmem:[%s4783_s5 + $0x1] ss:$0 sm:$0xff] }
 0x215   :  { %v1805_v29 = vrot.slane %v1791_v20, 1  ;;  %v1815_v46 = vperm.slane %v1791_v20, 0 }
 0x217   :  { %v1816_v31 = vperm.slane %v1805_v29, 0  ;;  %v1843_v54 = vadd.f32 %v2906_v53, %v1815_v46  ;;  %v2910_v53 = vld [vmem:[%s4777_s0 + $0x50] sm:$0xff] }
 0x219   :  { %v1844_v44 = vadd.f32 %v2907_v40, %v1816_v31  ;;  %v1893_v21 = vsel %vm76_vm0, %v1843_v54, -inf  ;;  %v1655_v47 = vpop.f32.mrf.mxu3  ;;  %v1675_v49 = vpop.f32.mrf.mxu0  ;;  %v2911_v40 = vld [vmem:[%s4777_s0 + $0x58] sm:$0xff] }
 0x21a   :  { %v1894_v45 = vrot.slane %v1893_v21, 4  ;;  %v1676_v17 = vadd.f32 %v1675_v49, %v1655_v47 }
 0x21b   :  { %v1900_v48 = vsel %vm76_vm0, %v1844_v44, -inf }
 0x21c   :  { %v1895_v42 = vmax.f32 %v1893_v21, %v1894_v45  ;;  %v1901_v50 = vrot.slane %v1900_v48, 4  ;;  %vm1778_vm6 = vcmp.ge.f32.partialorder %v1676_v17, 0.0  ;;  %v1785_v60 = vmul.f32 0.01, %v1676_v17 }
 0x21e   :  { %v1896_v26 = vrot.slane %v1895_v42, 2  ;;  %v1902_v25 = vmax.f32 %v1900_v48, %v1901_v50  ;;  %v1792_v1 = vsel %vm1778_vm6, %v1676_v17, %v1785_v60 }
 0x21f   :  { %v1806_v15 = vrot.slane %v1792_v1, 1  ;;  %v1817_v57 = vperm.slane %v1792_v1, 0 }
 0x220   :  { %v1903_v3 = vrot.slane %v1902_v25, 2  ;;  %v1897_v36 = vmax.f32 %v1895_v42, %v1896_v26 }
 0x221   :  { %v1818_v33 = vperm.slane %v1806_v15, 0  ;;  %v1845_v19 = vadd.f32 %v2908_v23, %v1817_v57 }
 0x222   :  { %v1898_v38 = vrot.slane %v1897_v36, 1  ;;  %v1904_v56 = vmax.f32 %v1902_v25, %v1903_v3 }
 0x223   :  { %v1846_v5 = vadd.f32 %v2909_v4, %v1818_v33  ;;  %v1907_v6 = vsel %vm76_vm0, %v1845_v19, -inf  ;;  %v1703_v10 = vpop.f32.mrf.mxu1 }
 0x224   :  { %v1908_v39 = vrot.slane %v1907_v6, 4  ;;  %v1905_v58 = vrot.slane %v1904_v56, 1  ;;  %v1899_v9 = vmax.f32 %v1897_v36, %v1898_v38  ;;  %v2913_v38 = vld [vmem:[%s4777_s0 + $0x68] sm:$0xff] }
 0x225   :  { %v1914_v8 = vsel %vm76_vm0, %v1846_v5, -inf }
 0x226   :  { %v1909_v18 = vmax.f32 %v1907_v6, %v1908_v39  ;;  %v1915_v59 = vrot.slane %v1914_v8, 4  ;;  %v1906_v62 = vmax.f32 %v1904_v56, %v1905_v58 }
 0x228   :  { %v1910_v7 = vrot.slane %v1909_v18, 2  ;;  %v1916_v61 = vmax.f32 %v1914_v8, %v1915_v59  ;;  %v2054_v55 = vsel %vm1441_vm1, %v1906_v62, %v1899_v9 }
 0x229   :  { %2787 = vmatmul.msk.f32.vlgmr.msrb.gmra.mxu2 %vm76_vm0, %v2054_v55 }
 0x22a   :  { %v1917_v22 = vrot.slane %v1916_v61, 2  ;;  %v1911_v13 = vmax.f32 %v1909_v18, %v1910_v7 }
 0x22c   :  { %v1912_v37 = vrot.slane %v1911_v13, 1  ;;  %v1918_v51 = vmax.f32 %v1916_v61, %v1917_v22 }
 0x22e   :  { %v1919_v27 = vrot.slane %v1918_v51, 1  ;;  %v1913_v34 = vmax.f32 %v1911_v13, %v1912_v37  ;;  %v2800_v37 = vld [vmem:[%s4782_s4] ss:$0 sm:$0xff] }
 0x22f   :  { %v1723_v16 = vpop.f32.mrf.mxu2 }
 0x230   :  { %v1724_v63 = vadd.f32 %v1723_v16, %v1703_v10  ;;  %v1920_v43 = vmax.f32 %v1918_v51, %v1919_v27  ;;  %v2801_v51 = vld [vmem:[%s4783_s5] ss:$0 sm:$0xff]  ;;  %v2802_v16 = vld [vmem:[%s4782_s4 + $0x1] ss:$0 sm:$0xff] }
 0x232   :  { %vm1779_vm7 = vcmp.ge.f32.partialorder %v1724_v63, 0.0  ;;  %v1786_v35 = vmul.f32 0.01, %v1724_v63  ;;  %v2079_v14 = vsel %vm1441_vm1, %v1920_v43, %v1913_v34 }
 0x233   :  { %2788 = vmatmul.msk.f32.vlgmr.msra.gmra.mxu1 %vm76_vm0, %v2079_v14 }
 0x234   :  { %v1793_v20 = vsel %vm1779_vm7, %v1724_v63, %v1786_v35  ;;  %v2803_v35 = vld [vmem:[%s4782_s4 + $0x2] ss:$0 sm:$0xff] }
 0x235   :  { %v1807_v29 = vrot.slane %v1793_v20, 1  ;;  %v1819_v46 = vperm.slane %v1793_v20, 0 }
 0x237   :  { %v1820_v31 = vperm.slane %v1807_v29, 0  ;;  %v1847_v54 = vadd.f32 %v2910_v53, %v1819_v46  ;;  %v2804_v29 = vld [vmem:[%s4783_s5 + $0x2] ss:$0 sm:$0xff] }
 0x239   :  { %v1848_v44 = vadd.f32 %v2911_v40, %v1820_v31  ;;  %v1921_v21 = vsel %vm76_vm0, %v1847_v54, -inf  ;;  %v1751_v47 = vpop.f32.mrf.mxu3  ;;  %v1771_v49 = vpop.f32.mrf.mxu0 }
 0x23a   :  { %v1922_v45 = vrot.slane %v1921_v21, 4  ;;  %v1772_v17 = vadd.f32 %v1771_v49, %v1751_v47  ;;  %v2808_v49 = vld [vmem:[%s4782_s4 + $0x4] ss:$0 sm:$0xff] }
 0x23b   :  { %v1928_v48 = vsel %vm76_vm0, %v1848_v44, -inf }
 0x23c   :  { %v1923_v42 = vmax.f32 %v1921_v21, %v1922_v45  ;;  %v1929_v50 = vrot.slane %v1928_v48, 4  ;;  %vm1780_vm8 = vcmp.ge.f32.partialorder %v1772_v17, 0.0  ;;  %v1787_v60 = vmul.f32 0.01, %v1772_v17  ;;  %v2809_v45 = vld [vmem:[%s4783_s5 + $0x4] ss:$0 sm:$0xff] }
 0x23e   :  { %v1924_v26 = vrot.slane %v1923_v42, 2  ;;  %v1930_v25 = vmax.f32 %v1928_v48, %v1929_v50  ;;  %v1794_v1 = vsel %vm1780_vm8, %v1772_v17, %v1787_v60 }
 0x23f   :  { %v1808_v15 = vrot.slane %v1794_v1, 1  ;;  %v1821_v57 = vperm.slane %v1794_v1, 0  ;;  %v2811_v1 = vld [vmem:[%s4783_s5 + $0x5] ss:$0 sm:$0xff] }
 0x240   :  { %v1931_v3 = vrot.slane %v1930_v25, 2  ;;  %v1925_v36 = vmax.f32 %v1923_v42, %v1924_v26 }
 0x241   :  { %v1822_v0 = vperm.slane %v1808_v15, 0  ;;  %v1849_v33 = vadd.f32 %v2912_v11, %v1821_v57 }
 0x242   :  { %v1926_v23 = vrot.slane %v1925_v36, 1  ;;  %v1932_v19 = vmax.f32 %v1930_v25, %v1931_v3  ;;  %v2810_v25 = vld [vmem:[%s4782_s4 + $0x5] ss:$0 sm:$0xff] }
 0x243   :  { %v1850_v56 = vadd.f32 %v2913_v38, %v1822_v0  ;;  %v1935_v4 = vsel %vm76_vm0, %v1849_v33, -inf }
 0x244   :  { %v1936_v5 = vrot.slane %v1935_v4, 4  ;;  %v1933_v6 = vrot.slane %v1932_v19, 1  ;;  %v1927_v18 = vmax.f32 %v1925_v36, %v1926_v23 }
 0x245   :  { %v1942_v39 = vsel %vm76_vm0, %v1850_v56, -inf }
 0x246   :  { %v1937_v58 = vmax.f32 %v1935_v4, %v1936_v5  ;;  %v1943_v8 = vrot.slane %v1942_v39, 4  ;;  %v1934_v59 = vmax.f32 %v1932_v19, %v1933_v6  ;;  %v2812_v19 = vld [vmem:[%s4782_s4 + $0x6] ss:$0 sm:$0xff]  ;;  %v2806_v5 = vld [vmem:[%s4782_s4 + $0x3] ss:$0 sm:$0xff] }
 0x248   :  { %v1938_v9 = vrot.slane %v1937_v58, 2  ;;  %v1944_v62 = vmax.f32 %v1942_v39, %v1943_v8  ;;  %v2104_v7 = vsel %vm1441_vm1, %v1934_v59, %v1927_v18  ;;  %v2813_v39 = vld [vmem:[%s4783_s5 + $0x6] ss:$0 sm:$0xff] }
 0x249   :  { %2789 = vmatmul.msk.f32.vlgmr.msra.gmra.mxu2 %vm76_vm0, %v2104_v7 }
 0x24a   :  { %v1945_v61 = vrot.slane %v1944_v62, 2  ;;  %v1939_v55 = vmax.f32 %v1937_v58, %v1938_v9 }
 0x24c   :  { %v1940_v22 = vrot.slane %v1939_v55, 1  ;;  %v1946_v13 = vmax.f32 %v1944_v62, %v1945_v61 }
 0x24e   :  { %v1947_v24 = vrot.slane %v1946_v13, 1  ;;  %v1941_v2 = vmax.f32 %v1939_v55, %v1940_v22  ;;  %v2807_v22 = vld [vmem:[%s4783_s5 + $0x3] ss:$0 sm:$0xff] }
 0x250   :  { %v1948_v32 = vmax.f32 %v1946_v13, %v1947_v24 }
 0x252   :  { %v2129_v52 = vsel %vm1441_vm1, %v1948_v32, %v1941_v2 }
 0x253   :  { %2790 = vmatmul.msk.f32.vlgmr.msra.gmra.mxu3 %vm76_vm0, %v2129_v52 }
 0x270   :  { %v1999_v41 = vpop.f32.mrf.mxu1 }
 0x271   :  { %v2180_v28 = vmul.f32 %v2800_v37, %v1999_v41 }
 0x273   :  { %v4553_v27 = vadd.f32 %v2801_v51, %v2180_v28 }
 0x275   :  { %v2222_v30 = vmul.f32 %v4553_v27, %v4553_v27 }
 0x277   :  { %v2230_v10 = vsel %vm2229_vm9, %v2222_v30, 0.0 }
 0x278   :  { %2231 = vadd.xlane.f32.xlu1 %v2230_v10 }
 0x28c   :  { %v2024_v63 = vpop.f32.mrf.mxu2 }
 0x28d   :  { %v2181_v34 = vmul.f32 %v2802_v16, %v2024_v63  ;;  %v2643_v43 = vrot.slane %v2024_v63, 7 }
 0x28f   :  { %v2644_v14 = vsel %vm1441_vm1, %v2643_v43, %v1999_v41  ;;  %v2685_v20 = vsel %vm2646_vm10, %v2643_v43, %v1999_v41  ;;  %v4572_v46 = vadd.f32 %v2805_v12, %v2181_v34 }
 0x290   :  { %v2049_v31 = vpop.f32.mrf.mxu1 }
 0x291   :  { %v2182_v53 = vmul.f32 %v2803_v35, %v2049_v31  ;;  %v2223_v54 = vmul.f32 %v4572_v46, %v4572_v46  ;;  %v2645_v36 = vrot.slane %v2049_v31, 6 }
 0x293   :  { %v4576_v40 = vadd.f32 %v2804_v29, %v2182_v53  ;;  %v2233_v44 = vsel %vm2229_vm9, %v2223_v54, 0.0  ;;  %v2647_v38 = vsel %vm2646_vm10, %v2645_v36, %v2644_v14  ;;  %v2686_v4 = vsel %vm2649_vm11, %v2645_v36, %v2685_v20  ;;  %v2450_v20 = vld [vmem:[%s4785_s6 + $0x18] sm:$0xff]  ;;  %v2449_v54 = vld [vmem:[%s4785_s6 + $0x10] sm:$0xff] }
 0x294   :  { %2234 = vadd.xlane.f32.xlu0 %v2233_v44  ;;  %2490 = vmatpush.msrb.mxu1 %v2450_v20  ;;  %v2448_v44 = vld [vmem:[%s4785_s6 + $0x8] sm:$0xff] }
 0x295   :  { %v2224_v21 = vmul.f32 %v4576_v40, %v4576_v40 }
 0x296   :  { %2491 = vmatpush.msrb.mxu1 %v2449_v54 }
 0x297   :  { %v2236_v47 = vsel %vm2229_vm9, %v2224_v21, 0.0  ;;  %v2454_v21 = vld [vmem:[%s4785_s6 + $0x38] sm:$0xff] }
 0x298   :  { %2513 = vmatpush.msrb.mxu2 %v2454_v21  ;;  %2492 = vmatpush.msrb.mxu1 %v2448_v44 }
 0x29c   :  { %2237 = vadd.xlane.f32.xlu0 %v2236_v47 }
 0x2ac   :  { %v2074_v26 = vpop.f32.mrf.mxu2 }
 0x2ad   :  { %v2648_v0 = vrot.slane %v2074_v26, 5  ;;  %v2183_v55 = vmul.f32 %v2806_v5, %v2074_v26 }
 0x2af   :  { %v2650_v6 = vsel %vm2649_vm11, %v2648_v0, %v2647_v38  ;;  %v2687_v58 = vsel %vm2652_vm12, %v2648_v0, %v2686_v4  ;;  %v4636_v52 = vadd.f32 %v2807_v22, %v2183_v55 }
 0x2b0   :  { %v2099_v17 = vpop.f32.mrf.mxu1 }
 0x2b1   :  { %v2184_v48 = vmul.f32 %v2808_v49, %v2099_v17  ;;  %v2651_v33 = vrot.slane %v2099_v17, 4  ;;  %v2225_v51 = vmul.f32 %v4636_v52, %v4636_v52  ;;  %v2447_v49 = vld [vmem:[%s4785_s6] sm:$0xff] }
 0x2b2   :  { %2493 = vmatpush.msrb.mxu1 %v2447_v49 }
 0x2b3   :  { %v4588_v42 = vadd.f32 %v2809_v45, %v2184_v48  ;;  %v2653_v8 = vsel %vm2652_vm12, %v2651_v33, %v2650_v6  ;;  %v2688_v59 = vsel %vm2655_vm13, %v2651_v33, %v2687_v58  ;;  %v2239_v41 = vsel %vm2229_vm9, %v2225_v51, 0.0 }
 0x2b5   :  { %v2226_v50 = vmul.f32 %v4588_v42, %v4588_v42 }
 0x2b7   :  { %v2242_v60 = vsel %vm2229_vm9, %v2226_v50, 0.0 }
 0x2b8   :  { %2243 = vadd.xlane.f32.xlu0 %v2242_v60 }
 0x2cc   :  { %v2124_v15 = vpop.f32.mrf.mxu2 }
 0x2cd   :  { %v2185_v57 = vmul.f32 %v2810_v25, %v2124_v15  ;;  %v2654_v56 = vrot.slane %v2124_v15, 3 }
 0x2cf   :  { %v4599_v3 = vadd.f32 %v2811_v1, %v2185_v57  ;;  %v2656_v7 = vsel %vm2655_vm13, %v2654_v56, %v2653_v8  ;;  %v2689_v61 = vsel %vm2658_vm14, %v2654_v56, %v2688_v59 }
 0x2d1   :  { %v2227_v11 = vmul.f32 %v4599_v3, %v4599_v3 }
 0x2d3   :  { %v2245_v23 = vsel %vm2229_vm9, %v2227_v11, 0.0 }
 0x2d4   :  { %2246 = vadd.xlane.f32.xlu1 %v2245_v23 }
 0x2d6   :  { %v2149_v18 = vpop.f32.mrf.mxu3 }
 0x2d7   :  { %v2186_v9 = vmul.f32 %v2812_v19, %v2149_v18  ;;  %v2657_v62 = vrot.slane %v2149_v18, 2 }
 0x2d9   :  { %v2659_v13 = vsel %vm2658_vm14, %v2657_v62, %v2656_v7  ;;  %v2691_v24 = vsel %vm2690_vm15, %v2657_v62, %v2689_v61  ;;  %v4626_v2 = vadd.f32 %v2813_v39, %v2186_v9 }
 0x2da   :  { %2662 = vst.msk [vmem:[%s4784_s9] sm:$0x7f] %vm2661_vm2, %v2659_v13 }
 0x2db   :  { %2798 = vst.msk [vmem:[%s4784_s9 + $0x7] sm:$0xfe] %vm2694_vm3, %v2691_v24  ;;  %v2228_v32 = vmul.f32 %v4626_v2, %v4626_v2 }
 0x2dd   :  { %v2248_v37 = vsel %vm2229_vm9, %v2228_v32, 0.0 }
 0x2de   :  { %2249 = vadd.xlane.f32.xlu2 %v2248_v37  ;;  %v2453_v37 = vld [vmem:[%s4785_s6 + $0x30] sm:$0xff] }
 0x2df   :  { %2514 = vmatpush.msrb.mxu2 %v2453_v37 }
 0x2e6   :  { %2240 = vadd.xlane.f32.xlu2 %v2239_v41 }
 0x2eb   :  { %v2232_v28 = vpop.xlane.xlu1 %2231 }
 0x2ec   :  { %2870 = vrsqrt.f32 %v2232_v28  ;;  %vm2258_vm4 = vcmp.eq.f32.partialorder %v2232_v28, inf  ;;  %v2261_v35 = vand.u32 2147483648, %v2232_v28  ;;  %vm2260_vm5 = vcmp.eq.f32.partialorder %v2232_v28, 0.0 }
 0x2f2   :  { %v2871_v30 = vpop.eup %2870 }
 0x2f3   :  { %v2252_v10 = vmul.f32 %v2871_v30, %v2232_v28 }
 0x2f5   :  { %v2253_v16 = vmul.f32 %v2871_v30, %v2252_v10  ;;  %v2452_v10 = vld [vmem:[%s4785_s6 + $0x28] sm:$0xff] }
 0x2f6   :  { %2515 = vmatpush.msrb.mxu2 %v2452_v10 }
 0x2f7   :  { %v2254_v12 = vmul.f32 0.5, %v2253_v16  ;;  %v2451_v16 = vld [vmem:[%s4785_s6 + $0x20] sm:$0xff] }
 0x2f8   :  { %2516 = vmatpush.msrb.mxu2 %v2451_v16 }
 0x2f9   :  { %v2255_v63 = vsub.f32 1.5, %v2254_v12  ;;  %v2458_v12 = vld [vmem:[%s4785_s6 + $0x58] sm:$0xff] }
 0x2fa   :  { %2536 = vmatpush.msrb.mxu3 %v2458_v12  ;;  %v2467_v12 = vld [vmem:[%s4785_s6 + $0xa0] sm:$0xff] }
 0x2fb   :  { %v2256_v34 = vmul.f32 %v2871_v30, %v2255_v63 }
 0x2fd   :  { %v2257_v43 = vmul.f32 %v2256_v34, %v2232_v28 }
 0x2ff   :  { %v2259_v14 = vsel %vm2258_vm4, %v2232_v28, %v2257_v43  ;;  %v2457_v43 = vld [vmem:[%s4785_s6 + $0x50] sm:$0xff] }
 0x300   :  { %v2262_v29 = vsel %vm2260_vm5, %v2261_v35, %v2259_v14  ;;  %v2456_v14 = vld [vmem:[%s4785_s6 + $0x48] sm:$0xff]  ;;  %2537 = vmatpush.msrb.mxu3 %v2457_v43 }
 0x301   :  { %v2335_v31 = vmax.f32 %v2262_v29, 1e-12 }
 0x302   :  { %2538 = vmatpush.msrb.mxu3 %v2456_v14 }
 0x303   :  { %2872 = vrcp.f32 %v2335_v31  ;;  %v2353_v60 = vand.u32 2147483648, %v2335_v31  ;;  %v2351_v1 = vand.u32 2147483647, %v2335_v31  ;;  %vm2347_vm7 = vweird.f32 %v2335_v31 }
 0x305   :  { %v2354_v36 = vor.u32 1.1754944e-38, %v2353_v60  ;;  %vm2352_vm9 = vcmp.eq.f32.partialorder %v2351_v1, 8.507059e+37 }
 0x307   :  { %v2235_v53 = vpop.xlane.xlu0 %2234 }
 0x308   :  { %2874 = vrsqrt.f32 %v2235_v53  ;;  %vm2270_vm2 = vcmp.eq.f32.partialorder %v2235_v53, inf  ;;  %v2273_v39 = vand.u32 2147483648, %v2235_v53  ;;  %vm2272_vm3 = vcmp.eq.f32.partialorder %v2235_v53, 0.0 }
 0x309   :  { %v2873_v47 = vpop.eup %2872 }
 0x30a   :  { %v2343_v45 = vmul.f32 %v2873_v47, %v2335_v31  ;;  %vm2348_vm6 = vweird.f32 %v2873_v47 }
 0x30b   :  { %vm2349_vm8 = vmor %vm2347_vm7, %vm2348_vm6 }
 0x30c   :  { %v2344_v17 = vsub.f32 1.0, %v2343_v45 }
 0x30e   :  { %v2875_v48 = vpop.eup %2874  ;;  %v2345_v50 = vmul.f32 %v2873_v47, %v2344_v17 }
 0x30f   :  { %v2264_v26 = vmul.f32 %v2875_v48, %v2235_v53  ;;  %v2238_v25 = vpop.xlane.xlu0 %2237 }
 0x310   :  { %2876 = vrsqrt.f32 %v2238_v25  ;;  %v2346_v57 = vadd.f32 %v2873_v47, %v2345_v50  ;;  %vm2282_vm4 = vcmp.eq.f32.partialorder %v2238_v25, inf  ;;  %vm2284_vm5 = vcmp.eq.f32.partialorder %v2238_v25, 0.0 }
 0x311   :  { %v2265_v15 = vmul.f32 %v2875_v48, %v2264_v26 }
 0x312   :  { %v2350_v11 = vsel %vm2349_vm8, %v2873_v47, %v2346_v57 }
 0x313   :  { %v2266_v0 = vmul.f32 0.5, %v2265_v15  ;;  %v2355_v33 = vsel %vm2352_vm9, %v2354_v36, %v2350_v11 }
 0x314   :  { %v2356_v19 = vmul.f32 %v2355_v33, %v4553_v27  ;;  %v2285_v27 = vand.u32 2147483648, %v2238_v25 }
 0x315   :  { %v2267_v23 = vsub.f32 1.5, %v2266_v0 }
 0x316   :  { %v2877_v38 = vpop.eup %2876  ;;  %2791 = vmatmul.msk.f32.vlgmr.msrb.gmra.mxu1 %vm76_vm0, %v2356_v19 }
 0x317   :  { %v2268_v56 = vmul.f32 %v2875_v48, %v2267_v23  ;;  %v2276_v4 = vmul.f32 %v2877_v38, %v2238_v25 }
 0x319   :  { %v2269_v5 = vmul.f32 %v2268_v56, %v2235_v53  ;;  %v2277_v6 = vmul.f32 %v2877_v38, %v2276_v4 }
 0x31b   :  { %v2271_v58 = vsel %vm2270_vm2, %v2235_v53, %v2269_v5  ;;  %v2278_v8 = vmul.f32 0.5, %v2277_v6  ;;  %v2455_v53 = vld [vmem:[%s4785_s6 + $0x40] sm:$0xff]  ;;  %v2464_v5 = vld [vmem:[%s4785_s6 + $0x88] sm:$0xff] }
 0x31c   :  { %v2274_v18 = vsel %vm2272_vm3, %v2273_v39, %v2271_v58  ;;  %2539 = vmatpush.msrb.mxu3 %v2455_v53  ;;  %v2463_v39 = vld [vmem:[%s4785_s6 + $0x80] sm:$0xff] }
 0x31d   :  { %v2336_v59 = vmax.f32 %v2274_v18, 1e-12  ;;  %v2279_v9 = vsub.f32 1.5, %v2278_v8 }
 0x31f   :  { %2878 = vrcp.f32 %v2336_v59  ;;  %v2280_v62 = vmul.f32 %v2877_v38, %v2279_v9  ;;  %v2368_v41 = vand.u32 2147483648, %v2336_v59  ;;  %v2366_v30 = vand.u32 2147483647, %v2336_v59  ;;  %v2465_v38 = vld [vmem:[%s4785_s6 + $0x90] sm:$0xff] }
 0x320   :  { %vm2362_vm7 = vweird.f32 %v2336_v59 }
 0x321   :  { %v2281_v7 = vmul.f32 %v2280_v62, %v2238_v25  ;;  %v2369_v35 = vor.u32 1.1754944e-38, %v2368_v41  ;;  %vm2367_vm9 = vcmp.eq.f32.partialorder %v2366_v30, 8.507059e+37  ;;  %v2462_v41 = vld [vmem:[%s4785_s6 + $0x78] sm:$0xff]  ;;  %v2472_v30 = vld [vmem:[%s4785_s6 + $0xc8] sm:$0xff] }
 0x322   :  { %2559 = vmatpush.msrb.mxu0 %v2462_v41 }
 0x323   :  { %v2283_v61 = vsel %vm2282_vm4, %v2238_v25, %v2281_v7 }
 0x324   :  { %v2286_v55 = vsel %vm2284_vm5, %v2285_v27, %v2283_v61  ;;  %v2470_v61 = vld [vmem:[%s4785_s6 + $0xb8] sm:$0xff] }
 0x325   :  { %v2879_v22 = vpop.eup %2878  ;;  %v2337_v13 = vmax.f32 %v2286_v55, 1e-12  ;;  %v2469_v55 = vld [vmem:[%s4785_s6 + $0xb0] sm:$0xff]  ;;  %2605 = vmatpush.msra.mxu2 %v2470_v61 }
 0x326   :  { %v2358_v24 = vmul.f32 %v2879_v22, %v2336_v59  ;;  %vm2363_vm6 = vweird.f32 %v2879_v22 }
 0x327   :  { %2880 = vrcp.f32 %v2337_v13  ;;  %vm2364_vm8 = vmor %vm2362_vm7, %vm2363_vm6  ;;  %v2383_v21 = vand.u32 2147483648, %v2337_v13  ;;  %v2381_v45 = vand.u32 2147483647, %v2337_v13  ;;  %vm2377_vm3 = vweird.f32 %v2337_v13  ;;  %2606 = vmatpush.msra.mxu2 %v2469_v55 }
 0x328   :  { %v2359_v32 = vsub.f32 1.0, %v2358_v24  ;;  %v2473_v24 = vld [vmem:[%s4785_s6 + $0xd0] sm:$0xff] }
 0x329   :  { %v2384_v60 = vor.u32 1.1754944e-38, %v2383_v21  ;;  %vm2382_vm5 = vcmp.eq.f32.partialorder %v2381_v45, 8.507059e+37 }
 0x32a   :  { %v2360_v51 = vmul.f32 %v2879_v22, %v2359_v32 }
 0x32b   :  { %v2244_v28 = vpop.xlane.xlu0 %2243 }
 0x32c   :  { %2882 = vrsqrt.f32 %v2244_v28  ;;  %v2361_v34 = vadd.f32 %v2879_v22, %v2360_v51  ;;  %vm2306_vm6 = vcmp.eq.f32.partialorder %v2244_v28, inf  ;;  %v2309_v0 = vand.u32 2147483648, %v2244_v28  ;;  %v2468_v51 = vld [vmem:[%s4785_s6 + $0xa8] sm:$0xff] }
 0x32d   :  { %v2881_v63 = vpop.eup %2880  ;;  %vm2308_vm7 = vcmp.eq.f32.partialorder %v2244_v28, 0.0  ;;  %2607 = vmatpush.msra.mxu2 %v2468_v51 }
 0x32e   :  { %v2373_v20 = vmul.f32 %v2881_v63, %v2337_v13  ;;  %v2365_v29 = vsel %vm2364_vm8, %v2879_v22, %v2361_v34  ;;  %vm2378_vm2 = vweird.f32 %v2881_v63  ;;  %v2474_v13 = vld [vmem:[%s4785_s6 + $0xd8] sm:$0xff] }
 0x32f   :  { %v2370_v31 = vsel %vm2367_vm9, %v2369_v35, %v2365_v29  ;;  %vm2379_vm4 = vmor %vm2377_vm3, %vm2378_vm2  ;;  %2628 = vmatpush.msra.mxu3 %v2474_v13  ;;  %2608 = vmatpush.msra.mxu2 %v2467_v12 }
 0x330   :  { %v2374_v54 = vsub.f32 1.0, %v2373_v20  ;;  %v2371_v44 = vmul.f32 %v2370_v31, %v4572_v46 }
 0x331   :  { %2629 = vmatpush.msra.mxu3 %v2473_v24 }
 0x332   :  { %v2883_v47 = vpop.eup %2882  ;;  %v2375_v49 = vmul.f32 %v2881_v63, %v2374_v54  ;;  %2792 = vmatmul.msk.f32.vlgmr.msrb.gmra.mxu2 %vm76_vm0, %v2371_v44  ;;  %v2461_v54 = vld [vmem:[%s4785_s6 + $0x70] sm:$0xff]  ;;  %v2460_v44 = vld [vmem:[%s4785_s6 + $0x68] sm:$0xff] }
 0x333   :  { %v2300_v17 = vmul.f32 %v2883_v47, %v2244_v28  ;;  %2630 = vmatpush.msra.mxu3 %v2472_v30  ;;  %2560 = vmatpush.msrb.mxu0 %v2461_v54 }
 0x334   :  { %v2376_v48 = vadd.f32 %v2881_v63, %v2375_v49  ;;  %v2459_v49 = vld [vmem:[%s4785_s6 + $0x60] sm:$0xff] }
 0x335   :  { %v2301_v50 = vmul.f32 %v2883_v47, %v2300_v17  ;;  %2561 = vmatpush.msrb.mxu0 %v2460_v44 }
 0x336   :  { %v2380_v26 = vsel %vm2379_vm4, %v2881_v63, %v2376_v48  ;;  %v2471_v63 = vld [vmem:[%s4785_s6 + $0xc0] sm:$0xff] }
 0x337   :  { %v2302_v25 = vmul.f32 0.5, %v2301_v50  ;;  %v2385_v1 = vsel %vm2382_vm5, %v2384_v60, %v2380_v26  ;;  %2631 = vmatpush.msra.mxu3 %v2471_v63  ;;  %2562 = vmatpush.msrb.mxu0 %v2459_v49 }
 0x338   :  { %v2386_v46 = vmul.f32 %v2385_v1, %v4576_v40  ;;  %v2466_v40 = vld [vmem:[%s4785_s6 + $0x98] sm:$0xff] }
 0x339   :  { %v2303_v15 = vsub.f32 1.5, %v2302_v25  ;;  %2582 = vmatpush.msra.mxu1 %v2466_v40 }
 0x33a   :  { %2793 = vmatmul.msk.f32.vlgmr.msrb.gmra.mxu3 %vm76_vm0, %v2386_v46 }
 0x33b   :  { %v2304_v57 = vmul.f32 %v2883_v47, %v2303_v15  ;;  %2583 = vmatpush.msra.mxu1 %v2465_v38 }
 0x33d   :  { %v2305_v36 = vmul.f32 %v2304_v57, %v2244_v28  ;;  %2584 = vmatpush.msra.mxu1 %v2464_v5 }
 0x33f   :  { %v2307_v11 = vsel %vm2306_vm6, %v2244_v28, %v2305_v36  ;;  %2585 = vmatpush.msra.mxu1 %v2463_v39 }
 0x340   :  { %v2310_v33 = vsel %vm2308_vm7, %v2309_v0, %v2307_v11 }
 0x341   :  { %v2339_v23 = vmax.f32 %v2310_v33, 1e-12 }
 0x343   :  { %2884 = vrcp.f32 %v2339_v23  ;;  %v2413_v18 = vand.u32 2147483648, %v2339_v23  ;;  %v2411_v9 = vand.u32 2147483647, %v2339_v23  ;;  %vm2407_vm9 = vweird.f32 %v2339_v23 }
 0x345   :  { %v2414_v22 = vor.u32 1.1754944e-38, %v2413_v18  ;;  %vm2412_vm3 = vcmp.eq.f32.partialorder %v2411_v9, 8.507059e+37 }
 0x347   :  { %v4684_v19 = vpop.xlane.xlu1 %2246 }
 0x348   :  { %2886 = vrsqrt.f32 %v4684_v19  ;;  %vm2318_vm4 = vcmp.eq.f32.partialorder %v4684_v19, inf  ;;  %v2321_v20 = vand.u32 2147483648, %v4684_v19  ;;  %vm2320_vm5 = vcmp.eq.f32.partialorder %v4684_v19, 0.0 }
 0x349   :  { %v2885_v56 = vpop.eup %2884 }
 0x34a   :  { %v2403_v4 = vmul.f32 %v2885_v56, %v2339_v23  ;;  %vm2408_vm8 = vweird.f32 %v2885_v56 }
 0x34b   :  { %vm2409_vm2 = vmor %vm2407_vm9, %vm2408_vm8 }
 0x34c   :  { %v2404_v6 = vsub.f32 1.0, %v2403_v4 }
 0x34e   :  { %v2887_v58 = vpop.eup %2886  ;;  %v2405_v8 = vmul.f32 %v2885_v56, %v2404_v6 }
 0x34f   :  { %v2312_v59 = vmul.f32 %v2887_v58, %v4684_v19 }
 0x350   :  { %v2406_v62 = vadd.f32 %v2885_v56, %v2405_v8 }
 0x351   :  { %v2313_v7 = vmul.f32 %v2887_v58, %v2312_v59  ;;  %v4700_v27 = vpop.xlane.xlu2 %2249 }
 0x352   :  { %2888 = vrsqrt.f32 %v4700_v27  ;;  %v2410_v37 = vsel %vm2409_vm2, %v2885_v56, %v2406_v62  ;;  %vm2330_vm6 = vcmp.eq.f32.partialorder %v4700_v27, inf  ;;  %v2333_v25 = vand.u32 2147483648, %v4700_v27 }
 0x353   :  { %v2314_v32 = vmul.f32 0.5, %v2313_v7  ;;  %v2415_v28 = vsel %vm2412_vm3, %v2414_v22, %v2410_v37  ;;  %vm2332_vm7 = vcmp.eq.f32.partialorder %v4700_v27, 0.0 }
 0x354   :  { %v2416_v16 = vmul.f32 %v2415_v28, %v4588_v42 }
 0x355   :  { %v2315_v10 = vsub.f32 1.5, %v2314_v32 }
 0x356   :  { %2795 = vmatmul.msk.f32.vlgmr.msra.gmra.mxu1 %vm76_vm0, %v2416_v16 }
 0x357   :  { %v2316_v34 = vmul.f32 %v2887_v58, %v2315_v10 }
 0x358   :  { %v2889_v43 = vpop.eup %2888 }
 0x359   :  { %v2317_v35 = vmul.f32 %v2316_v34, %v4684_v19  ;;  %v2324_v42 = vmul.f32 %v2889_v43, %v4700_v27  ;;  %v2241_v14 = vpop.xlane.xlu2 %2240 }
 0x35a   :  { %2890 = vrsqrt.f32 %v2241_v14  ;;  %vm2294_vm9 = vcmp.eq.f32.partialorder %v2241_v14, inf  ;;  %v2297_v4 = vand.u32 2147483648, %v2241_v14  ;;  %vm2296_vm3 = vcmp.eq.f32.partialorder %v2241_v14, 0.0 }
 0x35b   :  { %v2319_v29 = vsel %vm2318_vm4, %v4684_v19, %v2317_v35  ;;  %v2325_v31 = vmul.f32 %v2889_v43, %v2324_v42 }
 0x35c   :  { %v2322_v53 = vsel %vm2320_vm5, %v2321_v20, %v2319_v29 }
 0x35d   :  { %v2340_v21 = vmax.f32 %v2322_v53, 1e-12  ;;  %v2326_v47 = vmul.f32 0.5, %v2325_v31 }
 0x35f   :  { %2892 = vrcp.f32 %v2340_v21  ;;  %v2327_v45 = vsub.f32 1.5, %v2326_v47  ;;  %v2428_v19 = vand.u32 2147483648, %v2340_v21  ;;  %v2426_v38 = vand.u32 2147483647, %v2340_v21 }
 0x360   :  { %v2891_v17 = vpop.eup %2890  ;;  %vm2422_vm2 = vweird.f32 %v2340_v21 }
 0x361   :  { %v2328_v48 = vmul.f32 %v2889_v43, %v2327_v45  ;;  %v2288_v50 = vmul.f32 %v2891_v17, %v2241_v14  ;;  %v2429_v39 = vor.u32 1.1754944e-38, %v2428_v19  ;;  %vm2427_vm5 = vcmp.eq.f32.partialorder %v2426_v38, 8.507059e+37 }
 0x363   :  { %v2329_v60 = vmul.f32 %v2328_v48, %v4700_v27  ;;  %v2289_v26 = vmul.f32 %v2891_v17, %v2288_v50 }
 0x365   :  { %v2893_v1 = vpop.eup %2892  ;;  %v2331_v46 = vsel %vm2330_vm6, %v4700_v27, %v2329_v60  ;;  %v2290_v15 = vmul.f32 0.5, %v2289_v26 }
 0x366   :  { %v2418_v57 = vmul.f32 %v2893_v1, %v2340_v21  ;;  %v2334_v36 = vsel %vm2332_vm7, %v2333_v25, %v2331_v46  ;;  %vm2423_vm8 = vweird.f32 %v2893_v1 }
 0x367   :  { %v2341_v0 = vmax.f32 %v2334_v36, 1e-12  ;;  %v2291_v11 = vsub.f32 1.5, %v2290_v15  ;;  %vm2424_vm4 = vmor %vm2422_vm2, %vm2423_vm8 }
 0x368   :  { %v2419_v33 = vsub.f32 1.0, %v2418_v57 }
 0x369   :  { %2894 = vrcp.f32 %v2341_v0  ;;  %v2292_v23 = vmul.f32 %v2891_v17, %v2291_v11  ;;  %v2443_v61 = vand.u32 2147483648, %v2341_v0  ;;  %v2441_v22 = vand.u32 2147483647, %v2341_v0 }
 0x36a   :  { %v2420_v40 = vmul.f32 %v2893_v1, %v2419_v33  ;;  %vm2437_vm7 = vweird.f32 %v2341_v0 }
 0x36b   :  { %v2293_v56 = vmul.f32 %v2292_v23, %v2241_v14  ;;  %v2444_v32 = vor.u32 1.1754944e-38, %v2443_v61 }
 0x36c   :  { %v2421_v5 = vadd.f32 %v2893_v1, %v2420_v40 }
 0x36d   :  { %v2295_v6 = vsel %vm2294_vm9, %v2241_v14, %v2293_v56  ;;  %vm2442_vm9 = vcmp.eq.f32.partialorder %v2441_v22, 8.507059e+37 }
 0x36e   :  { %v2298_v58 = vsel %vm2296_vm3, %v2297_v4, %v2295_v6  ;;  %v2425_v8 = vsel %vm2424_vm4, %v2893_v1, %v2421_v5 }
 0x36f   :  { %v2895_v18 = vpop.eup %2894  ;;  %v2338_v59 = vmax.f32 %v2298_v58, 1e-12  ;;  %v2430_v9 = vsel %vm2427_vm5, %v2429_v39, %v2425_v8 }
 0x370   :  { %v2431_v62 = vmul.f32 %v2430_v9, %v4599_v3  ;;  %v2433_v7 = vmul.f32 %v2895_v18, %v2341_v0  ;;  %vm2438_vm6 = vweird.f32 %v2895_v18 }
 0x371   :  { %2896 = vrcp.f32 %v2338_v59  ;;  %vm2439_vm8 = vmor %vm2437_vm7, %vm2438_vm6  ;;  %v2398_v30 = vand.u32 2147483648, %v2338_v59  ;;  %v2396_v16 = vand.u32 2147483647, %v2338_v59  ;;  %vm2392_vm3 = vweird.f32 %v2338_v59 }
 0x372   :  { %2796 = vmatmul.msk.f32.vlgmr.msra.gmra.mxu2 %vm76_vm0, %v2431_v62  ;;  %v2434_v27 = vsub.f32 1.0, %v2433_v7 }
 0x373   :  { %v2399_v63 = vor.u32 1.1754944e-38, %v2398_v30  ;;  %vm2397_vm5 = vcmp.eq.f32.partialorder %v2396_v16, 8.507059e+37 }
 0x374   :  { %v2435_v55 = vmul.f32 %v2895_v18, %v2434_v27 }
 0x376   :  { %v2436_v13 = vadd.f32 %v2895_v18, %v2435_v55 }
 0x377   :  { %v2897_v24 = vpop.eup %2896 }
 0x378   :  { %v2440_v37 = vsel %vm2439_vm8, %v2895_v18, %v2436_v13  ;;  %v2388_v51 = vmul.f32 %v2897_v24, %v2338_v59  ;;  %vm2393_vm2 = vweird.f32 %v2897_v24 }
 0x379   :  { %v2445_v41 = vsel %vm2442_vm9, %v2444_v32, %v2440_v37  ;;  %vm2394_vm4 = vmor %vm2392_vm3, %vm2393_vm2 }
 0x37a   :  { %v2446_v3 = vmul.f32 %v2445_v41, %v4626_v2  ;;  %v2389_v28 = vsub.f32 1.0, %v2388_v51 }
 0x37c   :  { %2797 = vmatmul.msk.f32.vlgmr.msra.gmra.mxu3 %vm76_vm0, %v2446_v3  ;;  %v2390_v10 = vmul.f32 %v2897_v24, %v2389_v28 }
 0x37e   :  { %v2391_v12 = vadd.f32 %v2897_v24, %v2390_v10 }
 0x380   :  { %v2395_v34 = vsel %vm2394_vm4, %v2897_v24, %v2391_v12 }
 0x381   :  { %v2400_v43 = vsel %vm2397_vm5, %v2399_v63, %v2395_v34 }
 0x382   :  { %v2401_v35 = vmul.f32 %v2400_v43, %v4636_v52 }
 0x384   :  { %2794 = vmatmul.msk.f32.vlgmr.msrb.gmra.mxu0 %vm76_vm0, %v2401_v35  ;;  %vm2683_vm0 = vcmask 129024  }
 0x393   :  { %v2495_v42 = vpop.f32.mrf.mxu1 }
 0x3b5   :  { %v2518_v2 = vpop.f32.mrf.mxu2 }
 0x3b6   :  { %v2670_v20 = vrot.slane %v2518_v2, 7 }
 0x3b8   :  { %v2671_v44 = vsel %vm1441_vm1, %v2670_v20, %v2495_v42  ;;  %v2696_v21 = vsel %vm2646_vm10, %v2670_v20, %v2495_v42  ;;  %vm2704_vm1 = vcmask 130049  }
 0x3bd   :  { %v2541_v14 = vpop.f32.mrf.mxu3 }
 0x3be   :  { %v2672_v29 = vrot.slane %v2541_v14, 6 }
 0x3c0   :  { %v2673_v45 = vsel %vm2646_vm10, %v2672_v29, %v2671_v44  ;;  %v2697_v52 = vsel %vm2649_vm11, %v2672_v29, %v2696_v21 }
 0x3d3   :  { %v2587_v31 = vpop.f32.mrf.mxu1 }
 0x3d4   :  { %v2676_v17 = vrot.slane %v2587_v31, 4 }
 0x3f5   :  { %v2610_v53 = vpop.f32.mrf.mxu2 }
 0x3f6   :  { %v2678_v48 = vrot.slane %v2610_v53, 3 }
 0x3ff   :  { %v2633_v47 = vpop.f32.mrf.mxu3 }
 0x400   :  { %v2680_v26 = vrot.slane %v2633_v47, 2 }
 0x401   :  { %v2564_v54 = vpop.f32.mrf.mxu0 }
 0x402   :  { %v2674_v49 = vrot.slane %v2564_v54, 5 }
 0x404   :  { %v2675_v50 = vsel %vm2649_vm11, %v2674_v49, %v2673_v45  ;;  %v2698_v60 = vsel %vm2652_vm12, %v2674_v49, %v2697_v52 }
 0x405   :  { %v2677_v25 = vsel %vm2652_vm12, %v2676_v17, %v2675_v50  ;;  %v2699_v1 = vsel %vm2655_vm13, %v2676_v17, %v2698_v60 }
 0x406   :  { %v2679_v46 = vsel %vm2655_vm13, %v2678_v48, %v2677_v25  ;;  %v2700_v15 = vsel %vm2658_vm14, %v2678_v48, %v2699_v1 }
 0x407   :  { %v2681_v57 = vsel %vm2658_vm14, %v2680_v26, %v2679_v46  ;;  %v2701_v36 = vsel %vm2690_vm15, %v2680_v26, %v2700_v15 }
 0x408   :  { %2684 = vst.msk [vmem:[%s4786_s10] sm:$0x7f] %vm2683_vm0, %v2681_v57 }
 0x409   :  { %2799 = vst.msk [vmem:[%s4786_s10 + $0x7] sm:$0xfe] %vm2704_vm1, %v2701_v36 }

</bundles_post_ra>
